<compile_context>
chip_gen: v5e
topology: v5e:2x2
jax: 0.10.0
libtpu: 0.0.40
codegen_flags: <defaults>
</compile_context>

<pallas_src>
import functools

import jax
import jax.numpy as jnp
from jax.experimental import pallas as pl
from jax.experimental.pallas import tpu as pltpu


def _round_up(x, m):
    return (x + m - 1) // m * m


# ----------------------------------------------------------------------------
# Pallas kernel: fused matmul (bf16 x bf16 -> f32) + bias + (optional) ReLU
# ----------------------------------------------------------------------------
def _matmul_bias_act_kernel(x_ref, w_ref, b_ref, o_ref, *, apply_relu):
    acc = jnp.dot(x_ref[...], w_ref[...], preferred_element_type=jnp.float32)
    acc = acc + b_ref[...]                      # f32 epilogue
    if apply_relu:
        acc = jnp.maximum(acc, 0.0)
    o_ref[...] = acc.astype(o_ref.dtype)


def matmul_bias_act(x, w, b, *, apply_relu, out_dtype=jnp.bfloat16, tile_m=256):
    """y = relu?(x @ w + b).

    x: (M, K) any float dtype (cast to bf16 here)
    w: (K, Np) bf16 with Np % 128 == 0 (already channel-padded)
    b: (cout,) f32, cout <= Np  (padded to Np here)
    returns (M, Np) in `out_dtype`.
    """
    M, K = x.shape
    Kw, Np = w.shape
    assert K == Kw and Np % 128 == 0

    # M tiling: multiple of 16 (bf16 sublane packing), capped at tile_m.
    m_min = _round_up(M, 16)
    tm = min(tile_m, m_min)
    Mp = _round_up(M, tm)

    x = x.astype(jnp.bfloat16)
    if Mp != M:
        x = jnp.pad(x, ((0, Mp - M), (0, 0)))
    b_row = jnp.pad(b.astype(jnp.float32), (0, Np - b.shape[0])).reshape(1, Np)

    grid = (Mp // tm,)
    out_bytes = jnp.dtype(out_dtype).itemsize
    cost = pl.CostEstimate(
        flops=2 * Mp * K * Np,
        transcendentals=0,
        bytes_accessed=Mp * K * 2 + K * Np * 2 + Np * 4 + Mp * Np * out_bytes,
    )
    # VMEM: double-buffered x/out tiles + resident weight/bias (x2 margin).
    need = 2 * (tm * K * 2) + 2 * (tm * Np * out_bytes) + 2 * (K * Np * 2) + 2 * Np * 4
    vmem_limit = int(min(48 * 2**20, max(8 * 2**20, 2 * need)))

    kernel = functools.partial(_matmul_bias_act_kernel, apply_relu=apply_relu)
    out = pl.pallas_call(
        kernel,
        out_shape=jax.ShapeDtypeStruct((Mp, Np), out_dtype),
        grid=grid,
        in_specs=[
            pl.BlockSpec((tm, K), lambda i: (i, 0)),    # streamed cols tile
            pl.BlockSpec((K, Np), lambda i: (0, 0)),    # resident weight
            pl.BlockSpec((1, Np), lambda i: (0, 0)),    # resident bias
        ],
        out_specs=pl.BlockSpec((tm, Np), lambda i: (i, 0)),
        compiler_params=pltpu.CompilerParams(
            dimension_semantics=("parallel",),
            vmem_limit_bytes=vmem_limit,
        ),
        cost_estimate=cost,
    )(x, w, b_row)
    return out[:M]


# ----------------------------------------------------------------------------
# im2col / dilation glue (plain JAX, done in bf16)
# ----------------------------------------------------------------------------
def _im2col(x, k, stride):
    """x: (N, H, W, C) already padded -> ((N*OH*OW, k*k*C), (N, OH, OW))."""
    N, H, W, C = x.shape
    OH = (H - k) // stride + 1
    OW = (W - k) // stride + 1
    patches = []
    for dh in range(k):
        for dw in range(k):
            patches.append(
                x[:, dh:dh + stride * OH:stride, dw:dw + stride * OW:stride, :]
            )
    cols = jnp.concatenate(patches, axis=-1)           # (N, OH, OW, k*k*C), (dh,dw,c) order
    return cols.reshape(N * OH * OW, k * k * C), (N, OH, OW)


def _dilate(x, s):
    if s == 1:
        return x
    N, H, W, C = x.shape
    out = jnp.zeros((N, (H - 1) * s + 1, (W - 1) * s + 1, C), x.dtype)
    return out.at[:, ::s, ::s, :].set(x)


# ----------------------------------------------------------------------------
# Conv2d / ConvTranspose2d built on the Pallas GEMM kernel
# ----------------------------------------------------------------------------
def conv2d(x, w_mat, b, *, k, stride, padding, relu, out_dtype=jnp.bfloat16):
    """x: NHWC. w_mat: (k*k*cin, Np) bf16 (prepared). b: (cout,) f32."""
    cout = b.shape[0]
    x = x.astype(jnp.bfloat16)
    if padding:
        x = jnp.pad(x, ((0, 0), (padding, padding), (padding, padding), (0, 0)))
    cols, (N, OH, OW) = _im2col(x, k, stride)
    y = matmul_bias_act(cols, w_mat, b, apply_relu=relu, out_dtype=out_dtype)
    return y[:, :cout].reshape(N, OH, OW, cout)


def conv_transpose2d(x, w_mat, b, *, k, stride, padding, output_padding, relu,
                     out_dtype=jnp.bfloat16):
    """x: NHWC. w_mat: prepared (flipped/transposed) (k*k*cin, Np) bf16."""
    cout = b.shape[0]
    x = x.astype(jnp.bfloat16)
    xd = _dilate(x, stride)
    lo = k - 1 - padding
    hi = k - 1 - padding + output_padding
    x_p = jnp.pad(xd, ((0, 0), (lo, hi), (lo, hi), (0, 0)))
    cols, (N, OH, OW) = _im2col(x_p, k, 1)   # transposed conv == stride-1 conv
    y = matmul_bias_act(cols, w_mat, b, apply_relu=relu, out_dtype=out_dtype)
    return y[:, :cout].reshape(N, OH, OW, cout)


# ----------------------------------------------------------------------------
# Parameter init (PyTorch layouts) + one-time GEMM-ready preparation
# ----------------------------------------------------------------------------
def init_params(key):
    def conv_w(key, cout, cin, k):
        scale = 1.0 / jnp.sqrt(cin * k * k)
        return scale * jax.random.normal(key, (cout, cin, k, k), jnp.float32)

    def deconv_w(key, cin, cout, k):
        scale = 1.0 / jnp.sqrt(cout * k * k)
        return scale * jax.random.normal(key, (cin, cout, k, k), jnp.float32)

    keys = jax.random.split(key, 12)
    return {
        # encoder
        "e1_w": conv_w(keys[0], 64, 3, 3),    "e1_b": 0.01 * jax.random.normal(keys[1], (64,), jnp.float32),
        "e2_w": conv_w(keys[2], 128, 64, 3),  "e2_b": 0.01 * jax.random.normal(keys[3], (128,), jnp.float32),
        "e3_w": conv_w(keys[4], 256, 128, 3), "e3_b": 0.01 * jax.random.normal(keys[5], (256,), jnp.float32),
        # decoder
        "d1_w": deconv_w(keys[6], 256, 128, 3), "d1_b": 0.01 * jax.random.normal(keys[7], (128,), jnp.float32),
        "d2_w": deconv_w(keys[8], 128, 64, 3),  "d2_b": 0.01 * jax.random.normal(keys[9], (64,), jnp.float32),
        "d3_w": deconv_w(keys[10], 64, 3, 3),   "d3_b": 0.01 * jax.random.normal(keys[11], (3,), jnp.float32),
    }


def _prep_conv(w_pt, b):
    """PyTorch Conv2d weight (Cout, Cin, kH, kW) -> (k*k*Cin, Np) bf16, b f32."""
    cout, cin, k, _ = w_pt.shape
    w_mat = jnp.transpose(w_pt, (2, 3, 1, 0)).reshape(k * k * cin, cout)
    n_pad = _round_up(cout, 128)
    w_mat = jnp.pad(w_mat, ((0, 0), (0, n_pad - cout))).astype(jnp.bfloat16)
    return w_mat, b.astype(jnp.float32)


def _prep_deconv(w_pt, b):
    """PyTorch ConvTranspose2d weight (Cin, Cout, kH, kW) -> flipped GEMM form."""
    cin, cout, k, _ = w_pt.shape
    w_flip = w_pt[:, :, ::-1, ::-1]
    w_mat = jnp.transpose(w_flip, (2, 3, 0, 1)).reshape(k * k * cin, cout)
    n_pad = _round_up(cout, 128)
    w_mat = jnp.pad(w_mat, ((0, 0), (0, n_pad - cout))).astype(jnp.bfloat16)
    return w_mat, b.astype(jnp.float32)


def prepare_params(p):
    return {
        "e1": _prep_conv(p["e1_w"], p["e1_b"]),
        "e2": _prep_conv(p["e2_w"], p["e2_b"]),
        "e3": _prep_conv(p["e3_w"], p["e3_b"]),
        "d1": _prep_deconv(p["d1_w"], p["d1_b"]),
        "d2": _prep_deconv(p["d2_w"], p["d2_b"]),
        "d3": _prep_deconv(p["d3_w"], p["d3_b"]),
    }


# ----------------------------------------------------------------------------
# Forward pass (matches Autoencoder.forward)
# ----------------------------------------------------------------------------
def autoencoder_forward(gp, x_nchw):
    x = jnp.transpose(x_nchw, (0, 2, 3, 1))   # NCHW -> NHWC

    # encoder
    h = conv2d(x, *gp["e1"], k=3, stride=2, padding=1, relu=True)
    h = conv2d(h, *gp["e2"], k=3, stride=2, padding=1, relu=True)
    latent = conv2d(h, *gp["e3"], k=3, stride=1, padding=0, relu=False)

    # decoder
    d = conv_transpose2d(latent, *gp["d1"], k=3, stride=1, padding=0,
                         output_padding=0, relu=True)
    d = conv_transpose2d(d, *gp["d2"], k=3, stride=2, padding=1,
                         output_padding=1, relu=True)
    recon = conv_transpose2d(d, *gp["d3"], k=3, stride=2, padding=1,
                             output_padding=1, relu=False, out_dtype=jnp.float32)

    return jnp.transpose(recon, (0, 3, 1, 2))   # NHWC -> NCHW


if __name__ == "__main__":
    x = jax.random.normal(jax.random.PRNGKey(0), (2, 3, 16, 16), jnp.float32)  # NCHW
    params = init_params(jax.random.PRNGKey(42))
    gemm_params = prepare_params(params)   # one-time weight prep (bf16, padded)

    fwd = jax.jit(autoencoder_forward)
    out = jax.block_until_ready(fwd(gemm_params, x))

    assert out.shape == (2, 3, 16, 16), out.shape
    assert out.dtype == jnp.float32
    print("KERNEL_OK")
</pallas_src>

<mosaic_0001>
module attributes {stable_mosaic.version = 11 : i64} {
  func.func @_matmul_bias_act_kernel(%arg0: i32, %arg1: memref<128x27xbf16, #tpu.memory_space<vmem>>, %arg2: memref<27x128xbf16, #tpu.memory_space<vmem>>, %arg3: memref<1x128xf32, #tpu.memory_space<vmem>>, %arg4: memref<128x128xbf16, #tpu.memory_space<vmem>>) attributes {dimension_semantics = [#tpu.dimension_semantics<parallel>], iteration_bounds = array<i64: 1>, scalar_prefetch = 0 : i64, scratch_operands = 0 : i64, tpu.core_type = #tpu.core_type<tc>, window_params = [{transform_indices = @transform_0, window_bounds = array<i64: 128, 27>}, {pipeline_mode = #tpu.pipeline_mode<synchronous>, transform_indices = @transform_1, window_bounds = array<i64: 27, 128>}, {pipeline_mode = #tpu.pipeline_mode<synchronous>, transform_indices = @transform_2, window_bounds = array<i64: 1, 128>}, {transform_indices = @transform_3, window_bounds = array<i64: 128, 128>}]} {
    %c0 = arith.constant 0 : index
    %c0_0 = arith.constant 0 : index
    %0 = vector.load %arg1[%c0, %c0_0] : memref<128x27xbf16, #tpu.memory_space<vmem>>, vector<128x27xbf16>
    %c0_1 = arith.constant 0 : index
    %c0_2 = arith.constant 0 : index
    %1 = vector.load %arg2[%c0_1, %c0_2] : memref<27x128xbf16, #tpu.memory_space<vmem>>, vector<27x128xbf16>
    %cst = arith.constant dense<0.000000e+00> : vector<128x128xf32>
    %2 = tpu.matmul %0, %1, %cst {dimension_numbers = #tpu.dot_dimension_numbers<[1], [0], [0], [1], [0, 0, 1, 1], [], []>} : vector<128x27xbf16>, vector<27x128xbf16>, vector<128x128xf32> -> vector<128x128xf32>
    %c0_3 = arith.constant 0 : index
    %c0_4 = arith.constant 0 : index
    %3 = vector.load %arg3[%c0_3, %c0_4] : memref<1x128xf32, #tpu.memory_space<vmem>>, vector<1x128xf32>
    %4 = vector.broadcast %3 : vector<1x128xf32> to vector<128x128xf32>
    %5 = arith.addf %2, %4 : vector<128x128xf32>
    %cst_5 = arith.constant 0.000000e+00 : f32
    %6 = vector.broadcast %cst_5 : f32 to vector<128x128xf32>
    %7 = arith.maximumf %5, %6 : vector<128x128xf32>
    %8 = arith.truncf %7 : vector<128x128xf32> to vector<128x128xbf16>
    %c0_6 = arith.constant 0 : index
    %c0_7 = arith.constant 0 : index
    %9 = vector.load %arg4[%c0_6, %c0_7] : memref<128x128xbf16, #tpu.memory_space<vmem>>, vector<128x128xbf16>
    tpu.vector_store %arg4[%c0_6, %c0_7], %8 {strides = array<i32>} : memref<128x128xbf16, #tpu.memory_space<vmem>>, vector<128x128xbf16>,
    return
  }
  func.func @transform_0(%arg0: i32) -> (i32, i32) {
    %c0_i32 = arith.constant 0 : i32
    %c0_i32_0 = arith.constant 0 : i32
    return %arg0, %c0_i32 : i32, i32
  }
  func.func @transform_1(%arg0: i32) -> (i32, i32) {
    %c0_i32 = arith.constant 0 : i32
    %c0_i32_0 = arith.constant 0 : i32
    %c0_i32_1 = arith.constant 0 : i32
    return %c0_i32, %c0_i32_0 : i32, i32
  }
  func.func @transform_2(%arg0: i32) -> (i32, i32) {
    %c0_i32 = arith.constant 0 : i32
    %c0_i32_0 = arith.constant 0 : i32
    %c0_i32_1 = arith.constant 0 : i32
    return %c0_i32, %c0_i32_0 : i32, i32
  }
  func.func @transform_3(%arg0: i32) -> (i32, i32) {
    %c0_i32 = arith.constant 0 : i32
    %c0_i32_0 = arith.constant 0 : i32
    return %arg0, %c0_i32 : i32, i32
  }
}

module attributes {stable_mosaic.version = 11 : i64} {
  func.func @_matmul_bias_act_kernel(%arg0: i32, %arg1: memref<32x576xbf16, #tpu.memory_space<vmem>>, %arg2: memref<576x128xbf16, #tpu.memory_space<vmem>>, %arg3: memref<1x128xf32, #tpu.memory_space<vmem>>, %arg4: memref<32x128xbf16, #tpu.memory_space<vmem>>) attributes {dimension_semantics = [#tpu.dimension_semantics<parallel>], iteration_bounds = array<i64: 1>, scalar_prefetch = 0 : i64, scratch_operands = 0 : i64, tpu.core_type = #tpu.core_type<tc>, window_params = [{transform_indices = @transform_0, window_bounds = array<i64: 32, 576>}, {pipeline_mode = #tpu.pipeline_mode<synchronous>, transform_indices = @transform_1, window_bounds = array<i64: 576, 128>}, {pipeline_mode = #tpu.pipeline_mode<synchronous>, transform_indices = @transform_2, window_bounds = array<i64: 1, 128>}, {transform_indices = @transform_3, window_bounds = array<i64: 32, 128>}]} {
    %c0 = arith.constant 0 : index
    %c0_0 = arith.constant 0 : index
    %0 = vector.load %arg1[%c0, %c0_0] : memref<32x576xbf16, #tpu.memory_space<vmem>>, vector<32x576xbf16>
    %c0_1 = arith.constant 0 : index
    %c0_2 = arith.constant 0 : index
    %1 = vector.load %arg2[%c0_1, %c0_2] : memref<576x128xbf16, #tpu.memory_space<vmem>>, vector<576x128xbf16>
    %cst = arith.constant dense<0.000000e+00> : vector<32x128xf32>
    %2 = tpu.matmul %0, %1, %cst {dimension_numbers = #tpu.dot_dimension_numbers<[1], [0], [0], [1], [0, 0, 1, 1], [], []>} : vector<32x576xbf16>, vector<576x128xbf16>, vector<32x128xf32> -> vector<32x128xf32>
    %c0_3 = arith.constant 0 : index
    %c0_4 = arith.constant 0 : index
    %3 = vector.load %arg3[%c0_3, %c0_4] : memref<1x128xf32, #tpu.memory_space<vmem>>, vector<1x128xf32>
    %4 = vector.broadcast %3 : vector<1x128xf32> to vector<32x128xf32>
    %5 = arith.addf %2, %4 : vector<32x128xf32>
    %cst_5 = arith.constant 0.000000e+00 : f32
    %6 = vector.broadcast %cst_5 : f32 to vector<32x128xf32>
    %7 = arith.maximumf %5, %6 : vector<32x128xf32>
    %8 = arith.truncf %7 : vector<32x128xf32> to vector<32x128xbf16>
    %c0_6 = arith.constant 0 : index
    %c0_7 = arith.constant 0 : index
    %9 = vector.load %arg4[%c0_6, %c0_7] : memref<32x128xbf16, #tpu.memory_space<vmem>>, vector<32x128xbf16>
    tpu.vector_store %arg4[%c0_6, %c0_7], %8 {strides = array<i32>} : memref<32x128xbf16, #tpu.memory_space<vmem>>, vector<32x128xbf16>,
    return
  }
  func.func @transform_0(%arg0: i32) -> (i32, i32) {
    %c0_i32 = arith.constant 0 : i32
    %c0_i32_0 = arith.constant 0 : i32
    return %arg0, %c0_i32 : i32, i32
  }
  func.func @transform_1(%arg0: i32) -> (i32, i32) {
    %c0_i32 = arith.constant 0 : i32
    %c0_i32_0 = arith.constant 0 : i32
    %c0_i32_1 = arith.constant 0 : i32
    return %c0_i32, %c0_i32_0 : i32, i32
  }
  func.func @transform_2(%arg0: i32) -> (i32, i32) {
    %c0_i32 = arith.constant 0 : i32
    %c0_i32_0 = arith.constant 0 : i32
    %c0_i32_1 = arith.constant 0 : i32
    return %c0_i32, %c0_i32_0 : i32, i32
  }
  func.func @transform_3(%arg0: i32) -> (i32, i32) {
    %c0_i32 = arith.constant 0 : i32
    %c0_i32_0 = arith.constant 0 : i32
    return %arg0, %c0_i32 : i32, i32
  }
}

module attributes {stable_mosaic.version = 11 : i64} {
  func.func @_matmul_bias_act_kernel(%arg0: i32, %arg1: memref<16x1152xbf16, #tpu.memory_space<vmem>>, %arg2: memref<1152x256xbf16, #tpu.memory_space<vmem>>, %arg3: memref<1x256xf32, #tpu.memory_space<vmem>>, %arg4: memref<16x256xbf16, #tpu.memory_space<vmem>>) attributes {dimension_semantics = [#tpu.dimension_semantics<parallel>], iteration_bounds = array<i64: 1>, scalar_prefetch = 0 : i64, scratch_operands = 0 : i64, tpu.core_type = #tpu.core_type<tc>, window_params = [{transform_indices = @transform_0, window_bounds = array<i64: 16, 1152>}, {pipeline_mode = #tpu.pipeline_mode<synchronous>, transform_indices = @transform_1, window_bounds = array<i64: 1152, 256>}, {pipeline_mode = #tpu.pipeline_mode<synchronous>, transform_indices = @transform_2, window_bounds = array<i64: 1, 256>}, {transform_indices = @transform_3, window_bounds = array<i64: 16, 256>}]} {
    %c0 = arith.constant 0 : index
    %c0_0 = arith.constant 0 : index
    %0 = vector.load %arg1[%c0, %c0_0] : memref<16x1152xbf16, #tpu.memory_space<vmem>>, vector<16x1152xbf16>
    %c0_1 = arith.constant 0 : index
    %c0_2 = arith.constant 0 : index
    %1 = vector.load %arg2[%c0_1, %c0_2] : memref<1152x256xbf16, #tpu.memory_space<vmem>>, vector<1152x256xbf16>
    %cst = arith.constant dense<0.000000e+00> : vector<16x256xf32>
    %2 = tpu.matmul %0, %1, %cst {dimension_numbers = #tpu.dot_dimension_numbers<[1], [0], [0], [1], [0, 0, 1, 1], [], []>} : vector<16x1152xbf16>, vector<1152x256xbf16>, vector<16x256xf32> -> vector<16x256xf32>
    %c0_3 = arith.constant 0 : index
    %c0_4 = arith.constant 0 : index
    %3 = vector.load %arg3[%c0_3, %c0_4] : memref<1x256xf32, #tpu.memory_space<vmem>>, vector<1x256xf32>
    %4 = vector.broadcast %3 : vector<1x256xf32> to vector<16x256xf32>
    %5 = arith.addf %2, %4 : vector<16x256xf32>
    %6 = arith.truncf %5 : vector<16x256xf32> to vector<16x256xbf16>
    %c0_5 = arith.constant 0 : index
    %c0_6 = arith.constant 0 : index
    %7 = vector.load %arg4[%c0_5, %c0_6] : memref<16x256xbf16, #tpu.memory_space<vmem>>, vector<16x256xbf16>
    tpu.vector_store %arg4[%c0_5, %c0_6], %6 {strides = array<i32>} : memref<16x256xbf16, #tpu.memory_space<vmem>>, vector<16x256xbf16>,
    return
  }
  func.func @transform_0(%arg0: i32) -> (i32, i32) {
    %c0_i32 = arith.constant 0 : i32
    %c0_i32_0 = arith.constant 0 : i32
    return %arg0, %c0_i32 : i32, i32
  }
  func.func @transform_1(%arg0: i32) -> (i32, i32) {
    %c0_i32 = arith.constant 0 : i32
    %c0_i32_0 = arith.constant 0 : i32
    %c0_i32_1 = arith.constant 0 : i32
    return %c0_i32, %c0_i32_0 : i32, i32
  }
  func.func @transform_2(%arg0: i32) -> (i32, i32) {
    %c0_i32 = arith.constant 0 : i32
    %c0_i32_0 = arith.constant 0 : i32
    %c0_i32_1 = arith.constant 0 : i32
    return %c0_i32, %c0_i32_0 : i32, i32
  }
  func.func @transform_3(%arg0: i32) -> (i32, i32) {
    %c0_i32 = arith.constant 0 : i32
    %c0_i32_0 = arith.constant 0 : i32
    return %arg0, %c0_i32 : i32, i32
  }
}

module attributes {stable_mosaic.version = 11 : i64} {
  func.func @_matmul_bias_act_kernel(%arg0: i32, %arg1: memref<32x2304xbf16, #tpu.memory_space<vmem>>, %arg2: memref<2304x128xbf16, #tpu.memory_space<vmem>>, %arg3: memref<1x128xf32, #tpu.memory_space<vmem>>, %arg4: memref<32x128xbf16, #tpu.memory_space<vmem>>) attributes {dimension_semantics = [#tpu.dimension_semantics<parallel>], iteration_bounds = array<i64: 1>, scalar_prefetch = 0 : i64, scratch_operands = 0 : i64, tpu.core_type = #tpu.core_type<tc>, window_params = [{transform_indices = @transform_0, window_bounds = array<i64: 32, 2304>}, {pipeline_mode = #tpu.pipeline_mode<synchronous>, transform_indices = @transform_1, window_bounds = array<i64: 2304, 128>}, {pipeline_mode = #tpu.pipeline_mode<synchronous>, transform_indices = @transform_2, window_bounds = array<i64: 1, 128>}, {transform_indices = @transform_3, window_bounds = array<i64: 32, 128>}]} {
    %c0 = arith.constant 0 : index
    %c0_0 = arith.constant 0 : index
    %0 = vector.load %arg1[%c0, %c0_0] : memref<32x2304xbf16, #tpu.memory_space<vmem>>, vector<32x2304xbf16>
    %c0_1 = arith.constant 0 : index
    %c0_2 = arith.constant 0 : index
    %1 = vector.load %arg2[%c0_1, %c0_2] : memref<2304x128xbf16, #tpu.memory_space<vmem>>, vector<2304x128xbf16>
    %cst = arith.constant dense<0.000000e+00> : vector<32x128xf32>
    %2 = tpu.matmul %0, %1, %cst {dimension_numbers = #tpu.dot_dimension_numbers<[1], [0], [0], [1], [0, 0, 1, 1], [], []>} : vector<32x2304xbf16>, vector<2304x128xbf16>, vector<32x128xf32> -> vector<32x128xf32>
    %c0_3 = arith.constant 0 : index
    %c0_4 = arith.constant 0 : index
    %3 = vector.load %arg3[%c0_3, %c0_4] : memref<1x128xf32, #tpu.memory_space<vmem>>, vector<1x128xf32>
    %4 = vector.broadcast %3 : vector<1x128xf32> to vector<32x128xf32>
    %5 = arith.addf %2, %4 : vector<32x128xf32>
    %cst_5 = arith.constant 0.000000e+00 : f32
    %6 = vector.broadcast %cst_5 : f32 to vector<32x128xf32>
    %7 = arith.maximumf %5, %6 : vector<32x128xf32>
    %8 = arith.truncf %7 : vector<32x128xf32> to vector<32x128xbf16>
    %c0_6 = arith.constant 0 : index
    %c0_7 = arith.constant 0 : index
    %9 = vector.load %arg4[%c0_6, %c0_7] : memref<32x128xbf16, #tpu.memory_space<vmem>>, vector<32x128xbf16>
    tpu.vector_store %arg4[%c0_6, %c0_7], %8 {strides = array<i32>} : memref<32x128xbf16, #tpu.memory_space<vmem>>, vector<32x128xbf16>,
    return
  }
  func.func @transform_0(%arg0: i32) -> (i32, i32) {
    %c0_i32 = arith.constant 0 : i32
    %c0_i32_0 = arith.constant 0 : i32
    return %arg0, %c0_i32 : i32, i32
  }
  func.func @transform_1(%arg0: i32) -> (i32, i32) {
    %c0_i32 = arith.constant 0 : i32
    %c0_i32_0 = arith.constant 0 : i32
    %c0_i32_1 = arith.constant 0 : i32
    return %c0_i32, %c0_i32_0 : i32, i32
  }
  func.func @transform_2(%arg0: i32) -> (i32, i32) {
    %c0_i32 = arith.constant 0 : i32
    %c0_i32_0 = arith.constant 0 : i32
    %c0_i32_1 = arith.constant 0 : i32
    return %c0_i32, %c0_i32_0 : i32, i32
  }
  func.func @transform_3(%arg0: i32) -> (i32, i32) {
    %c0_i32 = arith.constant 0 : i32
    %c0_i32_0 = arith.constant 0 : i32
    return %arg0, %c0_i32 : i32, i32
  }
}

module attributes {stable_mosaic.version = 11 : i64} {
  func.func @_matmul_bias_act_kernel(%arg0: i32, %arg1: memref<128x1152xbf16, #tpu.memory_space<vmem>>, %arg2: memref<1152x128xbf16, #tpu.memory_space<vmem>>, %arg3: memref<1x128xf32, #tpu.memory_space<vmem>>, %arg4: memref<128x128xbf16, #tpu.memory_space<vmem>>) attributes {dimension_semantics = [#tpu.dimension_semantics<parallel>], iteration_bounds = array<i64: 1>, scalar_prefetch = 0 : i64, scratch_operands = 0 : i64, tpu.core_type = #tpu.core_type<tc>, window_params = [{transform_indices = @transform_0, window_bounds = array<i64: 128, 1152>}, {pipeline_mode = #tpu.pipeline_mode<synchronous>, transform_indices = @transform_1, window_bounds = array<i64: 1152, 128>}, {pipeline_mode = #tpu.pipeline_mode<synchronous>, transform_indices = @transform_2, window_bounds = array<i64: 1, 128>}, {transform_indices = @transform_3, window_bounds = array<i64: 128, 128>}]} {
    %c0 = arith.constant 0 : index
    %c0_0 = arith.constant 0 : index
    %0 = vector.load %arg1[%c0, %c0_0] : memref<128x1152xbf16, #tpu.memory_space<vmem>>, vector<128x1152xbf16>
    %c0_1 = arith.constant 0 : index
    %c0_2 = arith.constant 0 : index
    %1 = vector.load %arg2[%c0_1, %c0_2] : memref<1152x128xbf16, #tpu.memory_space<vmem>>, vector<1152x128xbf16>
    %cst = arith.constant dense<0.000000e+00> : vector<128x128xf32>
    %2 = tpu.matmul %0, %1, %cst {dimension_numbers = #tpu.dot_dimension_numbers<[1], [0], [0], [1], [0, 0, 1, 1], [], []>} : vector<128x1152xbf16>, vector<1152x128xbf16>, vector<128x128xf32> -> vector<128x128xf32>
    %c0_3 = arith.constant 0 : index
    %c0_4 = arith.constant 0 : index
    %3 = vector.load %arg3[%c0_3, %c0_4] : memref<1x128xf32, #tpu.memory_space<vmem>>, vector<1x128xf32>
    %4 = vector.broadcast %3 : vector<1x128xf32> to vector<128x128xf32>
    %5 = arith.addf %2, %4 : vector<128x128xf32>
    %cst_5 = arith.constant 0.000000e+00 : f32
    %6 = vector.broadcast %cst_5 : f32 to vector<128x128xf32>
    %7 = arith.maximumf %5, %6 : vector<128x128xf32>
    %8 = arith.truncf %7 : vector<128x128xf32> to vector<128x128xbf16>
    %c0_6 = arith.constant 0 : index
    %c0_7 = arith.constant 0 : index
    %9 = vector.load %arg4[%c0_6, %c0_7] : memref<128x128xbf16, #tpu.memory_space<vmem>>, vector<128x128xbf16>
    tpu.vector_store %arg4[%c0_6, %c0_7], %8 {strides = array<i32>} : memref<128x128xbf16, #tpu.memory_space<vmem>>, vector<128x128xbf16>,
    return
  }
  func.func @transform_0(%arg0: i32) -> (i32, i32) {
    %c0_i32 = arith.constant 0 : i32
    %c0_i32_0 = arith.constant 0 : i32
    return %arg0, %c0_i32 : i32, i32
  }
  func.func @transform_1(%arg0: i32) -> (i32, i32) {
    %c0_i32 = arith.constant 0 : i32
    %c0_i32_0 = arith.constant 0 : i32
    %c0_i32_1 = arith.constant 0 : i32
    return %c0_i32, %c0_i32_0 : i32, i32
  }
  func.func @transform_2(%arg0: i32) -> (i32, i32) {
    %c0_i32 = arith.constant 0 : i32
    %c0_i32_0 = arith.constant 0 : i32
    %c0_i32_1 = arith.constant 0 : i32
    return %c0_i32, %c0_i32_0 : i32, i32
  }
  func.func @transform_3(%arg0: i32) -> (i32, i32) {
    %c0_i32 = arith.constant 0 : i32
    %c0_i32_0 = arith.constant 0 : i32
    return %arg0, %c0_i32 : i32, i32
  }
}

module attributes {stable_mosaic.version = 11 : i64} {
  func.func @_matmul_bias_act_kernel(%arg0: i32, %arg1: memref<256x576xbf16, #tpu.memory_space<vmem>>, %arg2: memref<576x128xbf16, #tpu.memory_space<vmem>>, %arg3: memref<1x128xf32, #tpu.memory_space<vmem>>, %arg4: memref<256x128xf32, #tpu.memory_space<vmem>>) attributes {dimension_semantics = [#tpu.dimension_semantics<parallel>], iteration_bounds = array<i64: 2>, scalar_prefetch = 0 : i64, scratch_operands = 0 : i64, tpu.core_type = #tpu.core_type<tc>, window_params = [{transform_indices = @transform_0, window_bounds = array<i64: 256, 576>}, {pipeline_mode = #tpu.pipeline_mode<synchronous>, transform_indices = @transform_1, window_bounds = array<i64: 576, 128>}, {pipeline_mode = #tpu.pipeline_mode<synchronous>, transform_indices = @transform_2, window_bounds = array<i64: 1, 128>}, {transform_indices = @transform_3, window_bounds = array<i64: 256, 128>}]} {
    %c0 = arith.constant 0 : index
    %c0_0 = arith.constant 0 : index
    %0 = vector.load %arg1[%c0, %c0_0] : memref<256x576xbf16, #tpu.memory_space<vmem>>, vector<256x576xbf16>
    %c0_1 = arith.constant 0 : index
    %c0_2 = arith.constant 0 : index
    %1 = vector.load %arg2[%c0_1, %c0_2] : memref<576x128xbf16, #tpu.memory_space<vmem>>, vector<576x128xbf16>
    %cst = arith.constant dense<0.000000e+00> : vector<256x128xf32>
    %2 = tpu.matmul %0, %1, %cst {dimension_numbers = #tpu.dot_dimension_numbers<[1], [0], [0], [1], [0, 0, 1, 1], [], []>} : vector<256x576xbf16>, vector<576x128xbf16>, vector<256x128xf32> -> vector<256x128xf32>
    %c0_3 = arith.constant 0 : index
    %c0_4 = arith.constant 0 : index
    %3 = vector.load %arg3[%c0_3, %c0_4] : memref<1x128xf32, #tpu.memory_space<vmem>>, vector<1x128xf32>
    %4 = vector.broadcast %3 : vector<1x128xf32> to vector<256x128xf32>
    %5 = arith.addf %2, %4 : vector<256x128xf32>
    %c0_5 = arith.constant 0 : index
    %c0_6 = arith.constant 0 : index
    %6 = vector.load %arg4[%c0_5, %c0_6] : memref<256x128xf32, #tpu.memory_space<vmem>>, vector<256x128xf32>
    tpu.vector_store %arg4[%c0_5, %c0_6], %5 {strides = array<i32>} : memref<256x128xf32, #tpu.memory_space<vmem>>, vector<256x128xf32>,
    return
  }
  func.func @transform_0(%arg0: i32) -> (i32, i32) {
    %c0_i32 = arith.constant 0 : i32
    %c0_i32_0 = arith.constant 0 : i32
    return %arg0, %c0_i32 : i32, i32
  }
  func.func @transform_1(%arg0: i32) -> (i32, i32) {
    %c0_i32 = arith.constant 0 : i32
    %c0_i32_0 = arith.constant 0 : i32
    %c0_i32_1 = arith.constant 0 : i32
    return %c0_i32, %c0_i32_0 : i32, i32
  }
  func.func @transform_2(%arg0: i32) -> (i32, i32) {
    %c0_i32 = arith.constant 0 : i32
    %c0_i32_0 = arith.constant 0 : i32
    %c0_i32_1 = arith.constant 0 : i32
    return %c0_i32, %c0_i32_0 : i32, i32
  }
  func.func @transform_3(%arg0: i32) -> (i32, i32) {
    %c0_i32 = arith.constant 0 : i32
    %c0_i32_0 = arith.constant 0 : i32
    return %arg0, %c0_i32 : i32, i32
  }
}

</mosaic_0001>

<bundles_post_ra>
// kernel: autoencoder_forward.6
= control target key start
LH: loop header
LB: loop body
LE: loop exit
PB: predicated region body
PF: predicated region fallthrough
CT: control target
= control target key end

     0   :  { %vm115_vm0 = vcmask 1044480   ;;  %vm116_vm1 = vcmask 1045504   ;;  %v336_v2 = vmov 65535   ;;  %vm90_vm2 = vcmask 220160   ;;  %s425_s1 = inlined_call_operand.vmem [shape: bf16[27,128], index: 1, kind: input, shape index: {}]   ;;  %s426_s2 = inlined_call_operand.vmem [shape: f32[1,128], index: 2, kind: input, shape index: {}]   ;;  %s427_s0 = inlined_call_operand.vmem [shape: bf16[128,27], index: 0, kind: input, shape index: {}]   ;;  %s428_s3 = inlined_call_operand.vmem [shape: bf16[128,128], index: 3, kind: output, shape index: {}]  }
   0x1   :  { %v261_v0 = vld [vmem:[%s425_s1 + $0x8] sm:$0xf]  ;;  %v280_v1 = vld [vmem:[%s425_s1 + $0x8] sm:$0x30]  ;;  %v117_v3 = vsel %vm115_vm0, 4294967295, %v336_v2  ;;  %v279_v7 = vld [vmem:[%s425_s1] sm:$0xff] }
   0x2   :  { %v262_v4 = vor.u32 %v280_v1, %v261_v0  ;;  %v118_v5 = vsel %vm116_vm1, %v117_v3, 0  ;;  %v271_v8 = vld [vmem:[%s427_s0] sm:$0xff]  ;;  %v273_v9 = vld [vmem:[%s427_s0 + $0x10] sm:$0xff]  ;;  %v272_v12 = vld [vmem:[%s427_s0 + $0x8] sm:$0xff] }
   0x3   :  { %v275_v10 = vld [vmem:[%s427_s0 + $0x20] sm:$0xff]  ;;  %v277_v11 = vld [vmem:[%s427_s0 + $0x30] sm:$0xff]  ;;  %v274_v13 = vld [vmem:[%s427_s0 + $0x18] sm:$0xff] }
   0x4   :  { %v120_v6 = vand.u32 %v262_v4, %v118_v5  ;;  %v276_v14 = vld [vmem:[%s427_s0 + $0x28] sm:$0xff]  ;;  %v278_v15 = vld [vmem:[%s427_s0 + $0x38] sm:$0xff]  ;;  %v335_v18 = vld [vmem:[%s426_s2] ss:$0 sm:$0xff] }
   0x6   :  { %128 = vmatpush.bf16.msra.mxu0 %v120_v6  ;;  %328 = vmatpush.bf16.msra.mxu1 %v120_v6 }
   0x7   :  { %329 = vmatpush.bf16.msra.mxu2 %v120_v6  ;;  %330 = vmatpush.bf16.msra.mxu3 %v120_v6 }
   0xa   :  { %129 = vmatpush.bf16.msra.mxu0 %v279_v7  ;;  %331 = vmatpush.bf16.msra.mxu1 %v279_v7 }
   0xb   :  { %332 = vmatpush.bf16.msra.mxu2 %v279_v7  ;;  %333 = vmatpush.bf16.msra.mxu3 %v279_v7 }
   0xd   :  { %263 = vmatmul.msk.bf16.vlgmr.msra.gmra.mxu0 %vm90_vm2, %v271_v8  ;;  %265 = vmatmul.msk.bf16.vlgmr.msra.gmra.mxu1 %vm90_vm2, %v273_v9 }
   0xe   :  { %267 = vmatmul.msk.bf16.vlgmr.msra.gmra.mxu2 %vm90_vm2, %v275_v10  ;;  %269 = vmatmul.msk.bf16.vlgmr.msra.gmra.mxu3 %vm90_vm2, %v277_v11 }
  0x1d   :  { %264 = vmatmul.msk.bf16.gmra.mxu0 %vm90_vm2, %v272_v12  ;;  %266 = vmatmul.msk.bf16.gmra.mxu1 %vm90_vm2, %v274_v13 }
  0x1e   :  { %268 = vmatmul.msk.bf16.gmra.mxu2 %vm90_vm2, %v276_v14  ;;  %270 = vmatmul.msk.bf16.gmra.mxu3 %vm90_vm2, %v278_v15 }
  0x8a   :  { %v131_v16 = vpop.f32.mrf.mxu0  ;;  %v141_v17 = vpop.f32.mrf.mxu1 }
  0x8b   :  { %v132_v19 = vadd.f32 %v335_v18, %v131_v16  ;;  %v142_v20 = vadd.f32 %v335_v18, %v141_v17 }
  0x8d   :  { %v171_v27 = vmax.f32 %v132_v19, 0.0  ;;  %v175_v28 = vmax.f32 %v142_v20, 0.0 }
  0x91   :  { %v151_v21 = vpop.f32.mrf.mxu2  ;;  %v161_v22 = vpop.f32.mrf.mxu3 }
  0x92   :  { %v133_v23 = vpop.f32.mrf.mxu0  ;;  %v143_v24 = vpop.f32.mrf.mxu1  ;;  %v152_v33 = vadd.f32 %v335_v18, %v151_v21  ;;  %v162_v34 = vadd.f32 %v335_v18, %v161_v22 }
  0x93   :  { %v134_v25 = vadd.f32 %v335_v18, %v133_v23  ;;  %v144_v26 = vadd.f32 %v335_v18, %v143_v24 }
  0x94   :  { %v179_v41 = vmax.f32 %v152_v33, 0.0  ;;  %v183_v42 = vmax.f32 %v162_v34, 0.0 }
  0x95   :  { %v172_v29 = vmax.f32 %v134_v25, 0.0  ;;  %v176_v30 = vmax.f32 %v144_v26, 0.0 }
  0x97   :  { %v284_v31 = vpack.c.bf16 %v172_v29, %v171_v27  ;;  %v294_v32 = vpack.c.bf16 %v176_v30, %v175_v28 }
  0x99   :  { %285 = vst [vmem:[%s428_s3] sm:$0xff] %v284_v31   ;;  %v153_v35 = vpop.f32.mrf.mxu2  ;;  %v163_v36 = vpop.f32.mrf.mxu3 }
  0x9a   :  { %322 = vst [vmem:[%s428_s3 + $0x10] sm:$0xff] %v294_v32   ;;  %v154_v37 = vadd.f32 %v335_v18, %v153_v35  ;;  %v164_v38 = vadd.f32 %v335_v18, %v163_v36  ;;  %v136_v39 = vpop.f32.mrf.mxu0  ;;  %v146_v40 = vpop.f32.mrf.mxu1 }
  0x9b   :  { %v137_v47 = vadd.f32 %v335_v18, %v136_v39  ;;  %v147_v48 = vadd.f32 %v335_v18, %v146_v40 }
  0x9c   :  { %v180_v43 = vmax.f32 %v154_v37, 0.0  ;;  %v184_v44 = vmax.f32 %v164_v38, 0.0 }
  0x9d   :  { %v173_v55 = vmax.f32 %v137_v47, 0.0  ;;  %v177_v56 = vmax.f32 %v147_v48, 0.0 }
  0x9e   :  { %v304_v45 = vpack.c.bf16 %v180_v43, %v179_v41  ;;  %v314_v46 = vpack.c.bf16 %v184_v44, %v183_v42 }
  0xa0   :  { %324 = vst [vmem:[%s428_s3 + $0x20] sm:$0xff] %v304_v45  }
  0xa1   :  { %326 = vst [vmem:[%s428_s3 + $0x30] sm:$0xff] %v314_v46   ;;  %v156_v49 = vpop.f32.mrf.mxu2  ;;  %v166_v50 = vpop.f32.mrf.mxu3 }
  0xa2   :  { %v138_v51 = vpop.f32.mrf.mxu0  ;;  %v148_v52 = vpop.f32.mrf.mxu1  ;;  %v157_v61 = vadd.f32 %v335_v18, %v156_v49  ;;  %v167_v62 = vadd.f32 %v335_v18, %v166_v50 }
  0xa3   :  { %v139_v53 = vadd.f32 %v335_v18, %v138_v51  ;;  %v149_v54 = vadd.f32 %v335_v18, %v148_v52 }
  0xa4   :  { %v181_v3 = vmax.f32 %v157_v61, 0.0  ;;  %v185_v4 = vmax.f32 %v167_v62, 0.0 }
  0xa5   :  { %v174_v57 = vmax.f32 %v139_v53, 0.0  ;;  %v178_v58 = vmax.f32 %v149_v54, 0.0 }
  0xa7   :  { %v289_v59 = vpack.c.bf16 %v174_v57, %v173_v55  ;;  %v299_v60 = vpack.c.bf16 %v178_v58, %v177_v56 }
  0xa9   :  { %321 = vst [vmem:[%s428_s3 + $0x8] sm:$0xff] %v289_v59   ;;  %v158_v63 = vpop.f32.mrf.mxu2  ;;  %v168_v0 = vpop.f32.mrf.mxu3 }
  0xaa   :  { %323 = vst [vmem:[%s428_s3 + $0x18] sm:$0xff] %v299_v60   ;;  %v159_v1 = vadd.f32 %v335_v18, %v158_v63  ;;  %v169_v2 = vadd.f32 %v335_v18, %v168_v0 }
  0xac   :  { %v182_v5 = vmax.f32 %v159_v1, 0.0  ;;  %v186_v6 = vmax.f32 %v169_v2, 0.0 }
  0xae   :  { %v309_v7 = vpack.c.bf16 %v182_v5, %v181_v3  ;;  %v319_v8 = vpack.c.bf16 %v186_v6, %v185_v4 }
  0xb0   :  { %325 = vst [vmem:[%s428_s3 + $0x28] sm:$0xff] %v309_v7  }
  0xb1   :  { %327 = vst [vmem:[%s428_s3 + $0x38] sm:$0xff] %v319_v8  }

// kernel: autoencoder_forward.7
= control target key start
LH: loop header
LB: loop body
LE: loop exit
PB: predicated region body
PF: predicated region fallthrough
CT: control target
= control target key end

     0   :  { %vm369_vm0 = vcmask 523264   ;;  %s932_s1 = inlined_call_operand.vmem [shape: bf16[576,128], index: 1, kind: input, shape index: {}]   ;;  %s933_s2 = inlined_call_operand.vmem [shape: f32[1,128], index: 2, kind: input, shape index: {}]   ;;  %s934_s0 = inlined_call_operand.vmem [shape: bf16[32,576], index: 0, kind: input, shape index: {}]   ;;  %s935_s3 = inlined_call_operand.vmem [shape: bf16[32,128], index: 3, kind: output, shape index: {}]  }
   0x1   :  { %v690_v0 = vld [vmem:[%s932_s1 + $0x38] sm:$0xff]  ;;  %v689_v4 = vld [vmem:[%s932_s1 + $0x30] sm:$0xff]  ;;  %v688_v8 = vld [vmem:[%s932_s1 + $0x28] sm:$0xff] }
   0x2   :  { %v698_v1 = vld [vmem:[%s932_s1 + $0x78] sm:$0xff]  ;;  %376 = vmatpush.bf16.msra.mxu0 %v690_v0  ;;  %v697_v5 = vld [vmem:[%s932_s1 + $0x70] sm:$0xff]  ;;  %v696_v9 = vld [vmem:[%s932_s1 + $0x68] sm:$0xff] }
   0x3   :  { %v706_v2 = vld [vmem:[%s932_s1 + $0xb8] sm:$0xff]  ;;  %395 = vmatpush.bf16.msra.mxu1 %v698_v1  ;;  %v705_v6 = vld [vmem:[%s932_s1 + $0xb0] sm:$0xff]  ;;  %v704_v10 = vld [vmem:[%s932_s1 + $0xa8] sm:$0xff] }
   0x4   :  { %v714_v3 = vld [vmem:[%s932_s1 + $0xf8] sm:$0xff]  ;;  %414 = vmatpush.bf16.msra.mxu2 %v706_v2  ;;  %v713_v7 = vld [vmem:[%s932_s1 + $0xf0] sm:$0xff]  ;;  %v712_v11 = vld [vmem:[%s932_s1 + $0xe8] sm:$0xff] }
   0x5   :  { %433 = vmatpush.bf16.msra.mxu3 %v714_v3  ;;  %v687_v12 = vld [vmem:[%s932_s1 + $0x20] sm:$0xff]  ;;  %v686_v16 = vld [vmem:[%s932_s1 + $0x18] sm:$0xff]  ;;  %v685_v20 = vld [vmem:[%s932_s1 + $0x10] sm:$0xff] }
   0x6   :  { %377 = vmatpush.bf16.msra.mxu0 %v689_v4  ;;  %v695_v13 = vld [vmem:[%s932_s1 + $0x60] sm:$0xff]  ;;  %v694_v17 = vld [vmem:[%s932_s1 + $0x58] sm:$0xff]  ;;  %v693_v21 = vld [vmem:[%s932_s1 + $0x50] sm:$0xff] }
   0x7   :  { %396 = vmatpush.bf16.msra.mxu1 %v697_v5  ;;  %v703_v14 = vld [vmem:[%s932_s1 + $0xa0] sm:$0xff]  ;;  %v702_v18 = vld [vmem:[%s932_s1 + $0x98] sm:$0xff]  ;;  %v701_v22 = vld [vmem:[%s932_s1 + $0x90] sm:$0xff] }
   0x8   :  { %415 = vmatpush.bf16.msra.mxu2 %v705_v6  ;;  %v711_v15 = vld [vmem:[%s932_s1 + $0xe0] sm:$0xff]  ;;  %v710_v19 = vld [vmem:[%s932_s1 + $0xd8] sm:$0xff]  ;;  %v709_v23 = vld [vmem:[%s932_s1 + $0xd0] sm:$0xff] }
   0x9   :  { %434 = vmatpush.bf16.msra.mxu3 %v713_v7  ;;  %v684_v24 = vld [vmem:[%s932_s1 + $0x8] sm:$0xff]  ;;  %v683_v28 = vld [vmem:[%s932_s1] sm:$0xff]  ;;  %v675_v33 = vld [vmem:[%s934_s0 + $0x10] sm:$0xf0] }
   0xa   :  { %378 = vmatpush.bf16.msra.mxu0 %v688_v8  ;;  %v692_v25 = vld [vmem:[%s932_s1 + $0x48] sm:$0xff]  ;;  %v691_v29 = vld [vmem:[%s932_s1 + $0x40] sm:$0xff]  ;;  %v491_v35 = vld [vmem:[%s934_s0 + $0x14] sm:$0xf0] }
   0xb   :  { %397 = vmatpush.bf16.msra.mxu1 %v696_v9  ;;  %v700_v26 = vld [vmem:[%s932_s1 + $0x88] sm:$0xff]  ;;  %v699_v30 = vld [vmem:[%s932_s1 + $0x80] sm:$0xff]  ;;  %v676_v37 = vld [vmem:[%s934_s0 + $0x18] sm:$0xf0] }
   0xc   :  { %416 = vmatpush.bf16.msra.mxu2 %v704_v10  ;;  %v708_v27 = vld [vmem:[%s932_s1 + $0xc8] sm:$0xff]  ;;  %v707_v31 = vld [vmem:[%s932_s1 + $0xc0] sm:$0xff]  ;;  %v718_v40 = vld [vmem:[%s932_s1 + $0x118] sm:$0xff] }
   0xd   :  { %435 = vmatpush.bf16.msra.mxu3 %v712_v11  ;;  %v489_v32 = vld [vmem:[%s934_s0] sm:$0xf]  ;;  %v673_v34 = vld [vmem:[%s934_s0 + $0x4] sm:$0xf]  ;;  %v497_v36 = vld [vmem:[%s934_s0 + $0x8] sm:$0xf] }
   0xe   :  { %379 = vmatpush.bf16.msra.mxu0 %v687_v12  ;;  %v674_v38 = vld [vmem:[%s934_s0 + $0xc] sm:$0xf]  ;;  %v499_v39 = vld [vmem:[%s934_s0 + $0x1c] sm:$0xf0]  ;;  %v490_v41 = vor.u32 %v675_v33, %v489_v32  ;;  %v494_v42 = vor.u32 %v673_v34, %v491_v35  ;;  %v498_v43 = vor.u32 %v676_v37, %v497_v36  ;;  %v717_v45 = vld [vmem:[%s932_s1 + $0x110] sm:$0xff] }
   0xf   :  { %398 = vmatpush.bf16.msra.mxu1 %v695_v13  ;;  %v502_v44 = vor.u32 %v674_v38, %v499_v39  ;;  %v716_v46 = vld [vmem:[%s932_s1 + $0x108] sm:$0xff]  ;;  %v715_v47 = vld [vmem:[%s932_s1 + $0x100] sm:$0xff]  ;;  %v680_v49 = vld [vmem:[%s934_s0 + $0x38] sm:$0xf0] }
  0x10   :  { %417 = vmatpush.bf16.msra.mxu2 %v703_v14  ;;  %v509_v48 = vld [vmem:[%s934_s0 + $0x28] sm:$0xf]  ;;  %v678_v50 = vld [vmem:[%s934_s0 + $0x2c] sm:$0xf]  ;;  %v511_v51 = vld [vmem:[%s934_s0 + $0x3c] sm:$0xf0] }
  0x11   :  { %436 = vmatpush.bf16.msra.mxu3 %v711_v15  ;;  %v517_v52 = vld [vmem:[%s934_s0 + $0x30] sm:$0xf]  ;;  %v681_v53 = vld [vmem:[%s934_s0 + $0x40] sm:$0xf0]  ;;  %v679_v54 = vld [vmem:[%s934_s0 + $0x34] sm:$0xf]  ;;  %v510_v56 = vor.u32 %v680_v49, %v509_v48  ;;  %v514_v57 = vor.u32 %v678_v50, %v511_v51 }
  0x12   :  { %380 = vmatpush.bf16.msra.mxu0 %v686_v16  ;;  %v519_v55 = vld [vmem:[%s934_s0 + $0x44] sm:$0xf0]  ;;  %v518_v58 = vor.u32 %v681_v53, %v517_v52  ;;  %v505_v60 = vld [vmem:[%s934_s0 + $0x10] sm:$0xf]  ;;  %v677_v61 = vld [vmem:[%s934_s0 + $0x20] sm:$0xf0] }
  0x13   :  { %399 = vmatpush.bf16.msra.mxu1 %v694_v17  ;;  %v522_v59 = vor.u32 %v679_v54, %v519_v55  ;;  %v525_v62 = vld [vmem:[%s934_s0 + $0x38] sm:$0xf]  ;;  %v682_v63 = vld [vmem:[%s934_s0 + $0x48] sm:$0xf0]  ;;  %v506_v0 = vor.u32 %v677_v61, %v505_v60  ;;  %v734_v12 = vld [vmem:[%s933_s2] ss:$0 sm:$0xff] }
  0x14   :  { %418 = vmatpush.bf16.msra.mxu2 %v702_v18  ;;  %v526_v1 = vor.u32 %v682_v63, %v525_v62 }
  0x15   :  { %437 = vmatpush.bf16.msra.mxu3 %v710_v19 }
  0x16   :  { %381 = vmatpush.bf16.msra.mxu0 %v685_v20 }
  0x17   :  { %400 = vmatpush.bf16.msra.mxu1 %v693_v21 }
  0x18   :  { %419 = vmatpush.bf16.msra.mxu2 %v701_v22 }
  0x19   :  { %438 = vmatpush.bf16.msra.mxu3 %v709_v23 }
  0x1a   :  { %382 = vmatpush.bf16.msra.mxu0 %v684_v24 }
  0x1b   :  { %401 = vmatpush.bf16.msra.mxu1 %v692_v25 }
  0x1c   :  { %420 = vmatpush.bf16.msra.mxu2 %v700_v26 }
  0x1d   :  { %439 = vmatpush.bf16.msra.mxu3 %v708_v27 }
  0x1e   :  { %383 = vmatpush.bf16.msra.mxu0 %v683_v28 }
  0x1f   :  { %402 = vmatpush.bf16.msra.mxu1 %v691_v29 }
  0x20   :  { %421 = vmatpush.bf16.msra.mxu2 %v699_v30 }
  0x21   :  { %440 = vmatpush.bf16.msra.mxu3 %v707_v31  ;;  %384 = vmatmul.bf16.vlgmr.msra.gmra.mxu0 %v490_v41 }
  0x22   :  { %456 = vmatpush.bf16.msrb.mxu0 %v718_v40  ;;  %403 = vmatmul.bf16.vlgmr.msra.gmra.mxu1 %v494_v42 }
  0x23   :  { %730 = vmatpush.bf16.msrb.mxu1 %v718_v40  ;;  %422 = vmatmul.bf16.vlgmr.msra.gmra.mxu2 %v498_v43 }
  0x24   :  { %441 = vmatmul.bf16.vlgmr.msra.gmra.mxu3 %v502_v44 }
  0x26   :  { %457 = vmatpush.bf16.msrb.mxu0 %v717_v45 }
  0x27   :  { %731 = vmatpush.bf16.msrb.mxu1 %v717_v45 }
  0x2a   :  { %458 = vmatpush.bf16.msrb.mxu0 %v716_v46 }
  0x2b   :  { %732 = vmatpush.bf16.msrb.mxu1 %v716_v46 }
  0x2e   :  { %459 = vmatpush.bf16.msrb.mxu0 %v715_v47 }
  0x2f   :  { %733 = vmatpush.bf16.msrb.mxu1 %v715_v47 }
  0x31   :  { %389 = vmatmul.bf16.gmra.mxu0 %v510_v56 }
  0x32   :  { %408 = vmatmul.bf16.gmra.mxu1 %v514_v57 }
  0x33   :  { %427 = vmatmul.bf16.gmra.mxu2 %v518_v58 }
  0x34   :  { %446 = vmatmul.bf16.gmra.mxu3 %v522_v59 }
  0x41   :  { %671 = vmatmul.msk.bf16.vlgmr.msrb.gmra.mxu0 %vm369_vm0, %v506_v0 }
  0x42   :  { %672 = vmatmul.msk.bf16.vlgmr.msrb.gmra.mxu1 %vm369_vm0, %v526_v1 }
  0x9e   :  { %v385_v2 = vpop.f32.mrf.mxu0 }
  0x9f   :  { %v404_v3 = vpop.f32.mrf.mxu1  ;;  %v386_v16 = vadd.f32 %v734_v12, %v385_v2 }
  0xa1   :  { %v405_v21 = vadd.f32 %v404_v3, %v386_v16 }
  0xa6   :  { %v423_v4 = vpop.f32.mrf.mxu2  ;;  %v387_v6 = vpop.f32.mrf.mxu0 }
  0xa7   :  { %v442_v5 = vpop.f32.mrf.mxu3  ;;  %v406_v7 = vpop.f32.mrf.mxu1  ;;  %v388_v19 = vadd.f32 %v734_v12, %v387_v6  ;;  %v424_v26 = vadd.f32 %v423_v4, %v405_v21 }
  0xa9   :  { %v407_v27 = vadd.f32 %v406_v7, %v388_v19  ;;  %v443_v32 = vadd.f32 %v442_v5, %v424_v26 }
  0xae   :  { %v425_v8 = vpop.f32.mrf.mxu2  ;;  %v390_v9 = vpop.f32.mrf.mxu0 }
  0xaf   :  { %v409_v10 = vpop.f32.mrf.mxu1  ;;  %v444_v11 = vpop.f32.mrf.mxu3  ;;  %v391_v17 = vadd.f32 %v734_v12, %v390_v9  ;;  %v426_v30 = vadd.f32 %v425_v8, %v407_v27 }
  0xb1   :  { %v410_v22 = vadd.f32 %v409_v10, %v391_v17  ;;  %v445_v35 = vadd.f32 %v444_v11, %v426_v30 }
  0xb6   :  { %v428_v13 = vpop.f32.mrf.mxu2  ;;  %v392_v14 = vpop.f32.mrf.mxu0 }
  0xb7   :  { %v411_v15 = vpop.f32.mrf.mxu1  ;;  %v447_v18 = vpop.f32.mrf.mxu3  ;;  %v393_v20 = vadd.f32 %v734_v12, %v392_v14  ;;  %v429_v28 = vadd.f32 %v428_v13, %v410_v22 }
  0xb9   :  { %v412_v29 = vadd.f32 %v411_v15, %v393_v20  ;;  %v448_v33 = vadd.f32 %v447_v18, %v429_v28 }
  0xbe   :  { %v430_v23 = vpop.f32.mrf.mxu2  ;;  %v461_v24 = vpop.f32.mrf.mxu0 }
  0xbf   :  { %v466_v25 = vpop.f32.mrf.mxu1  ;;  %v431_v31 = vadd.f32 %v430_v23, %v412_v29  ;;  %v449_v34 = vpop.f32.mrf.mxu3  ;;  %v462_v37 = vadd.f32 %v461_v24, %v443_v32 }
  0xc0   :  { %v467_v38 = vadd.f32 %v466_v25, %v448_v33 }
  0xc1   :  { %v450_v36 = vadd.f32 %v449_v34, %v431_v31  ;;  %v471_v43 = vmax.f32 %v462_v37, 0.0 }
  0xc2   :  { %v473_v44 = vmax.f32 %v467_v38, 0.0 }
  0xc6   :  { %v463_v39 = vpop.f32.mrf.mxu0 }
  0xc7   :  { %v468_v40 = vpop.f32.mrf.mxu1  ;;  %v464_v41 = vadd.f32 %v463_v39, %v445_v35 }
  0xc8   :  { %v469_v42 = vadd.f32 %v468_v40, %v450_v36 }
  0xc9   :  { %v472_v45 = vmax.f32 %v464_v41, 0.0 }
  0xca   :  { %v474_v46 = vmax.f32 %v469_v42, 0.0 }
  0xcb   :  { %v722_v47 = vpack.c.bf16 %v472_v45, %v471_v43 }
  0xcc   :  { %v727_v48 = vpack.c.bf16 %v474_v46, %v473_v44 }
  0xcd   :  { %723 = vst [vmem:[%s935_s3] sm:$0xff] %v722_v47  }
  0xce   :  { %729 = vst [vmem:[%s935_s3 + $0x8] sm:$0xff] %v727_v48  }

// kernel: autoencoder_forward.8
= control target key start
LH: loop header
LB: loop body
LE: loop exit
PB: predicated region body
PF: predicated region fallthrough
CT: control target
= control target key end

     0   :  { %s2948_s1 = inlined_call_operand.vmem [shape: bf16[1152,256], index: 1, kind: input, shape index: {}]   ;;  %s2949_s0 = inlined_call_operand.vmem [shape: bf16[16,1152], index: 0, kind: input, shape index: {}]   ;;  %s2950_s2 = inlined_call_operand.vmem [shape: f32[1,256], index: 2, kind: input, shape index: {}]   ;;  %s2951_s3 = inlined_call_operand.vmem [shape: bf16[16,256], index: 3, kind: output, shape index: {}]  }
   0x1   :  { %v1294_v0 = vld [vmem:[%s2948_s1 + $0x70] sm:$0xf]  ;;  %v1836_v1 = vld [vmem:[%s2948_s1 + $0x74] sm:$0xf0]  ;;  %v1286_v11 = vld [vmem:[%s2948_s1 + $0x60] sm:$0xf] }
   0x2   :  { %v1358_v2 = vld [vmem:[%s2948_s1 + $0xf0] sm:$0xf]  ;;  %v1295_v3 = vor.u32 %v1836_v1, %v1294_v0  ;;  %v1852_v4 = vld [vmem:[%s2948_s1 + $0xf4] sm:$0xf0]  ;;  %v1834_v13 = vld [vmem:[%s2948_s1 + $0x64] sm:$0xf0] }
   0x3   :  { %v1422_v5 = vld [vmem:[%s2948_s1 + $0x170] sm:$0xf]  ;;  %v1868_v6 = vld [vmem:[%s2948_s1 + $0x174] sm:$0xf0]  ;;  %v1359_v7 = vor.u32 %v1852_v4, %v1358_v2  ;;  %v1350_v14 = vld [vmem:[%s2948_s1 + $0xe0] sm:$0xf]  ;;  %v1287_v16 = vor.u32 %v1834_v13, %v1286_v11 }
   0x4   :  { %v1423_v8 = vor.u32 %v1868_v6, %v1422_v5  ;;  %v1486_v9 = vld [vmem:[%s2948_s1 + $0x1f0] sm:$0xf]  ;;  %v1884_v10 = vld [vmem:[%s2948_s1 + $0x1f4] sm:$0xf0]  ;;  %940 = vmatpush.bf16.msra.mxu0 %v1295_v3  ;;  %v1850_v15 = vld [vmem:[%s2948_s1 + $0xe4] sm:$0xf0] }
   0x5   :  { %v1487_v12 = vor.u32 %v1884_v10, %v1486_v9  ;;  %954 = vmatpush.bf16.msra.mxu1 %v1359_v7  ;;  %v1351_v17 = vor.u32 %v1850_v15, %v1350_v14  ;;  %v1414_v18 = vld [vmem:[%s2948_s1 + $0x160] sm:$0xf]  ;;  %v1866_v19 = vld [vmem:[%s2948_s1 + $0x164] sm:$0xf0]  ;;  %v1278_v23 = vld [vmem:[%s2948_s1 + $0x50] sm:$0xf] }
   0x6   :  { %968 = vmatpush.bf16.msra.mxu2 %v1423_v8  ;;  %v1478_v20 = vld [vmem:[%s2948_s1 + $0x1e0] sm:$0xf]  ;;  %v1415_v21 = vor.u32 %v1866_v19, %v1414_v18  ;;  %v1882_v22 = vld [vmem:[%s2948_s1 + $0x1e4] sm:$0xf0]  ;;  %v1832_v24 = vld [vmem:[%s2948_s1 + $0x54] sm:$0xf0] }
   0x7   :  { %982 = vmatpush.bf16.msra.mxu3 %v1487_v12  ;;  %v1479_v25 = vor.u32 %v1882_v22, %v1478_v20  ;;  %v1342_v26 = vld [vmem:[%s2948_s1 + $0xd0] sm:$0xf]  ;;  %v1848_v27 = vld [vmem:[%s2948_s1 + $0xd4] sm:$0xf0]  ;;  %v1279_v29 = vor.u32 %v1832_v24, %v1278_v23  ;;  %v1270_v35 = vld [vmem:[%s2948_s1 + $0x40] sm:$0xf] }
   0x8   :  { %v1406_v28 = vld [vmem:[%s2948_s1 + $0x150] sm:$0xf]  ;;  %941 = vmatpush.bf16.msra.mxu0 %v1287_v16  ;;  %v1864_v30 = vld [vmem:[%s2948_s1 + $0x154] sm:$0xf0]  ;;  %v1343_v33 = vor.u32 %v1848_v27, %v1342_v26  ;;  %v1830_v36 = vld [vmem:[%s2948_s1 + $0x44] sm:$0xf0] }
   0x9   :  { %v1470_v31 = vld [vmem:[%s2948_s1 + $0x1d0] sm:$0xf]  ;;  %v1880_v32 = vld [vmem:[%s2948_s1 + $0x1d4] sm:$0xf0]  ;;  %955 = vmatpush.bf16.msra.mxu1 %v1351_v17  ;;  %v1407_v34 = vor.u32 %v1864_v30, %v1406_v28  ;;  %v1334_v37 = vld [vmem:[%s2948_s1 + $0xc0] sm:$0xf]  ;;  %v1271_v44 = vor.u32 %v1830_v36, %v1270_v35 }
   0xa   :  { %969 = vmatpush.bf16.msra.mxu2 %v1415_v21  ;;  %v1471_v38 = vor.u32 %v1880_v32, %v1470_v31  ;;  %v1846_v39 = vld [vmem:[%s2948_s1 + $0xc4] sm:$0xf0]  ;;  %v1398_v40 = vld [vmem:[%s2948_s1 + $0x140] sm:$0xf]  ;;  %v1262_v47 = vld [vmem:[%s2948_s1 + $0x30] sm:$0xf] }
   0xb   :  { %983 = vmatpush.bf16.msra.mxu3 %v1479_v25  ;;  %v1862_v41 = vld [vmem:[%s2948_s1 + $0x144] sm:$0xf0]  ;;  %v1462_v42 = vld [vmem:[%s2948_s1 + $0x1c0] sm:$0xf]  ;;  %v1335_v45 = vor.u32 %v1846_v39, %v1334_v37  ;;  %v1828_v48 = vld [vmem:[%s2948_s1 + $0x34] sm:$0xf0] }
   0xc   :  { %v1878_v43 = vld [vmem:[%s2948_s1 + $0x1c4] sm:$0xf0]  ;;  %942 = vmatpush.bf16.msra.mxu0 %v1279_v29  ;;  %v1399_v46 = vor.u32 %v1862_v41, %v1398_v40  ;;  %v1326_v49 = vld [vmem:[%s2948_s1 + $0xb0] sm:$0xf]  ;;  %v1844_v51 = vld [vmem:[%s2948_s1 + $0xb4] sm:$0xf0]  ;;  %v1263_v56 = vor.u32 %v1828_v48, %v1262_v47 }
   0xd   :  { %956 = vmatpush.bf16.msra.mxu1 %v1343_v33  ;;  %v1463_v50 = vor.u32 %v1878_v43, %v1462_v42  ;;  %v1390_v52 = vld [vmem:[%s2948_s1 + $0x130] sm:$0xf]  ;;  %v1860_v53 = vld [vmem:[%s2948_s1 + $0x134] sm:$0xf0]  ;;  %v1327_v57 = vor.u32 %v1844_v51, %v1326_v49  ;;  %v1254_v59 = vld [vmem:[%s2948_s1 + $0x20] sm:$0xf] }
   0xe   :  { %970 = vmatpush.bf16.msra.mxu2 %v1407_v34  ;;  %v1454_v54 = vld [vmem:[%s2948_s1 + $0x1b0] sm:$0xf]  ;;  %v1876_v55 = vld [vmem:[%s2948_s1 + $0x1b4] sm:$0xf0]  ;;  %v1391_v58 = vor.u32 %v1860_v53, %v1390_v52  ;;  %v1826_v60 = vld [vmem:[%s2948_s1 + $0x24] sm:$0xf0] }
   0xf   :  { %984 = vmatpush.bf16.msra.mxu3 %v1471_v38  ;;  %v1318_v61 = vld [vmem:[%s2948_s1 + $0xa0] sm:$0xf]  ;;  %v1455_v62 = vor.u32 %v1876_v55, %v1454_v54  ;;  %v1842_v63 = vld [vmem:[%s2948_s1 + $0xa4] sm:$0xf0]  ;;  %v1255_v4 = vor.u32 %v1826_v60, %v1254_v59  ;;  %v1246_v7 = vld [vmem:[%s2948_s1 + $0x10] sm:$0xf] }
  0x10   :  { %943 = vmatpush.bf16.msra.mxu0 %v1271_v44  ;;  %v1382_v0 = vld [vmem:[%s2948_s1 + $0x120] sm:$0xf]  ;;  %v1858_v1 = vld [vmem:[%s2948_s1 + $0x124] sm:$0xf0]  ;;  %v1319_v5 = vor.u32 %v1842_v63, %v1318_v61  ;;  %v1824_v8 = vld [vmem:[%s2948_s1 + $0x14] sm:$0xf0] }
  0x11   :  { %957 = vmatpush.bf16.msra.mxu1 %v1335_v45  ;;  %v1446_v2 = vld [vmem:[%s2948_s1 + $0x1a0] sm:$0xf]  ;;  %v1874_v3 = vld [vmem:[%s2948_s1 + $0x1a4] sm:$0xf0]  ;;  %v1383_v6 = vor.u32 %v1858_v1, %v1382_v0  ;;  %v1310_v9 = vld [vmem:[%s2948_s1 + $0x90] sm:$0xf]  ;;  %v1247_v16 = vor.u32 %v1824_v8, %v1246_v7 }
  0x12   :  { %971 = vmatpush.bf16.msra.mxu2 %v1399_v46  ;;  %v1447_v10 = vor.u32 %v1874_v3, %v1446_v2  ;;  %v1840_v11 = vld [vmem:[%s2948_s1 + $0x94] sm:$0xf0]  ;;  %v1374_v12 = vld [vmem:[%s2948_s1 + $0x110] sm:$0xf]  ;;  %v1238_v17 = vld [vmem:[%s2948_s1] sm:$0xf] }
  0x13   :  { %985 = vmatpush.bf16.msra.mxu3 %v1463_v50  ;;  %v1856_v13 = vld [vmem:[%s2948_s1 + $0x114] sm:$0xf0]  ;;  %v1438_v14 = vld [vmem:[%s2948_s1 + $0x190] sm:$0xf]  ;;  %v1822_v18 = vld [vmem:[%s2948_s1 + $0x4] sm:$0xf0]  ;;  %v1311_v19 = vor.u32 %v1840_v11, %v1310_v9 }
  0x14   :  { %944 = vmatpush.bf16.msra.mxu0 %v1263_v56  ;;  %v1872_v15 = vld [vmem:[%s2948_s1 + $0x194] sm:$0xf0]  ;;  %v1375_v20 = vor.u32 %v1856_v13, %v1374_v12  ;;  %v1302_v21 = vld [vmem:[%s2948_s1 + $0x80] sm:$0xf]  ;;  %v1838_v22 = vld [vmem:[%s2948_s1 + $0x84] sm:$0xf0]  ;;  %v1239_v31 = vor.u32 %v1822_v18, %v1238_v17 }
  0x15   :  { %958 = vmatpush.bf16.msra.mxu1 %v1327_v57  ;;  %v1366_v23 = vld [vmem:[%s2948_s1 + $0x100] sm:$0xf]  ;;  %v1439_v24 = vor.u32 %v1872_v15, %v1438_v14  ;;  %v1854_v25 = vld [vmem:[%s2948_s1 + $0x104] sm:$0xf0]  ;;  %v1550_v26 = vld [vmem:[%s2948_s1 + $0x270] sm:$0xf]  ;;  %v1303_v35 = vor.u32 %v1838_v22, %v1302_v21 }
  0x16   :  { %972 = vmatpush.bf16.msra.mxu2 %v1391_v58  ;;  %v1900_v27 = vld [vmem:[%s2948_s1 + $0x274] sm:$0xf0]  ;;  %v1614_v28 = vld [vmem:[%s2948_s1 + $0x2f0] sm:$0xf]  ;;  %v1430_v33 = vld [vmem:[%s2948_s1 + $0x180] sm:$0xf]  ;;  %v1367_v36 = vor.u32 %v1854_v25, %v1366_v23 }
  0x17   :  { %986 = vmatpush.bf16.msra.mxu3 %v1455_v62  ;;  %v1916_v29 = vld [vmem:[%s2948_s1 + $0x2f4] sm:$0xf0]  ;;  %v1678_v30 = vld [vmem:[%s2948_s1 + $0x370] sm:$0xf]  ;;  %v1870_v34 = vld [vmem:[%s2948_s1 + $0x184] sm:$0xf0]  ;;  %v1551_v39 = vor.u32 %v1900_v27, %v1550_v26 }
  0x18   :  { %945 = vmatpush.bf16.msra.mxu0 %v1255_v4  ;;  %v1932_v32 = vld [vmem:[%s2948_s1 + $0x374] sm:$0xf0]  ;;  %v1742_v37 = vld [vmem:[%s2948_s1 + $0x3f0] sm:$0xf]  ;;  %v1615_v40 = vor.u32 %v1916_v29, %v1614_v28  ;;  %v1542_v41 = vld [vmem:[%s2948_s1 + $0x260] sm:$0xf]  ;;  %v1431_v44 = vor.u32 %v1870_v34, %v1430_v33 }
  0x19   :  { %959 = vmatpush.bf16.msra.mxu1 %v1319_v5  ;;  %v1948_v38 = vld [vmem:[%s2948_s1 + $0x3f4] sm:$0xf0]  ;;  %v1898_v42 = vld [vmem:[%s2948_s1 + $0x264] sm:$0xf0]  ;;  %v1679_v43 = vor.u32 %v1932_v32, %v1678_v30  ;;  %v1606_v45 = vld [vmem:[%s2948_s1 + $0x2e0] sm:$0xf] }
  0x1a   :  { %973 = vmatpush.bf16.msra.mxu2 %v1383_v6  ;;  %v1914_v46 = vld [vmem:[%s2948_s1 + $0x2e4] sm:$0xf0]  ;;  %v1670_v47 = vld [vmem:[%s2948_s1 + $0x360] sm:$0xf]  ;;  %v1743_v48 = vor.u32 %v1948_v38, %v1742_v37  ;;  %v1534_v52 = vld [vmem:[%s2948_s1 + $0x250] sm:$0xf]  ;;  %v1543_v56 = vor.u32 %v1898_v42, %v1542_v41 }
  0x1b   :  { %987 = vmatpush.bf16.msra.mxu3 %v1447_v10  ;;  %v1930_v49 = vld [vmem:[%s2948_s1 + $0x364] sm:$0xf0]  ;;  %v1734_v50 = vld [vmem:[%s2948_s1 + $0x3e0] sm:$0xf]  ;;  %v1816_v54 = vld [vmem:[%s2949_s0 + $0x20] sm:$0xf0]  ;;  %v1607_v57 = vor.u32 %v1914_v46, %v1606_v45 }
  0x1c   :  { %946 = vmatpush.bf16.msra.mxu0 %v1247_v16  ;;  %v1946_v51 = vld [vmem:[%s2948_s1 + $0x3e4] sm:$0xf0]  ;;  %v1202_v53 = vld [vmem:[%s2949_s0] sm:$0xf]  ;;  %v1896_v58 = vld [vmem:[%s2948_s1 + $0x254] sm:$0xf0]  ;;  %v1671_v62 = vor.u32 %v1930_v49, %v1670_v47 }
  0x1d   :  { %960 = vmatpush.bf16.msra.mxu1 %v1311_v19  ;;  %v1210_v55 = vld [vmem:[%s2949_s0 + $0x8] sm:$0xf]  ;;  %v1598_v59 = vld [vmem:[%s2948_s1 + $0x2d0] sm:$0xf]  ;;  %v2243_v60 = vor.u32 %v1816_v54, %v1202_v53  ;;  %v1817_v61 = vld [vmem:[%s2949_s0 + $0x28] sm:$0xf0]  ;;  %v1735_v3 = vor.u32 %v1946_v51, %v1734_v50  ;;  %v1535_v11 = vor.u32 %v1896_v58, %v1534_v52 }
  0x1e   :  { %974 = vmatpush.bf16.msra.mxu2 %v1375_v20  ;;  %v1912_v63 = vld [vmem:[%s2948_s1 + $0x2d4] sm:$0xf0]  ;;  %v1662_v0 = vld [vmem:[%s2948_s1 + $0x350] sm:$0xf]  ;;  %v2257_v2 = vor.u32 %v1817_v61, %v1210_v55  ;;  %v1812_v5 = vld [vmem:[%s2949_s0 + $0x4] sm:$0xf] }
  0x1f   :  { %988 = vmatpush.bf16.msra.mxu3 %v1439_v24  ;;  %v1928_v1 = vld [vmem:[%s2948_s1 + $0x354] sm:$0xf0]  ;;  %v1726_v4 = vld [vmem:[%s2948_s1 + $0x3d0] sm:$0xf]  ;;  %v1204_v6 = vld [vmem:[%s2949_s0 + $0x24] sm:$0xf0]  ;;  %v1599_v12 = vor.u32 %v1912_v63, %v1598_v59 }
  0x20   :  { %947 = vmatpush.bf16.msra.mxu0 %v1239_v31  ;;  %v1944_v7 = vld [vmem:[%s2948_s1 + $0x3d4] sm:$0xf0]  ;;  %v2273_v8 = vor.u32 %v1812_v5, %v1204_v6  ;;  %v1813_v9 = vld [vmem:[%s2949_s0 + $0xc] sm:$0xf]  ;;  %v1212_v10 = vld [vmem:[%s2949_s0 + $0x2c] sm:$0xf0]  ;;  %v1663_v15 = vor.u32 %v1928_v1, %v1662_v0 }
  0x21   :  { %961 = vmatpush.bf16.msra.mxu1 %v1303_v35  ;;  %v1526_v13 = vld [vmem:[%s2948_s1 + $0x240] sm:$0xf]  ;;  %v2284_v14 = vor.u32 %v1813_v9, %v1212_v10  ;;  %v1894_v16 = vld [vmem:[%s2948_s1 + $0x244] sm:$0xf0]  ;;  %v1727_v19 = vor.u32 %v1944_v7, %v1726_v4  ;;  %v1518_v26 = vld [vmem:[%s2948_s1 + $0x230] sm:$0xf] }
  0x22   :  { %975 = vmatpush.bf16.msra.mxu2 %v1367_v36  ;;  %v1590_v17 = vld [vmem:[%s2948_s1 + $0x2c0] sm:$0xf]  ;;  %v1910_v18 = vld [vmem:[%s2948_s1 + $0x2c4] sm:$0xf0]  ;;  %v1527_v24 = vor.u32 %v1894_v16, %v1526_v13  ;;  %v1892_v28 = vld [vmem:[%s2948_s1 + $0x234] sm:$0xf0] }
  0x23   :  { %989 = vmatpush.bf16.msra.mxu3 %v1431_v44  ;;  %948 = vmatmul.bf16.vlgmr.msra.gmra.mxu0 %v2243_v60  ;;  %v1654_v20 = vld [vmem:[%s2948_s1 + $0x340] sm:$0xf]  ;;  %v1926_v21 = vld [vmem:[%s2948_s1 + $0x344] sm:$0xf0]  ;;  %v1591_v25 = vor.u32 %v1910_v18, %v1590_v17  ;;  %v1582_v29 = vld [vmem:[%s2948_s1 + $0x2b0] sm:$0xf]  ;;  %v1519_v36 = vor.u32 %v1892_v28, %v1518_v26 }
  0x24   :  { %996 = vmatpush.bf16.msrb.mxu0 %v1551_v39  ;;  %962 = vmatmul.bf16.vlgmr.msra.gmra.mxu1 %v2273_v8  ;;  %v1718_v22 = vld [vmem:[%s2948_s1 + $0x3c0] sm:$0xf]  ;;  %v1942_v23 = vld [vmem:[%s2948_s1 + $0x3c4] sm:$0xf0]  ;;  %v1655_v27 = vor.u32 %v1926_v21, %v1654_v20  ;;  %v1908_v30 = vld [vmem:[%s2948_s1 + $0x2b4] sm:$0xf0] }
  0x25   :  { %1010 = vmatpush.bf16.msrb.mxu1 %v1615_v40  ;;  %976 = vmatmul.bf16.vlgmr.msra.gmra.mxu2 %v2257_v2  ;;  %v1719_v31 = vor.u32 %v1942_v23, %v1718_v22  ;;  %v1646_v32 = vld [vmem:[%s2948_s1 + $0x330] sm:$0xf]  ;;  %v1924_v33 = vld [vmem:[%s2948_s1 + $0x334] sm:$0xf0]  ;;  %v1583_v37 = vor.u32 %v1908_v30, %v1582_v29  ;;  %v1510_v38 = vld [vmem:[%s2948_s1 + $0x220] sm:$0xf] }
  0x26   :  { %1024 = vmatpush.bf16.msrb.mxu2 %v1679_v43  ;;  %990 = vmatmul.bf16.vlgmr.msra.gmra.mxu3 %v2284_v14  ;;  %v1710_v34 = vld [vmem:[%s2948_s1 + $0x3b0] sm:$0xf]  ;;  %v1940_v35 = vld [vmem:[%s2948_s1 + $0x3b4] sm:$0xf0]  ;;  %v1647_v39 = vor.u32 %v1924_v33, %v1646_v32  ;;  %v1890_v40 = vld [vmem:[%s2948_s1 + $0x224] sm:$0xf0] }
  0x27   :  { %1038 = vmatpush.bf16.msrb.mxu3 %v1743_v48  ;;  %v1574_v41 = vld [vmem:[%s2948_s1 + $0x2a0] sm:$0xf]  ;;  %v1906_v42 = vld [vmem:[%s2948_s1 + $0x2a4] sm:$0xf0]  ;;  %v1711_v43 = vor.u32 %v1940_v35, %v1710_v34  ;;  %v1511_v48 = vor.u32 %v1890_v40, %v1510_v38  ;;  %v1502_v50 = vld [vmem:[%s2948_s1 + $0x210] sm:$0xf] }
  0x28   :  { %997 = vmatpush.bf16.msrb.mxu0 %v1543_v56  ;;  %v1638_v44 = vld [vmem:[%s2948_s1 + $0x320] sm:$0xf]  ;;  %v1922_v45 = vld [vmem:[%s2948_s1 + $0x324] sm:$0xf0]  ;;  %v1575_v49 = vor.u32 %v1906_v42, %v1574_v41  ;;  %v1888_v51 = vld [vmem:[%s2948_s1 + $0x214] sm:$0xf0] }
  0x29   :  { %1011 = vmatpush.bf16.msrb.mxu1 %v1607_v57  ;;  %v1702_v46 = vld [vmem:[%s2948_s1 + $0x3a0] sm:$0xf]  ;;  %v1938_v47 = vld [vmem:[%s2948_s1 + $0x3a4] sm:$0xf0]  ;;  %v1639_v52 = vor.u32 %v1922_v45, %v1638_v44  ;;  %v1566_v53 = vld [vmem:[%s2948_s1 + $0x290] sm:$0xf]  ;;  %v1503_v1 = vor.u32 %v1888_v51, %v1502_v50 }
  0x2a   :  { %1025 = vmatpush.bf16.msrb.mxu2 %v1671_v62  ;;  %v1904_v54 = vld [vmem:[%s2948_s1 + $0x294] sm:$0xf0]  ;;  %v1630_v55 = vld [vmem:[%s2948_s1 + $0x310] sm:$0xf]  ;;  %v1703_v56 = vor.u32 %v1938_v47, %v1702_v46  ;;  %v1494_v61 = vld [vmem:[%s2948_s1 + $0x200] sm:$0xf] }
  0x2b   :  { %1039 = vmatpush.bf16.msrb.mxu3 %v1735_v3  ;;  %v1920_v57 = vld [vmem:[%s2948_s1 + $0x314] sm:$0xf0]  ;;  %v1694_v58 = vld [vmem:[%s2948_s1 + $0x390] sm:$0xf]  ;;  %v1886_v62 = vld [vmem:[%s2948_s1 + $0x204] sm:$0xf0]  ;;  %v1567_v3 = vor.u32 %v1904_v54, %v1566_v53 }
  0x2c   :  { %998 = vmatpush.bf16.msrb.mxu0 %v1535_v11  ;;  %v1936_v59 = vld [vmem:[%s2948_s1 + $0x394] sm:$0xf0]  ;;  %v1558_v63 = vld [vmem:[%s2948_s1 + $0x280] sm:$0xf]  ;;  %v1902_v0 = vld [vmem:[%s2948_s1 + $0x284] sm:$0xf0]  ;;  %v1631_v7 = vor.u32 %v1920_v57, %v1630_v55  ;;  %v1495_v20 = vor.u32 %v1886_v62, %v1494_v61 }
  0x2d   :  { %1012 = vmatpush.bf16.msrb.mxu1 %v1599_v12  ;;  %v1622_v4 = vld [vmem:[%s2948_s1 + $0x300] sm:$0xf]  ;;  %v1918_v5 = vld [vmem:[%s2948_s1 + $0x304] sm:$0xf0]  ;;  %v1806_v6 = vld [vmem:[%s2948_s1 + $0x470] sm:$0xf]  ;;  %v1695_v12 = vor.u32 %v1936_v59, %v1694_v58  ;;  %v1559_v21 = vor.u32 %v1902_v0, %v1558_v63 }
  0x2e   :  { %1026 = vmatpush.bf16.msrb.mxu2 %v1663_v15  ;;  %v1964_v9 = vld [vmem:[%s2948_s1 + $0x474] sm:$0xf0]  ;;  %v1835_v10 = vld [vmem:[%s2948_s1 + $0x74] sm:$0xf]  ;;  %v1296_v11 = vld [vmem:[%s2948_s1 + $0x78] sm:$0xf0] }
  0x2f   :  { %1040 = vmatpush.bf16.msrb.mxu3 %v1727_v19  ;;  %v1851_v13 = vld [vmem:[%s2948_s1 + $0xf4] sm:$0xf]  ;;  %v1360_v15 = vld [vmem:[%s2948_s1 + $0xf8] sm:$0xf0]  ;;  %v1686_v16 = vld [vmem:[%s2948_s1 + $0x380] sm:$0xf]  ;;  %v1807_v26 = vor.u32 %v1964_v9, %v1806_v6  ;;  %v1299_v30 = vor.u32 %v1835_v10, %v1296_v11 }
  0x30   :  { %999 = vmatpush.bf16.msrb.mxu0 %v1527_v24  ;;  %v1934_v17 = vld [vmem:[%s2948_s1 + $0x384] sm:$0xf0]  ;;  %v1218_v18 = vld [vmem:[%s2949_s0 + $0x10] sm:$0xf]  ;;  %v1818_v19 = vld [vmem:[%s2949_s0 + $0x30] sm:$0xf0] }
  0x31   :  { %1013 = vmatpush.bf16.msrb.mxu1 %v1591_v25  ;;  %v1226_v22 = vld [vmem:[%s2949_s0 + $0x18] sm:$0xf]  ;;  %v1819_v23 = vld [vmem:[%s2949_s0 + $0x38] sm:$0xf0]  ;;  %v1867_v24 = vld [vmem:[%s2948_s1 + $0x174] sm:$0xf]  ;;  %v1623_v25 = vor.u32 %v1918_v5, %v1622_v4  ;;  %v1687_v35 = vor.u32 %v1934_v17, %v1686_v16 }
  0x32   :  { %1027 = vmatpush.bf16.msrb.mxu2 %v1655_v27  ;;  %v1424_v27 = vld [vmem:[%s2948_s1 + $0x178] sm:$0xf0]  ;;  %v1814_v28 = vld [vmem:[%s2949_s0 + $0x14] sm:$0xf]  ;;  %v1220_v29 = vld [vmem:[%s2949_s0 + $0x34] sm:$0xf0]  ;;  %v2467_v40 = vor.u32 %v1819_v23, %v1226_v22 }
  0x33   :  { %1041 = vmatpush.bf16.msrb.mxu3 %v1719_v31  ;;  %v1363_v31 = vor.u32 %v1851_v13, %v1360_v15  ;;  %v1815_v32 = vld [vmem:[%s2949_s0 + $0x1c] sm:$0xf]  ;;  %v1798_v33 = vld [vmem:[%s2948_s1 + $0x460] sm:$0xf]  ;;  %v1962_v34 = vld [vmem:[%s2948_s1 + $0x464] sm:$0xf0]  ;;  %v1427_v41 = vor.u32 %v1867_v24, %v1424_v27  ;;  %v2475_v44 = vor.u32 %v1814_v28, %v1220_v29 }
  0x34   :  { %1000 = vmatpush.bf16.msrb.mxu0 %v1519_v36  ;;  %v2456_v36 = vor.u32 %v1818_v19, %v1218_v18  ;;  %v1833_v38 = vld [vmem:[%s2948_s1 + $0x64] sm:$0xf]  ;;  %v1799_v45 = vor.u32 %v1962_v34, %v1798_v33  ;;  %v1416_v47 = vld [vmem:[%s2948_s1 + $0x168] sm:$0xf0]  ;;  %v1790_v50 = vld [vmem:[%s2948_s1 + $0x450] sm:$0xf] }
  0x35   :  { %1014 = vmatpush.bf16.msrb.mxu1 %v1583_v37  ;;  %v1228_v37 = vld [vmem:[%s2949_s0 + $0x3c] sm:$0xf0]  ;;  %v1849_v42 = vld [vmem:[%s2948_s1 + $0xe4] sm:$0xf]  ;;  %v1960_v51 = vld [vmem:[%s2948_s1 + $0x454] sm:$0xf0] }
  0x36   :  { %1028 = vmatpush.bf16.msrb.mxu2 %v1647_v39  ;;  %v1288_v39 = vld [vmem:[%s2948_s1 + $0x68] sm:$0xf0]  ;;  %v1865_v46 = vld [vmem:[%s2948_s1 + $0x164] sm:$0xf]  ;;  %v1831_v53 = vld [vmem:[%s2948_s1 + $0x54] sm:$0xf]  ;;  %v1791_v58 = vor.u32 %v1960_v51, %v1790_v50 }
  0x37   :  { %1042 = vmatpush.bf16.msrb.mxu3 %v1711_v43  ;;  %v1352_v43 = vld [vmem:[%s2948_s1 + $0xe8] sm:$0xf0]  ;;  %v1280_v54 = vld [vmem:[%s2948_s1 + $0x58] sm:$0xf0]  ;;  %v1419_v55 = vor.u32 %v1865_v46, %v1416_v47  ;;  %v1863_v59 = vld [vmem:[%s2948_s1 + $0x154] sm:$0xf] }
  0x38   :  { %1001 = vmatpush.bf16.msrb.mxu0 %v1511_v48  ;;  %v2483_v48 = vor.u32 %v1815_v32, %v1228_v37  ;;  %v1344_v57 = vld [vmem:[%s2948_s1 + $0xd8] sm:$0xf0]  ;;  %v1283_v62 = vor.u32 %v1831_v53, %v1280_v54  ;;  %v1782_v63 = vld [vmem:[%s2948_s1 + $0x440] sm:$0xf]  ;;  %v1958_v0 = vld [vmem:[%s2948_s1 + $0x444] sm:$0xf0] }
  0x39   :  { %1015 = vmatpush.bf16.msrb.mxu1 %v1575_v49  ;;  %v1291_v49 = vor.u32 %v1833_v38, %v1288_v39  ;;  %v1408_v61 = vld [vmem:[%s2948_s1 + $0x158] sm:$0xf0]  ;;  %v1272_v4 = vld [vmem:[%s2948_s1 + $0x48] sm:$0xf0]  ;;  %v1845_v6 = vld [vmem:[%s2948_s1 + $0xc4] sm:$0xf]  ;;  %v1783_v9 = vor.u32 %v1958_v0, %v1782_v63 }
  0x3a   :  { %1029 = vmatpush.bf16.msrb.mxu2 %v1639_v52  ;;  %v1355_v52 = vor.u32 %v1849_v42, %v1352_v43  ;;  %v1411_v5 = vor.u32 %v1863_v59, %v1408_v61  ;;  %v1861_v10 = vld [vmem:[%s2948_s1 + $0x144] sm:$0xf]  ;;  %v1400_v11 = vld [vmem:[%s2948_s1 + $0x148] sm:$0xf0]  ;;  %v1774_v13 = vld [vmem:[%s2948_s1 + $0x430] sm:$0xf] }
  0x3b   :  { %1043 = vmatpush.bf16.msrb.mxu3 %v1703_v56  ;;  %v1847_v56 = vld [vmem:[%s2948_s1 + $0xd4] sm:$0xf]  ;;  %v1956_v15 = vld [vmem:[%s2948_s1 + $0x434] sm:$0xf0]  ;;  %v1264_v18 = vld [vmem:[%s2948_s1 + $0x38] sm:$0xf0]  ;;  %v1403_v19 = vor.u32 %v1861_v10, %v1400_v11 }
  0x3c   :  { %1002 = vmatpush.bf16.msrb.mxu0 %v1503_v1  ;;  %v1347_v1 = vor.u32 %v1847_v56, %v1344_v57  ;;  %v1827_v17 = vld [vmem:[%s2948_s1 + $0x34] sm:$0xf]  ;;  %v1775_v22 = vor.u32 %v1956_v15, %v1774_v13  ;;  %v1392_v24 = vld [vmem:[%s2948_s1 + $0x138] sm:$0xf0]  ;;  %v1954_v27 = vld [vmem:[%s2948_s1 + $0x424] sm:$0xf0] }
  0x3d   :  { %1016 = vmatpush.bf16.msrb.mxu1 %v1567_v3  ;;  %v1829_v3 = vld [vmem:[%s2948_s1 + $0x44] sm:$0xf]  ;;  %v1859_v23 = vld [vmem:[%s2948_s1 + $0x134] sm:$0xf]  ;;  %v1320_v33 = vld [vmem:[%s2948_s1 + $0xa8] sm:$0xf0] }
  0x3e   :  { %1030 = vmatpush.bf16.msrb.mxu2 %v1631_v7  ;;  %v1336_v7 = vld [vmem:[%s2948_s1 + $0xc8] sm:$0xf0]  ;;  %v1825_v29 = vld [vmem:[%s2948_s1 + $0x24] sm:$0xf]  ;;  %v1758_v39 = vld [vmem:[%s2948_s1 + $0x410] sm:$0xf] }
  0x3f   :  { %1044 = vmatpush.bf16.msrb.mxu3 %v1695_v12  ;;  %v1275_v12 = vor.u32 %v1829_v3, %v1272_v4  ;;  %v1339_v16 = vor.u32 %v1845_v6, %v1336_v7  ;;  %v1841_v32 = vld [vmem:[%s2948_s1 + $0xa4] sm:$0xf]  ;;  %v1384_v37 = vld [vmem:[%s2948_s1 + $0x128] sm:$0xf0]  ;;  %v1823_v43 = vld [vmem:[%s2948_s1 + $0x14] sm:$0xf] }
  0x40   :  { %1003 = vmatpush.bf16.msrb.mxu0 %v1495_v20  ;;  %v1843_v20 = vld [vmem:[%s2948_s1 + $0xb4] sm:$0xf]  ;;  %v1323_v42 = vor.u32 %v1841_v32, %v1320_v33  ;;  %v1376_v51 = vld [vmem:[%s2948_s1 + $0x118] sm:$0xf0]  ;;  %v1750_v53 = vld [vmem:[%s2948_s1 + $0x400] sm:$0xf] }
  0x41   :  { %1017 = vmatpush.bf16.msrb.mxu1 %v1559_v21  ;;  %v1328_v21 = vld [vmem:[%s2948_s1 + $0xb8] sm:$0xf0]  ;;  %v1839_v46 = vld [vmem:[%s2948_s1 + $0x94] sm:$0xf]  ;;  %v1950_v54 = vld [vmem:[%s2948_s1 + $0x404] sm:$0xf0] }
  0x42   :  { %1031 = vmatpush.bf16.msrb.mxu2 %v1623_v25  ;;  %v1267_v25 = vor.u32 %v1827_v17, %v1264_v18  ;;  %v1331_v28 = vor.u32 %v1843_v20, %v1328_v21  ;;  %v1855_v50 = vld [vmem:[%s2948_s1 + $0x114] sm:$0xf]  ;;  %v1240_v57 = vld [vmem:[%s2948_s1 + $0x8] sm:$0xf0]  ;;  %v1488_v63 = vld [vmem:[%s2948_s1 + $0x1f8] sm:$0xf0]  ;;  %v1751_v6 = vor.u32 %v1950_v54, %v1750_v53 }
  0x43   :  { %1045 = vmatpush.bf16.msrb.mxu3 %v1687_v35  ;;  %1004 = vmatmul.bf16.vlgmr.msrb.gmra.mxu0 %v2456_v36  ;;  %v1857_v35 = vld [vmem:[%s2948_s1 + $0x124] sm:$0xf]  ;;  %v1304_v59 = vld [vmem:[%s2948_s1 + $0x88] sm:$0xf0]  ;;  %v1899_v0 = vld [vmem:[%s2948_s1 + $0x274] sm:$0xf] }
  0x44   :  { %1052 = vmatpush.bf16.msra.mxu0 %v1807_v26  ;;  %1018 = vmatmul.bf16.vlgmr.msrb.gmra.mxu1 %v2475_v44  ;;  %v1766_v26 = vld [vmem:[%s2948_s1 + $0x420] sm:$0xf]  ;;  %v1387_v47 = vor.u32 %v1857_v35, %v1384_v37  ;;  %v1552_v3 = vld [vmem:[%s2948_s1 + $0x278] sm:$0xf0]  ;;  %v1915_v4 = vld [vmem:[%s2948_s1 + $0x2f4] sm:$0xf] }
  0x45   :  { %1066 = vmatpush.bf16.msra.mxu1 %v1299_v30  ;;  %1032 = vmatmul.bf16.vlgmr.msrb.gmra.mxu2 %v2467_v40  ;;  %v1256_v30 = vld [vmem:[%s2948_s1 + $0x28] sm:$0xf0]  ;;  %v1767_v34 = vor.u32 %v1954_v27, %v1766_v26  ;;  %v1853_v7 = vld [vmem:[%s2948_s1 + $0x104] sm:$0xf]  ;;  %v1234_v10 = vld [vmem:[%s2949_s0 + $0x20] sm:$0xf]  ;;  %v1555_v18 = vor.u32 %v1899_v0, %v1552_v3 }
  0x46   :  { %1080 = vmatpush.bf16.msra.mxu2 %v1363_v31  ;;  %1046 = vmatmul.bf16.vlgmr.msrb.gmra.mxu3 %v2483_v48  ;;  %v1395_v31 = vor.u32 %v1859_v23, %v1392_v24  ;;  %v1259_v38 = vor.u32 %v1825_v29, %v1256_v30  ;;  %v1820_v13 = vld [vmem:[%s2949_s0 + $0x40] sm:$0xf0]  ;;  %v1931_v15 = vld [vmem:[%s2948_s1 + $0x374] sm:$0xf]  ;;  %v1480_v20 = vld [vmem:[%s2948_s1 + $0x1e8] sm:$0xf0] }
  0x47   :  { %1094 = vmatpush.bf16.msra.mxu3 %v1427_v41  ;;  %v1952_v41 = vld [vmem:[%s2948_s1 + $0x414] sm:$0xf0]  ;;  %v1897_v23 = vld [vmem:[%s2948_s1 + $0x264] sm:$0xf]  ;;  %v1544_v24 = vld [vmem:[%s2948_s1 + $0x268] sm:$0xf0] }
  0x48   :  { %1053 = vmatpush.bf16.msra.mxu0 %v1799_v45  ;;  %v1248_v45 = vld [vmem:[%s2948_s1 + $0x18] sm:$0xf0]  ;;  %v1913_v27 = vld [vmem:[%s2948_s1 + $0x2e4] sm:$0xf]  ;;  %v1547_v32 = vor.u32 %v1897_v23, %v1544_v24  ;;  %v1879_v33 = vld [vmem:[%s2948_s1 + $0x1d4] sm:$0xf] }
  0x49   :  { %1067 = vmatpush.bf16.msra.mxu1 %v1291_v49  ;;  %v1312_v49 = vld [vmem:[%s2948_s1 + $0x98] sm:$0xf0]  ;;  %v1251_v56 = vor.u32 %v1823_v43, %v1248_v45  ;;  %v1929_v30 = vld [vmem:[%s2948_s1 + $0x364] sm:$0xf]  ;;  %v1895_v37 = vld [vmem:[%s2948_s1 + $0x254] sm:$0xf] }
  0x4a   :  { %1081 = vmatpush.bf16.msra.mxu2 %v1355_v52  ;;  %v1759_v52 = vor.u32 %v1952_v41, %v1758_v39  ;;  %v1315_v61 = vor.u32 %v1839_v46, %v1312_v49  ;;  %v1911_v41 = vld [vmem:[%s2948_s1 + $0x2d4] sm:$0xf]  ;;  %v1664_v46 = vld [vmem:[%s2948_s1 + $0x358] sm:$0xf0]  ;;  %v1877_v49 = vld [vmem:[%s2948_s1 + $0x1c4] sm:$0xf] }
  0x4b   :  { %1095 = vmatpush.bf16.msra.mxu3 %v1419_v55  ;;  %v1821_v55 = vld [vmem:[%s2948_s1 + $0x4] sm:$0xf]  ;;  %v1927_v45 = vld [vmem:[%s2948_s1 + $0x354] sm:$0xf]  ;;  %v1584_v3 = vld [vmem:[%s2948_s1 + $0x2b8] sm:$0xf0] }
  0x4c   :  { %1054 = vmatpush.bf16.msra.mxu0 %v1791_v58  ;;  %v1837_v58 = vld [vmem:[%s2948_s1 + $0x84] sm:$0xf]  ;;  %v1243_v11 = vor.u32 %v1821_v55, %v1240_v57  ;;  %v1667_v53 = vor.u32 %v1927_v45, %v1664_v46  ;;  %v1440_v23 = vld [vmem:[%s2948_s1 + $0x198] sm:$0xf0] }
  0x4d   :  { %1068 = vmatpush.bf16.msra.mxu1 %v1283_v62  ;;  %v1883_v62 = vld [vmem:[%s2948_s1 + $0x1f4] sm:$0xf]  ;;  %v1307_v17 = vor.u32 %v1837_v58, %v1304_v59  ;;  %v1909_v54 = vld [vmem:[%s2948_s1 + $0x2c4] sm:$0xf]  ;;  %v1456_v59 = vld [vmem:[%s2948_s1 + $0x1b8] sm:$0xf0] }
  0x4e   :  { %1082 = vmatpush.bf16.msra.mxu2 %v1347_v1  ;;  %v1379_v1 = vor.u32 %v1855_v50, %v1376_v51  ;;  %v1464_v50 = vld [vmem:[%s2948_s1 + $0x1c8] sm:$0xf0]  ;;  %v1875_v58 = vld [vmem:[%s2948_s1 + $0x1b4] sm:$0xf]  ;;  %v1744_v45 = vld [vmem:[%s2948_s1 + $0x3f8] sm:$0xf0] }
  0x4f   :  { %1096 = vmatpush.bf16.msra.mxu3 %v1411_v5  ;;  %v1616_v5 = vld [vmem:[%s2948_s1 + $0x2f8] sm:$0xf0]  ;;  %v1467_v55 = vor.u32 %v1877_v49, %v1464_v50  ;;  %v1963_v49 = vld [vmem:[%s2948_s1 + $0x474] sm:$0xf] }
  0x50   :  { %1055 = vmatpush.bf16.msra.mxu0 %v1783_v9  ;;  %v1368_v9 = vld [vmem:[%s2948_s1 + $0x108] sm:$0xf0]  ;;  %v1619_v21 = vor.u32 %v1915_v4, %v1616_v5  ;;  %v1459_v4 = vor.u32 %v1875_v58, %v1456_v59  ;;  %v1923_v5 = vld [vmem:[%s2948_s1 + $0x334] sm:$0xf]  ;;  %v1808_v50 = vld [vmem:[%s2948_s1 + $0x478] sm:$0xf0] }
  0x51   :  { %1069 = vmatpush.bf16.msra.mxu1 %v1275_v12  ;;  %v1491_v12 = vor.u32 %v1883_v62, %v1488_v63  ;;  %v1891_v62 = vld [vmem:[%s2948_s1 + $0x234] sm:$0xf]  ;;  %v1520_v63 = vld [vmem:[%s2948_s1 + $0x238] sm:$0xf0]  ;;  %v1961_v58 = vld [vmem:[%s2948_s1 + $0x464] sm:$0xf] }
  0x52   :  { %1083 = vmatpush.bf16.msra.mxu2 %v1339_v16  ;;  %v1680_v16 = vld [vmem:[%s2948_s1 + $0x378] sm:$0xf0]  ;;  %v1800_v59 = vld [vmem:[%s2948_s1 + $0x468] sm:$0xf0] }
  0x53   :  { %1097 = vmatpush.bf16.msra.mxu3 %v1403_v19  ;;  %v1881_v19 = vld [vmem:[%s2948_s1 + $0x1e4] sm:$0xf]  ;;  %v1683_v26 = vor.u32 %v1931_v15, %v1680_v16 }
  0x54   :  { %1056 = vmatpush.bf16.msra.mxu0 %v1775_v22  ;;  %v1371_v22 = vor.u32 %v1853_v7, %v1368_v9  ;;  %v1483_v29 = vor.u32 %v1881_v19, %v1480_v20  ;;  %v1523_v7 = vor.u32 %v1891_v62, %v1520_v63  ;;  %v1873_v9 = vld [vmem:[%s2948_s1 + $0x1a4] sm:$0xf]  ;;  %v1640_v20 = vld [vmem:[%s2948_s1 + $0x328] sm:$0xf0]  ;;  %v1803_v62 = vor.u32 %v1961_v58, %v1800_v59  ;;  %v1943_v63 = vld [vmem:[%s2948_s1 + $0x3d4] sm:$0xf] }
  0x55   :  { %1070 = vmatpush.bf16.msra.mxu1 %v1267_v25  ;;  %v2675_v25 = vor.u32 %v1820_v13, %v1234_v10  ;;  %v1448_v10 = vld [vmem:[%s2948_s1 + $0x1a8] sm:$0xf0]  ;;  %v1905_v16 = vld [vmem:[%s2948_s1 + $0x2a4] sm:$0xf] }
  0x56   :  { %1084 = vmatpush.bf16.msra.mxu2 %v1331_v28  ;;  %v1608_v28 = vld [vmem:[%s2948_s1 + $0x2e8] sm:$0xf0]  ;;  %v1921_v19 = vld [vmem:[%s2948_s1 + $0x324] sm:$0xf] }
  0x57   :  { %1098 = vmatpush.bf16.msra.mxu3 %v1395_v31  ;;  %v1672_v31 = vld [vmem:[%s2948_s1 + $0x368] sm:$0xf0]  ;;  %v1611_v35 = vor.u32 %v1913_v27, %v1608_v28  ;;  %v1504_v27 = vld [vmem:[%s2948_s1 + $0x218] sm:$0xf0]  ;;  %v1643_v28 = vor.u32 %v1921_v19, %v1640_v20 }
  0x58   :  { %1057 = vmatpush.bf16.msra.mxu0 %v1767_v34  ;;  %v1472_v34 = vld [vmem:[%s2948_s1 + $0x1d8] sm:$0xf0]  ;;  %v1675_v39 = vor.u32 %v1929_v30, %v1672_v31  ;;  %v1512_v13 = vld [vmem:[%s2948_s1 + $0x228] sm:$0xf0] }
  0x59   :  { %1071 = vmatpush.bf16.msra.mxu1 %v1259_v38  ;;  %v1536_v38 = vld [vmem:[%s2948_s1 + $0x258] sm:$0xf0]  ;;  %v1475_v43 = vor.u32 %v1879_v33, %v1472_v34  ;;  %v1869_v34 = vld [vmem:[%s2948_s1 + $0x184] sm:$0xf]  ;;  %v1768_v19 = vld [vmem:[%s2948_s1 + $0x428] sm:$0xf0] }
  0x5a   :  { %1085 = vmatpush.bf16.msra.mxu2 %v1323_v42  ;;  %v1600_v42 = vld [vmem:[%s2948_s1 + $0x2d8] sm:$0xf0] }
  0x5b   :  { %1099 = vmatpush.bf16.msra.mxu3 %v1387_v47  ;;  %v1539_v47 = vor.u32 %v1895_v37, %v1536_v38  ;;  %v1603_v51 = vor.u32 %v1911_v41, %v1600_v42  ;;  %v1568_v30 = vld [vmem:[%s2948_s1 + $0x298] sm:$0xf0]  ;;  %v1432_v37 = vld [vmem:[%s2948_s1 + $0x188] sm:$0xf0]  ;;  %v1885_v38 = vld [vmem:[%s2948_s1 + $0x204] sm:$0xf] }
  0x5c   :  { %1058 = vmatpush.bf16.msra.mxu0 %v1759_v52  ;;  %v1893_v52 = vld [vmem:[%s2948_s1 + $0x244] sm:$0xf]  ;;  %v1632_v33 = vld [vmem:[%s2948_s1 + $0x318] sm:$0xf0] }
  0x5d   :  { %1072 = vmatpush.bf16.msra.mxu1 %v1251_v56  ;;  %v1925_v56 = vld [vmem:[%s2948_s1 + $0x344] sm:$0xf] }
  0x5e   :  { %1086 = vmatpush.bf16.msra.mxu2 %v1315_v61  ;;  %v1901_v42 = vld [vmem:[%s2948_s1 + $0x284] sm:$0xf] }
  0x5f   :  { %1100 = vmatpush.bf16.msra.mxu3 %v1379_v1  ;;  %v1907_v1 = vld [vmem:[%s2948_s1 + $0x2b4] sm:$0xf] }
  0x60   :  { %1059 = vmatpush.bf16.msra.mxu0 %v1751_v6  ;;  %v1648_v6 = vld [vmem:[%s2948_s1 + $0x338] sm:$0xf0] }
  0x61   :  { %1073 = vmatpush.bf16.msra.mxu1 %v1243_v11  ;;  %v1587_v11 = vor.u32 %v1907_v1, %v1584_v3  ;;  %v1651_v15 = vor.u32 %v1923_v5, %v1648_v6  ;;  %v1959_v1 = vld [vmem:[%s2948_s1 + $0x454] sm:$0xf]  ;;  %v1792_v3 = vld [vmem:[%s2948_s1 + $0x458] sm:$0xf0]  ;;  %v1720_v6 = vld [vmem:[%s2948_s1 + $0x3c8] sm:$0xf0] }
  0x62   :  { %1087 = vmatpush.bf16.msra.mxu2 %v1307_v17  ;;  %v1576_v17 = vld [vmem:[%s2948_s1 + $0x2a8] sm:$0xf0]  ;;  %v1795_v5 = vor.u32 %v1959_v1, %v1792_v3 }
  0x63   :  { %1101 = vmatpush.bf16.msra.mxu3 %v1371_v22  ;;  %1060 = vmatmul.bf16.vlgmr.msra.gmra.mxu0 %v2675_v25  ;;  %v1871_v22 = vld [vmem:[%s2948_s1 + $0x194] sm:$0xf]  ;;  %v1579_v24 = vor.u32 %v1905_v16, %v1576_v17  ;;  %v1937_v16 = vld [vmem:[%s2948_s1 + $0x3a4] sm:$0xf]  ;;  %v1704_v17 = vld [vmem:[%s2948_s1 + $0x3a8] sm:$0xf0] }
  0x64   :  { %1108 = vmatpush.bf16.msrb.mxu0 %v1491_v12  ;;  %1074 = vmatmul.bf16.vlgmr.msra.gmra.mxu1 %v2243_v60  ;;  %v1656_v60 = vld [vmem:[%s2948_s1 + $0x348] sm:$0xf0]  ;;  %v1889_v12 = vld [vmem:[%s2948_s1 + $0x224] sm:$0xf]  ;;  %v1443_v31 = vor.u32 %v1871_v22, %v1440_v23  ;;  %v1707_v20 = vor.u32 %v1937_v16, %v1704_v17  ;;  %v1935_v22 = vld [vmem:[%s2948_s1 + $0x394] sm:$0xf] }
  0x65   :  { %1122 = vmatpush.bf16.msrb.mxu1 %v1555_v18  ;;  %1088 = vmatmul.bf16.vlgmr.msra.gmra.mxu2 %v2273_v8  ;;  %v1528_v8 = vld [vmem:[%s2948_s1 + $0x248] sm:$0xf0]  ;;  %v1659_v0 = vor.u32 %v1925_v56, %v1656_v60  ;;  %v1451_v18 = vor.u32 %v1873_v9, %v1448_v10  ;;  %v1945_v56 = vld [vmem:[%s2948_s1 + $0x3e4] sm:$0xf]  ;;  %v1939_v9 = vld [vmem:[%s2948_s1 + $0x3b4] sm:$0xf] }
  0x66   :  { %1136 = vmatpush.bf16.msrb.mxu2 %v1619_v21  ;;  %1102 = vmatmul.bf16.vlgmr.msra.gmra.mxu3 %v2257_v2  ;;  %v1592_v2 = vld [vmem:[%s2948_s1 + $0x2c8] sm:$0xf0]  ;;  %v1531_v57 = vor.u32 %v1893_v52, %v1528_v8  ;;  %v1515_v21 = vor.u32 %v1889_v12, %v1512_v13  ;;  %v1917_v52 = vld [vmem:[%s2948_s1 + $0x304] sm:$0xf]  ;;  %v1712_v10 = vld [vmem:[%s2948_s1 + $0x3b8] sm:$0xf0] }
  0x67   :  { %1150 = vmatpush.bf16.msrb.mxu3 %v1683_v26  ;;  %v1595_v61 = vor.u32 %v1909_v54, %v1592_v2  ;;  %v1887_v26 = vld [vmem:[%s2948_s1 + $0x214] sm:$0xf]  ;;  %v1624_v8 = vld [vmem:[%s2948_s1 + $0x308] sm:$0xf0]  ;;  %v1776_v12 = vld [vmem:[%s2948_s1 + $0x438] sm:$0xf0]  ;;  %v1715_v13 = vor.u32 %v1939_v9, %v1712_v10 }
  0x68   :  { %1109 = vmatpush.bf16.msrb.mxu0 %v1483_v29  ;;  %v1903_v29 = vld [vmem:[%s2948_s1 + $0x294] sm:$0xf]  ;;  %v1736_v60 = vld [vmem:[%s2948_s1 + $0x3e8] sm:$0xf0]  ;;  %v1696_v23 = vld [vmem:[%s2948_s1 + $0x398] sm:$0xf0] }
  0x69   :  { %1123 = vmatpush.bf16.msrb.mxu1 %v1547_v32  ;;  %v1919_v32 = vld [vmem:[%s2948_s1 + $0x314] sm:$0xf]  ;;  %v1571_v41 = vor.u32 %v1903_v29, %v1568_v30  ;;  %v1933_v29 = vld [vmem:[%s2948_s1 + $0x384] sm:$0xf]  ;;  %v1688_v30 = vld [vmem:[%s2948_s1 + $0x388] sm:$0xf0] }
  0x6a   :  { %1137 = vmatpush.bf16.msrb.mxu2 %v1611_v35  ;;  %v1507_v35 = vor.u32 %v1887_v26, %v1504_v27  ;;  %v1635_v46 = vor.u32 %v1919_v32, %v1632_v33  ;;  %v1760_v26 = vld [vmem:[%s2948_s1 + $0x418] sm:$0xf0]  ;;  %v1699_v27 = vor.u32 %v1935_v22, %v1696_v23  ;;  %v1752_v32 = vld [vmem:[%s2948_s1 + $0x408] sm:$0xf0]  ;;  %v1691_v33 = vor.u32 %v1933_v29, %v1688_v30 }
  0x6b   :  { %1151 = vmatpush.bf16.msrb.mxu3 %v1675_v39  ;;  %v1496_v39 = vld [vmem:[%s2948_s1 + $0x208] sm:$0xf0] }
  0x6c   :  { %1110 = vmatpush.bf16.msrb.mxu0 %v1475_v43  ;;  %v1947_v43 = vld [vmem:[%s2948_s1 + $0x3f4] sm:$0xf] }
  0x6d   :  { %1124 = vmatpush.bf16.msrb.mxu1 %v1539_v47  ;;  %v1560_v47 = vld [vmem:[%s2948_s1 + $0x288] sm:$0xf0]  ;;  %v1747_v54 = vor.u32 %v1947_v43, %v1744_v45 }
  0x6e   :  { %1138 = vmatpush.bf16.msrb.mxu2 %v1603_v51  ;;  %v1435_v51 = vor.u32 %v1869_v34, %v1432_v37  ;;  %v1563_v2 = vor.u32 %v1901_v42, %v1560_v47 }
  0x6f   :  { %1152 = vmatpush.bf16.msrb.mxu3 %v1667_v53  ;;  %v1499_v53 = vor.u32 %v1885_v38, %v1496_v39 }
  0x70   :  { %1111 = vmatpush.bf16.msrb.mxu0 %v1467_v55  ;;  %v1811_v55 = vor.u32 %v1963_v49, %v1808_v50 }
  0x71   :  { %1125 = vmatpush.bf16.msrb.mxu1 %v1531_v57  ;;  %v1627_v57 = vor.u32 %v1917_v52, %v1624_v8 }
  0x72   :  { %1139 = vmatpush.bf16.msrb.mxu2 %v1595_v61  ;;  %v1739_v61 = vor.u32 %v1945_v56, %v1736_v60 }
  0x73   :  { %1153 = vmatpush.bf16.msrb.mxu3 %v1659_v0  ;;  %v1728_v0 = vld [vmem:[%s2948_s1 + $0x3d8] sm:$0xf0] }
  0x74   :  { %1112 = vmatpush.bf16.msrb.mxu0 %v1459_v4  ;;  %v1731_v4 = vor.u32 %v1943_v63, %v1728_v0 }
  0x75   :  { %1126 = vmatpush.bf16.msrb.mxu1 %v1523_v7 }
  0x76   :  { %1140 = vmatpush.bf16.msrb.mxu2 %v1587_v11  ;;  %v1955_v11 = vld [vmem:[%s2948_s1 + $0x434] sm:$0xf] }
  0x77   :  { %1154 = vmatpush.bf16.msrb.mxu3 %v1651_v15  ;;  %v1779_v15 = vor.u32 %v1955_v11, %v1776_v12 }
  0x78   :  { %1113 = vmatpush.bf16.msrb.mxu0 %v1451_v18  ;;  %v1953_v18 = vld [vmem:[%s2948_s1 + $0x424] sm:$0xf] }
  0x79   :  { %1127 = vmatpush.bf16.msrb.mxu1 %v1515_v21  ;;  %v1771_v21 = vor.u32 %v1953_v18, %v1768_v19 }
  0x7a   :  { %1141 = vmatpush.bf16.msrb.mxu2 %v1579_v24  ;;  %v1951_v24 = vld [vmem:[%s2948_s1 + $0x414] sm:$0xf] }
  0x7b   :  { %1155 = vmatpush.bf16.msrb.mxu3 %v1643_v28  ;;  %v1763_v28 = vor.u32 %v1951_v24, %v1760_v26 }
  0x7c   :  { %1114 = vmatpush.bf16.msrb.mxu0 %v1443_v31  ;;  %v1949_v31 = vld [vmem:[%s2948_s1 + $0x404] sm:$0xf] }
  0x7d   :  { %1128 = vmatpush.bf16.msrb.mxu1 %v1507_v35  ;;  %v1755_v34 = vor.u32 %v1949_v31, %v1752_v32 }
  0x7e   :  { %1142 = vmatpush.bf16.msrb.mxu2 %v1571_v41 }
  0x7f   :  { %1156 = vmatpush.bf16.msrb.mxu3 %v1635_v46 }
  0x80   :  { %1115 = vmatpush.bf16.msrb.mxu0 %v1435_v51 }
  0x81   :  { %1129 = vmatpush.bf16.msrb.mxu1 %v1499_v53 }
  0x82   :  { %1143 = vmatpush.bf16.msrb.mxu2 %v1563_v2 }
  0x83   :  { %1157 = vmatpush.bf16.msrb.mxu3 %v1627_v57  ;;  %1116 = vmatmul.bf16.vlgmr.msrb.gmra.mxu0 %v2284_v14  ;;  %v1941_v14 = vld [vmem:[%s2948_s1 + $0x3c4] sm:$0xf] }
  0x84   :  { %1164 = vmatpush.bf16.msra.mxu0 %v1747_v54  ;;  %1130 = vmatmul.bf16.vlgmr.msrb.gmra.mxu1 %v2456_v36  ;;  %v1957_v36 = vld [vmem:[%s2948_s1 + $0x444] sm:$0xf] }
  0x85   :  { %1178 = vmatpush.bf16.msra.mxu1 %v1811_v55  ;;  %1144 = vmatmul.bf16.vlgmr.msrb.gmra.mxu2 %v2475_v44  ;;  %v1784_v44 = vld [vmem:[%s2948_s1 + $0x448] sm:$0xf0] }
  0x86   :  { %1158 = vmatmul.bf16.vlgmr.msrb.gmra.mxu3 %v2467_v40  ;;  %v1723_v40 = vor.u32 %v1941_v14, %v1720_v6  ;;  %v1787_v7 = vor.u32 %v1957_v36, %v1784_v44 }
  0x88   :  { %1165 = vmatpush.bf16.msra.mxu0 %v1739_v61 }
  0x89   :  { %1179 = vmatpush.bf16.msra.mxu1 %v1803_v62 }
  0x8c   :  { %1166 = vmatpush.bf16.msra.mxu0 %v1731_v4 }
  0x8d   :  { %1180 = vmatpush.bf16.msra.mxu1 %v1795_v5 }
  0x90   :  { %1167 = vmatpush.bf16.msra.mxu0 %v1723_v40 }
  0x91   :  { %1181 = vmatpush.bf16.msra.mxu1 %v1787_v7 }
  0x94   :  { %1168 = vmatpush.bf16.msra.mxu0 %v1715_v13 }
  0x95   :  { %1182 = vmatpush.bf16.msra.mxu1 %v1779_v15 }
  0x98   :  { %1169 = vmatpush.bf16.msra.mxu0 %v1707_v20 }
  0x99   :  { %1183 = vmatpush.bf16.msra.mxu1 %v1771_v21 }
  0x9c   :  { %1170 = vmatpush.bf16.msra.mxu0 %v1699_v27 }
  0x9d   :  { %1184 = vmatpush.bf16.msra.mxu1 %v1763_v28 }
  0xa0   :  { %1171 = vmatpush.bf16.msra.mxu0 %v1691_v33  ;;  %v949_v37 = vpop.f32.mrf.mxu0 }
  0xa1   :  { %1185 = vmatpush.bf16.msra.mxu1 %v1755_v34  ;;  %v963_v35 = vpop.f32.mrf.mxu1 }
  0xa3   :  { %1172 = vmatmul.bf16.vlgmr.msra.gmra.mxu0 %v2483_v48  ;;  %v168_v48 = vld [vmem:[%s2950_s2] sm:$0x3] }
  0xa4   :  { %1186 = vmatmul.bf16.vlgmr.msra.gmra.mxu1 %v2675_v25  ;;  %v170_v2 = vperm.slane %v168_v48, 0  ;;  %v171_v56 = vperm.slane %v168_v48, 1 }
  0xa6   :  { %v950_v60 = vadd.f32 %v949_v37, %v170_v2 }
  0xa8   :  { %v977_v38 = vpop.f32.mrf.mxu2  ;;  %v951_v41 = vpop.f32.mrf.mxu0  ;;  %v964_v62 = vadd.f32 %v963_v35, %v950_v60 }
  0xa9   :  { %v965_v39 = vpop.f32.mrf.mxu1  ;;  %v991_v42 = vpop.f32.mrf.mxu3  ;;  %v952_v6 = vadd.f32 %v951_v41, %v170_v2 }
  0xaa   :  { %v978_v1 = vadd.f32 %v977_v38, %v964_v62 }
  0xab   :  { %v966_v7 = vadd.f32 %v965_v39, %v952_v6 }
  0xac   :  { %v992_v36 = vadd.f32 %v991_v42, %v978_v1 }
  0xb0   :  { %v979_v43 = vpop.f32.mrf.mxu2 }
  0xb1   :  { %v993_v46 = vpop.f32.mrf.mxu3  ;;  %v980_v15 = vadd.f32 %v979_v43, %v966_v7 }
  0xb3   :  { %v994_v21 = vadd.f32 %v993_v46, %v980_v15 }
  0xc0   :  { %v1005_v47 = vpop.f32.mrf.mxu0 }
  0xc1   :  { %v1019_v45 = vpop.f32.mrf.mxu1  ;;  %v1006_v9 = vadd.f32 %v1005_v47, %v992_v36 }
  0xc3   :  { %v1020_v16 = vadd.f32 %v1019_v45, %v1006_v9 }
  0xc8   :  { %v1033_v49 = vpop.f32.mrf.mxu2  ;;  %v1007_v51 = vpop.f32.mrf.mxu0 }
  0xc9   :  { %v1021_v50 = vpop.f32.mrf.mxu1  ;;  %v1047_v52 = vpop.f32.mrf.mxu3  ;;  %v1034_v22 = vadd.f32 %v1033_v49, %v1020_v16  ;;  %v1008_v24 = vadd.f32 %v1007_v51, %v994_v21 }
  0xcb   :  { %v1048_v29 = vadd.f32 %v1047_v52, %v1034_v22  ;;  %v1022_v33 = vadd.f32 %v1021_v50, %v1008_v24 }
  0xd0   :  { %v1035_v8 = vpop.f32.mrf.mxu2 }
  0xd1   :  { %v1049_v25 = vpop.f32.mrf.mxu3  ;;  %v1036_v39 = vadd.f32 %v1035_v8, %v1022_v33 }
  0xd3   :  { %v1050_v45 = vadd.f32 %v1049_v25, %v1036_v39 }
  0xe0   :  { %v1061_v54 = vpop.f32.mrf.mxu0 }
  0xe1   :  { %v1075_v53 = vpop.f32.mrf.mxu1  ;;  %v1062_v34 = vadd.f32 %v1061_v54, %v1048_v29 }
  0xe2   :  { %v1076_v61 = vadd.f32 %v1075_v53, %v171_v56 }
  0xe8   :  { %v1089_v55 = vpop.f32.mrf.mxu2  ;;  %v1063_v58 = vpop.f32.mrf.mxu0 }
  0xe9   :  { %v1077_v57 = vpop.f32.mrf.mxu1  ;;  %v1103_v59 = vpop.f32.mrf.mxu3  ;;  %v1090_v63 = vadd.f32 %v1089_v55, %v1076_v61  ;;  %v1064_v49 = vadd.f32 %v1063_v58, %v1050_v45 }
  0xea   :  { %v1078_v44 = vadd.f32 %v1077_v57, %v171_v56 }
  0xeb   :  { %v1104_v4 = vadd.f32 %v1103_v59, %v1090_v63 }
  0xf0   :  { %v1091_v0 = vpop.f32.mrf.mxu2 }
  0xf1   :  { %v1105_v14 = vpop.f32.mrf.mxu3  ;;  %v1092_v11 = vadd.f32 %v1091_v0, %v1078_v44 }
  0xf3   :  { %v1106_v19 = vadd.f32 %v1105_v14, %v1092_v11 }
 0x100   :  { %v1117_v3 = vpop.f32.mrf.mxu0 }
 0x101   :  { %v1131_v5 = vpop.f32.mrf.mxu1  ;;  %v1118_v40 = vadd.f32 %v1117_v3, %v1104_v4 }
 0x103   :  { %v1132_v12 = vadd.f32 %v1131_v5, %v1118_v40 }
 0x108   :  { %v1145_v10 = vpop.f32.mrf.mxu2  ;;  %v1119_v13 = vpop.f32.mrf.mxu0 }
 0x109   :  { %v1133_v17 = vpop.f32.mrf.mxu1  ;;  %v1159_v18 = vpop.f32.mrf.mxu3  ;;  %v1146_v20 = vadd.f32 %v1145_v10, %v1132_v12  ;;  %v1120_v23 = vadd.f32 %v1119_v13, %v1106_v19 }
 0x10b   :  { %v1160_v26 = vadd.f32 %v1159_v18, %v1146_v20  ;;  %v1134_v30 = vadd.f32 %v1133_v17, %v1120_v23 }
 0x110   :  { %v1147_v27 = vpop.f32.mrf.mxu2 }
 0x111   :  { %v1148_v35 = vadd.f32 %v1147_v27, %v1134_v30  ;;  %v1161_v38 = vpop.f32.mrf.mxu3 }
 0x113   :  { %v1162_v42 = vadd.f32 %v1161_v38, %v1148_v35 }
 0x120   :  { %v1173_v28 = vpop.f32.mrf.mxu0 }
 0x121   :  { %v1174_v31 = vadd.f32 %v1173_v28, %v1160_v26  ;;  %v1187_v32 = vpop.f32.mrf.mxu1 }
 0x123   :  { %v1188_v37 = vadd.f32 %v1187_v32, %v1174_v31 }
 0x125   :  { %v1192_v41 = vpack.c.bf16 %v1188_v37, %v1062_v34 }
 0x127   :  { %1194 = vst [vmem:[%s2951_s3] sm:$0xff] %v1192_v41 }
 0x128   :  { %v1175_v43 = vpop.f32.mrf.mxu0 }
 0x129   :  { %v1176_v46 = vadd.f32 %v1175_v43, %v1162_v42  ;;  %v1189_v47 = vpop.f32.mrf.mxu1 }
 0x12b   :  { %v1190_v51 = vadd.f32 %v1189_v47, %v1176_v46 }
 0x12d   :  { %v1193_v52 = vpack.c.bf16 %v1190_v51, %v1064_v49 }
 0x12f   :  { %1195 = vst [vmem:[%s2951_s3 + $0x8] sm:$0xff] %v1193_v52 }

// kernel: autoencoder_forward.9
= control target key start
LH: loop header
LB: loop body
LE: loop exit
PB: predicated region body
PF: predicated region fallthrough
CT: control target
= control target key end

     0   :  { %s3349_s1 = inlined_call_operand.vmem [shape: bf16[2304,128], index: 1, kind: input, shape index: {}]   ;;  %s3350_s0 = inlined_call_operand.vmem [shape: bf16[32,2304], index: 0, kind: input, shape index: {}]   ;;  %s3351_s2 = inlined_call_operand.vmem [shape: f32[1,128], index: 2, kind: input, shape index: {}]   ;;  %s3352_s3 = inlined_call_operand.vmem [shape: bf16[32,128], index: 3, kind: output, shape index: {}]  }
   0x1   :  { %v2507_v0 = vld [vmem:[%s3349_s1 + $0x38] sm:$0xff]  ;;  %v2506_v4 = vld [vmem:[%s3349_s1 + $0x30] sm:$0xff]  ;;  %v2505_v8 = vld [vmem:[%s3349_s1 + $0x28] sm:$0xff] }
   0x2   :  { %v2515_v1 = vld [vmem:[%s3349_s1 + $0x78] sm:$0xff]  ;;  %1386 = vmatpush.bf16.msra.mxu0 %v2507_v0  ;;  %v2514_v5 = vld [vmem:[%s3349_s1 + $0x70] sm:$0xff]  ;;  %v2513_v9 = vld [vmem:[%s3349_s1 + $0x68] sm:$0xff] }
   0x3   :  { %v2523_v2 = vld [vmem:[%s3349_s1 + $0xb8] sm:$0xff]  ;;  %1405 = vmatpush.bf16.msra.mxu1 %v2515_v1  ;;  %v2522_v6 = vld [vmem:[%s3349_s1 + $0xb0] sm:$0xff]  ;;  %v2521_v10 = vld [vmem:[%s3349_s1 + $0xa8] sm:$0xff] }
   0x4   :  { %v2531_v3 = vld [vmem:[%s3349_s1 + $0xf8] sm:$0xff]  ;;  %1424 = vmatpush.bf16.msra.mxu2 %v2523_v2  ;;  %v2530_v7 = vld [vmem:[%s3349_s1 + $0xf0] sm:$0xff]  ;;  %v2529_v11 = vld [vmem:[%s3349_s1 + $0xe8] sm:$0xff] }
   0x5   :  { %1443 = vmatpush.bf16.msra.mxu3 %v2531_v3  ;;  %v2504_v12 = vld [vmem:[%s3349_s1 + $0x20] sm:$0xff]  ;;  %v2503_v16 = vld [vmem:[%s3349_s1 + $0x18] sm:$0xff]  ;;  %v2502_v20 = vld [vmem:[%s3349_s1 + $0x10] sm:$0xff] }
   0x6   :  { %1387 = vmatpush.bf16.msra.mxu0 %v2506_v4  ;;  %v2512_v13 = vld [vmem:[%s3349_s1 + $0x60] sm:$0xff]  ;;  %v2511_v17 = vld [vmem:[%s3349_s1 + $0x58] sm:$0xff]  ;;  %v2510_v21 = vld [vmem:[%s3349_s1 + $0x50] sm:$0xff] }
   0x7   :  { %1406 = vmatpush.bf16.msra.mxu1 %v2514_v5  ;;  %v2520_v14 = vld [vmem:[%s3349_s1 + $0xa0] sm:$0xff]  ;;  %v2519_v18 = vld [vmem:[%s3349_s1 + $0x98] sm:$0xff]  ;;  %v2518_v22 = vld [vmem:[%s3349_s1 + $0x90] sm:$0xff] }
   0x8   :  { %1425 = vmatpush.bf16.msra.mxu2 %v2522_v6  ;;  %v2528_v15 = vld [vmem:[%s3349_s1 + $0xe0] sm:$0xff]  ;;  %v2527_v19 = vld [vmem:[%s3349_s1 + $0xd8] sm:$0xff]  ;;  %v2526_v23 = vld [vmem:[%s3349_s1 + $0xd0] sm:$0xff] }
   0x9   :  { %1444 = vmatpush.bf16.msra.mxu3 %v2530_v7  ;;  %v2501_v24 = vld [vmem:[%s3349_s1 + $0x8] sm:$0xff]  ;;  %v2500_v28 = vld [vmem:[%s3349_s1] sm:$0xff]  ;;  %v2474_v37 = vld [vmem:[%s3350_s0 + $0x4c] sm:$0xf0] }
   0xa   :  { %1388 = vmatpush.bf16.msra.mxu0 %v2505_v8  ;;  %v2509_v25 = vld [vmem:[%s3349_s1 + $0x48] sm:$0xff]  ;;  %v2508_v29 = vld [vmem:[%s3349_s1 + $0x40] sm:$0xff]  ;;  %v1756_v39 = vld [vmem:[%s3350_s0 + $0x50] sm:$0xf0] }
   0xb   :  { %1407 = vmatpush.bf16.msra.mxu1 %v2513_v9  ;;  %v2517_v26 = vld [vmem:[%s3349_s1 + $0x88] sm:$0xff]  ;;  %v2516_v30 = vld [vmem:[%s3349_s1 + $0x80] sm:$0xff]  ;;  %v2555_v40 = vld [vmem:[%s3349_s1 + $0x1b8] sm:$0xff] }
   0xc   :  { %1426 = vmatpush.bf16.msra.mxu2 %v2521_v10  ;;  %v2525_v27 = vld [vmem:[%s3349_s1 + $0xc8] sm:$0xff]  ;;  %v2524_v31 = vld [vmem:[%s3349_s1 + $0xc0] sm:$0xff]  ;;  %v2539_v41 = vld [vmem:[%s3349_s1 + $0x138] sm:$0xff] }
   0xd   :  { %1445 = vmatpush.bf16.msra.mxu3 %v2529_v11  ;;  %v1746_v32 = vld [vmem:[%s3350_s0] sm:$0xf]  ;;  %v2473_v33 = vld [vmem:[%s3350_s0 + $0x44] sm:$0xf0]  ;;  %v2464_v34 = vld [vmem:[%s3350_s0 + $0x4] sm:$0xf] }
   0xe   :  { %1389 = vmatpush.bf16.msra.mxu0 %v2504_v12  ;;  %v1748_v35 = vld [vmem:[%s3350_s0 + $0x48] sm:$0xf0]  ;;  %v1754_v36 = vld [vmem:[%s3350_s0 + $0x8] sm:$0xf]  ;;  %v1747_v42 = vor.u32 %v2473_v33, %v1746_v32  ;;  %v2547_v46 = vld [vmem:[%s3349_s1 + $0x178] sm:$0xff] }
   0xf   :  { %1408 = vmatpush.bf16.msra.mxu1 %v2512_v13  ;;  %v2465_v38 = vld [vmem:[%s3350_s0 + $0xc] sm:$0xf]  ;;  %v1751_v43 = vor.u32 %v2464_v34, %v1748_v35  ;;  %v1755_v44 = vor.u32 %v2474_v37, %v1754_v36  ;;  %v2563_v47 = vld [vmem:[%s3349_s1 + $0x1f8] sm:$0xff]  ;;  %v2554_v48 = vld [vmem:[%s3349_s1 + $0x1b0] sm:$0xff] }
  0x10   :  { %1427 = vmatpush.bf16.msra.mxu2 %v2520_v14  ;;  %v1759_v45 = vor.u32 %v2465_v38, %v1756_v39  ;;  %v2538_v49 = vld [vmem:[%s3349_s1 + $0x130] sm:$0xff]  ;;  %v2553_v52 = vld [vmem:[%s3349_s1 + $0x1a8] sm:$0xff]  ;;  %v2552_v56 = vld [vmem:[%s3349_s1 + $0x1a0] sm:$0xff] }
  0x11   :  { %1446 = vmatpush.bf16.msra.mxu3 %v2528_v15  ;;  %v2546_v50 = vld [vmem:[%s3349_s1 + $0x170] sm:$0xff]  ;;  %v2537_v53 = vld [vmem:[%s3349_s1 + $0x128] sm:$0xff]  ;;  %v2536_v57 = vld [vmem:[%s3349_s1 + $0x120] sm:$0xff] }
  0x12   :  { %1390 = vmatpush.bf16.msra.mxu0 %v2503_v16  ;;  %v2562_v51 = vld [vmem:[%s3349_s1 + $0x1f0] sm:$0xff]  ;;  %v2545_v54 = vld [vmem:[%s3349_s1 + $0x168] sm:$0xff]  ;;  %v2544_v58 = vld [vmem:[%s3349_s1 + $0x160] sm:$0xff] }
  0x13   :  { %1409 = vmatpush.bf16.msra.mxu1 %v2511_v17  ;;  %v2561_v55 = vld [vmem:[%s3349_s1 + $0x1e8] sm:$0xff]  ;;  %v2560_v59 = vld [vmem:[%s3349_s1 + $0x1e0] sm:$0xff]  ;;  %v1818_v60 = vld [vmem:[%s3350_s0 + $0x90] sm:$0xf] }
  0x14   :  { %1428 = vmatpush.bf16.msra.mxu2 %v2519_v18  ;;  %v2491_v61 = vld [vmem:[%s3350_s0 + $0xd4] sm:$0xf0]  ;;  %v2482_v62 = vld [vmem:[%s3350_s0 + $0x94] sm:$0xf]  ;;  %v1820_v63 = vld [vmem:[%s3350_s0 + $0xd8] sm:$0xf0] }
  0x15   :  { %1447 = vmatpush.bf16.msra.mxu3 %v2527_v19  ;;  %v1826_v0 = vld [vmem:[%s3350_s0 + $0x98] sm:$0xf]  ;;  %v2492_v1 = vld [vmem:[%s3350_s0 + $0xdc] sm:$0xf0]  ;;  %v2483_v2 = vld [vmem:[%s3350_s0 + $0x9c] sm:$0xf]  ;;  %v1819_v6 = vor.u32 %v2491_v61, %v1818_v60  ;;  %v1823_v7 = vor.u32 %v2482_v62, %v1820_v63 }
  0x16   :  { %1391 = vmatpush.bf16.msra.mxu0 %v2502_v20  ;;  %v1828_v3 = vld [vmem:[%s3350_s0 + $0xe0] sm:$0xf0]  ;;  %v2551_v4 = vld [vmem:[%s3349_s1 + $0x198] sm:$0xff]  ;;  %v1827_v8 = vor.u32 %v2492_v1, %v1826_v0  ;;  %v2550_v12 = vld [vmem:[%s3349_s1 + $0x190] sm:$0xff] }
  0x17   :  { %1410 = vmatpush.bf16.msra.mxu1 %v2510_v21  ;;  %v2535_v5 = vld [vmem:[%s3349_s1 + $0x118] sm:$0xff]  ;;  %v1831_v9 = vor.u32 %v2483_v2, %v1828_v3  ;;  %v2534_v13 = vld [vmem:[%s3349_s1 + $0x110] sm:$0xff]  ;;  %v2549_v16 = vld [vmem:[%s3349_s1 + $0x188] sm:$0xff] }
  0x18   :  { %1429 = vmatpush.bf16.msra.mxu2 %v2518_v22  ;;  %v2543_v10 = vld [vmem:[%s3349_s1 + $0x158] sm:$0xff]  ;;  %v2542_v14 = vld [vmem:[%s3349_s1 + $0x150] sm:$0xff]  ;;  %v2533_v17 = vld [vmem:[%s3349_s1 + $0x108] sm:$0xff] }
  0x19   :  { %1448 = vmatpush.bf16.msra.mxu3 %v2526_v23  ;;  %v2559_v11 = vld [vmem:[%s3349_s1 + $0x1d8] sm:$0xff]  ;;  %v2558_v15 = vld [vmem:[%s3349_s1 + $0x1d0] sm:$0xff]  ;;  %v2541_v18 = vld [vmem:[%s3349_s1 + $0x148] sm:$0xff] }
  0x1a   :  { %1392 = vmatpush.bf16.msra.mxu0 %v2501_v24  ;;  %v2557_v19 = vld [vmem:[%s3349_s1 + $0x1c8] sm:$0xff]  ;;  %v2548_v20 = vld [vmem:[%s3349_s1 + $0x180] sm:$0xff]  ;;  %v1762_v24 = vld [vmem:[%s3350_s0 + $0x10] sm:$0xf] }
  0x1b   :  { %1411 = vmatpush.bf16.msra.mxu1 %v2509_v25  ;;  %v2532_v21 = vld [vmem:[%s3349_s1 + $0x100] sm:$0xff]  ;;  %v2587_v25 = vld [vmem:[%s3349_s1 + $0x2b8] sm:$0xff]  ;;  %v2586_v37 = vld [vmem:[%s3349_s1 + $0x2b0] sm:$0xff] }
  0x1c   :  { %1430 = vmatpush.bf16.msra.mxu2 %v2517_v26  ;;  %v2540_v22 = vld [vmem:[%s3349_s1 + $0x140] sm:$0xff]  ;;  %v2571_v26 = vld [vmem:[%s3349_s1 + $0x238] sm:$0xff]  ;;  %v1844_v61 = vld [vmem:[%s3350_s0 + $0xf0] sm:$0xf0] }
  0x1d   :  { %1449 = vmatpush.bf16.msra.mxu3 %v2525_v27  ;;  %v2556_v23 = vld [vmem:[%s3349_s1 + $0x1c0] sm:$0xff]  ;;  %v2475_v27 = vld [vmem:[%s3350_s0 + $0x54] sm:$0xf0]  ;;  %v2467_v32 = vld [vmem:[%s3350_s0 + $0x1c] sm:$0xf] }
  0x1e   :  { %1393 = vmatpush.bf16.msra.mxu0 %v2500_v28  ;;  %v2466_v28 = vld [vmem:[%s3350_s0 + $0x14] sm:$0xf]  ;;  %v1772_v33 = vld [vmem:[%s3350_s0 + $0x60] sm:$0xf0]  ;;  %v2579_v34 = vld [vmem:[%s3349_s1 + $0x278] sm:$0xff]  ;;  %v1763_v36 = vor.u32 %v2475_v27, %v1762_v24 }
  0x1f   :  { %1412 = vmatpush.bf16.msra.mxu1 %v2508_v29  ;;  %v1764_v29 = vld [vmem:[%s3350_s0 + $0x58] sm:$0xf0]  ;;  %v2582_v1 = vld [vmem:[%s3349_s1 + $0x290] sm:$0xff]  ;;  %v1780_v24 = vld [vmem:[%s3350_s0 + $0x68] sm:$0xf0] }
  0x20   :  { %1431 = vmatpush.bf16.msra.mxu2 %v2516_v30  ;;  %v1770_v30 = vld [vmem:[%s3350_s0 + $0x18] sm:$0xf]  ;;  %v1767_v38 = vor.u32 %v2466_v28, %v1764_v29  ;;  %v2469_v27 = vld [vmem:[%s3350_s0 + $0x2c] sm:$0xf]  ;;  %v1788_v28 = vld [vmem:[%s3350_s0 + $0x70] sm:$0xf0] }
  0x21   :  { %1450 = vmatpush.bf16.msra.mxu3 %v2524_v31  ;;  %1394 = vmatmul.bf16.vlgmr.msra.gmra.mxu0 %v1747_v42  ;;  %v2476_v31 = vld [vmem:[%s3350_s0 + $0x5c] sm:$0xf0]  ;;  %v2595_v35 = vld [vmem:[%s3349_s1 + $0x2f8] sm:$0xff]  ;;  %v2578_v42 = vld [vmem:[%s3349_s1 + $0x270] sm:$0xff] }
  0x22   :  { %1462 = vmatpush.bf16.msrb.mxu0 %v2539_v41  ;;  %1413 = vmatmul.bf16.vlgmr.msra.gmra.mxu1 %v1751_v43  ;;  %v1771_v39 = vor.u32 %v2476_v31, %v1770_v30  ;;  %v2570_v41 = vld [vmem:[%s3349_s1 + $0x230] sm:$0xff]  ;;  %v2567_v60 = vld [vmem:[%s3349_s1 + $0x218] sm:$0xff] }
  0x23   :  { %1432 = vmatmul.bf16.vlgmr.msra.gmra.mxu2 %v1755_v44  ;;  %1481 = vmatpush.bf16.msrb.mxu1 %v2547_v46  ;;  %v2594_v43 = vld [vmem:[%s3349_s1 + $0x2f0] sm:$0xff]  ;;  %v2585_v44 = vld [vmem:[%s3349_s1 + $0x2a8] sm:$0xff]  ;;  %v2575_v62 = vld [vmem:[%s3349_s1 + $0x258] sm:$0xff] }
  0x24   :  { %1500 = vmatpush.bf16.msrb.mxu2 %v2555_v40  ;;  %1451 = vmatmul.bf16.vlgmr.msra.gmra.mxu3 %v1759_v45  ;;  %v1775_v40 = vor.u32 %v2467_v32, %v1772_v33  ;;  %v2569_v45 = vld [vmem:[%s3349_s1 + $0x228] sm:$0xff]  ;;  %v2591_v63 = vld [vmem:[%s3349_s1 + $0x2d8] sm:$0xff]  ;;  %v2610_v30 = vld [vmem:[%s3349_s1 + $0x370] sm:$0xff]  ;;  %v1791_v33 = vor.u32 %v2469_v27, %v1788_v28 }
  0x25   :  { %1519 = vmatpush.bf16.msrb.mxu3 %v2563_v47  ;;  %v2577_v46 = vld [vmem:[%s3349_s1 + $0x268] sm:$0xff]  ;;  %v2640_v27 = vld [vmem:[%s3349_s1 + $0x460] sm:$0xff]  ;;  %v2631_v28 = vld [vmem:[%s3349_s1 + $0x418] sm:$0xff] }
  0x26   :  { %1463 = vmatpush.bf16.msrb.mxu0 %v2538_v49  ;;  %v2593_v47 = vld [vmem:[%s3349_s1 + $0x2e8] sm:$0xff]  ;;  %v2568_v49 = vld [vmem:[%s3349_s1 + $0x220] sm:$0xff] }
  0x27   :  { %1482 = vmatpush.bf16.msrb.mxu1 %v2546_v50  ;;  %v2576_v50 = vld [vmem:[%s3349_s1 + $0x260] sm:$0xff] }
  0x28   :  { %1501 = vmatpush.bf16.msrb.mxu2 %v2554_v48  ;;  %v2584_v48 = vld [vmem:[%s3349_s1 + $0x2a0] sm:$0xff] }
  0x29   :  { %1520 = vmatpush.bf16.msrb.mxu3 %v2562_v51  ;;  %v2592_v51 = vld [vmem:[%s3349_s1 + $0x2e0] sm:$0xff] }
  0x2a   :  { %1464 = vmatpush.bf16.msrb.mxu0 %v2537_v53  ;;  %v2493_v53 = vld [vmem:[%s3350_s0 + $0xe4] sm:$0xf0] }
  0x2b   :  { %1483 = vmatpush.bf16.msrb.mxu1 %v2545_v54  ;;  %v2583_v54 = vld [vmem:[%s3349_s1 + $0x298] sm:$0xff] }
  0x2c   :  { %1502 = vmatpush.bf16.msrb.mxu2 %v2553_v52  ;;  %v1834_v52 = vld [vmem:[%s3350_s0 + $0xa0] sm:$0xf] }
  0x2d   :  { %1521 = vmatpush.bf16.msrb.mxu3 %v2561_v55  ;;  %v2484_v55 = vld [vmem:[%s3350_s0 + $0xa4] sm:$0xf]  ;;  %v1835_v0 = vor.u32 %v2493_v53, %v1834_v52  ;;  %v2487_v52 = vld [vmem:[%s3350_s0 + $0xbc] sm:$0xf] }
  0x2e   :  { %1465 = vmatpush.bf16.msrb.mxu0 %v2536_v57  ;;  %v1842_v57 = vld [vmem:[%s3350_s0 + $0xa8] sm:$0xf]  ;;  %v2599_v53 = vld [vmem:[%s3349_s1 + $0x318] sm:$0xff] }
  0x2f   :  { %1484 = vmatpush.bf16.msrb.mxu1 %v2544_v58  ;;  %v2494_v58 = vld [vmem:[%s3350_s0 + $0xec] sm:$0xf0] }
  0x30   :  { %1503 = vmatpush.bf16.msrb.mxu2 %v2552_v56  ;;  %v1836_v56 = vld [vmem:[%s3350_s0 + $0xe8] sm:$0xf0]  ;;  %v1843_v3 = vor.u32 %v2494_v58, %v1842_v57  ;;  %v2606_v58 = vld [vmem:[%s3349_s1 + $0x350] sm:$0xff] }
  0x31   :  { %1522 = vmatpush.bf16.msrb.mxu3 %v2560_v59  ;;  %1399 = vmatmul.bf16.gmra.mxu0 %v1819_v6  ;;  %v2485_v59 = vld [vmem:[%s3350_s0 + $0xac] sm:$0xf]  ;;  %v1839_v2 = vor.u32 %v2484_v55, %v1836_v56  ;;  %v2574_v6 = vld [vmem:[%s3349_s1 + $0x250] sm:$0xff]  ;;  %v2623_v55 = vld [vmem:[%s3349_s1 + $0x3d8] sm:$0xff] }
  0x32   :  { %1466 = vmatpush.bf16.msrb.mxu0 %v2535_v5  ;;  %1418 = vmatmul.bf16.gmra.mxu1 %v1823_v7  ;;  %v2566_v5 = vld [vmem:[%s3349_s1 + $0x210] sm:$0xff] }
  0x33   :  { %1437 = vmatmul.bf16.gmra.mxu2 %v1827_v8  ;;  %1485 = vmatpush.bf16.msrb.mxu1 %v2543_v10  ;;  %v2590_v7 = vld [vmem:[%s3349_s1 + $0x2d0] sm:$0xff]  ;;  %v2581_v8 = vld [vmem:[%s3349_s1 + $0x288] sm:$0xff] }
  0x34   :  { %1504 = vmatpush.bf16.msrb.mxu2 %v2551_v4  ;;  %1456 = vmatmul.bf16.gmra.mxu3 %v1831_v9  ;;  %v1847_v4 = vor.u32 %v2485_v59, %v1844_v61  ;;  %v2565_v9 = vld [vmem:[%s3349_s1 + $0x208] sm:$0xff]  ;;  %v2614_v56 = vld [vmem:[%s3349_s1 + $0x390] sm:$0xff] }
  0x35   :  { %1523 = vmatpush.bf16.msrb.mxu3 %v2559_v11  ;;  %v2573_v10 = vld [vmem:[%s3349_s1 + $0x248] sm:$0xff] }
  0x36   :  { %1467 = vmatpush.bf16.msrb.mxu0 %v2534_v13  ;;  %v2589_v11 = vld [vmem:[%s3349_s1 + $0x2c8] sm:$0xff]  ;;  %v2619_v13 = vld [vmem:[%s3349_s1 + $0x3b8] sm:$0xff] }
  0x37   :  { %1486 = vmatpush.bf16.msrb.mxu1 %v2542_v14  ;;  %v2564_v14 = vld [vmem:[%s3349_s1 + $0x200] sm:$0xff] }
  0x38   :  { %1505 = vmatpush.bf16.msrb.mxu2 %v2550_v12  ;;  %v2580_v12 = vld [vmem:[%s3349_s1 + $0x280] sm:$0xff] }
  0x39   :  { %1524 = vmatpush.bf16.msrb.mxu3 %v2558_v15  ;;  %v2572_v15 = vld [vmem:[%s3349_s1 + $0x240] sm:$0xff] }
  0x3a   :  { %1468 = vmatpush.bf16.msrb.mxu0 %v2533_v17  ;;  %v1778_v17 = vld [vmem:[%s3350_s0 + $0x20] sm:$0xf] }
  0x3b   :  { %1487 = vmatpush.bf16.msrb.mxu1 %v2541_v18  ;;  %v2477_v18 = vld [vmem:[%s3350_s0 + $0x64] sm:$0xf0] }
  0x3c   :  { %1506 = vmatpush.bf16.msrb.mxu2 %v2549_v16  ;;  %v2588_v16 = vld [vmem:[%s3349_s1 + $0x2c0] sm:$0xff]  ;;  %v1779_v29 = vor.u32 %v2477_v18, %v1778_v17  ;;  %v2471_v18 = vld [vmem:[%s3350_s0 + $0x3c] sm:$0xf] }
  0x3d   :  { %1525 = vmatpush.bf16.msrb.mxu3 %v2557_v19  ;;  %v2603_v19 = vld [vmem:[%s3349_s1 + $0x338] sm:$0xff]  ;;  %v2480_v17 = vld [vmem:[%s3350_s0 + $0x7c] sm:$0xf0] }
  0x3e   :  { %1469 = vmatpush.bf16.msrb.mxu0 %v2532_v21  ;;  %v2468_v21 = vld [vmem:[%s3350_s0 + $0x24] sm:$0xf] }
  0x3f   :  { %1488 = vmatpush.bf16.msrb.mxu1 %v2540_v22  ;;  %v2627_v22 = vld [vmem:[%s3349_s1 + $0x3f8] sm:$0xff]  ;;  %v1783_v31 = vor.u32 %v2468_v21, %v1780_v24  ;;  %v2633_v24 = vld [vmem:[%s3349_s1 + $0x428] sm:$0xff] }
  0x40   :  { %1507 = vmatpush.bf16.msrb.mxu2 %v2548_v20  ;;  %v2611_v20 = vld [vmem:[%s3349_s1 + $0x378] sm:$0xff] }
  0x41   :  { %1526 = vmatpush.bf16.msrb.mxu3 %v2556_v23  ;;  %1470 = vmatmul.bf16.vlgmr.msrb.gmra.mxu0 %v1763_v36  ;;  %v2618_v23 = vld [vmem:[%s3349_s1 + $0x3b0] sm:$0xff]  ;;  %v2617_v36 = vld [vmem:[%s3349_s1 + $0x3a8] sm:$0xff] }
  0x42   :  { %1538 = vmatpush.bf16.msra.mxu0 %v2571_v26  ;;  %1489 = vmatmul.bf16.vlgmr.msrb.gmra.mxu1 %v1767_v38  ;;  %v2478_v26 = vld [vmem:[%s3350_s0 + $0x6c] sm:$0xf0]  ;;  %v2601_v38 = vld [vmem:[%s3349_s1 + $0x328] sm:$0xff] }
  0x43   :  { %1557 = vmatpush.bf16.msra.mxu1 %v2579_v34  ;;  %1508 = vmatmul.bf16.vlgmr.msrb.gmra.mxu2 %v1771_v39  ;;  %v2602_v34 = vld [vmem:[%s3349_s1 + $0x330] sm:$0xff]  ;;  %v2625_v39 = vld [vmem:[%s3349_s1 + $0x3e8] sm:$0xff] }
  0x44   :  { %1576 = vmatpush.bf16.msra.mxu2 %v2587_v25  ;;  %1527 = vmatmul.bf16.vlgmr.msrb.gmra.mxu3 %v1775_v40  ;;  %v1786_v25 = vld [vmem:[%s3350_s0 + $0x28] sm:$0xf]  ;;  %v2616_v40 = vld [vmem:[%s3349_s1 + $0x3a0] sm:$0xff] }
  0x45   :  { %1595 = vmatpush.bf16.msra.mxu3 %v2595_v35  ;;  %v1787_v32 = vor.u32 %v2478_v26, %v1786_v25  ;;  %v2626_v35 = vld [vmem:[%s3349_s1 + $0x3f0] sm:$0xff]  ;;  %v2641_v25 = vld [vmem:[%s3349_s1 + $0x468] sm:$0xff]  ;;  %v2632_v26 = vld [vmem:[%s3349_s1 + $0x420] sm:$0xff] }
  0x46   :  { %1539 = vmatpush.bf16.msra.mxu0 %v2570_v41  ;;  %v2608_v41 = vld [vmem:[%s3349_s1 + $0x360] sm:$0xff] }
  0x47   :  { %1558 = vmatpush.bf16.msra.mxu1 %v2578_v42  ;;  %v2600_v42 = vld [vmem:[%s3349_s1 + $0x320] sm:$0xff] }
  0x48   :  { %1577 = vmatpush.bf16.msra.mxu2 %v2586_v37  ;;  %v2609_v37 = vld [vmem:[%s3349_s1 + $0x368] sm:$0xff] }
  0x49   :  { %1596 = vmatpush.bf16.msra.mxu3 %v2594_v43  ;;  %v2624_v43 = vld [vmem:[%s3349_s1 + $0x3e0] sm:$0xff] }
  0x4a   :  { %1540 = vmatpush.bf16.msra.mxu0 %v2569_v45  ;;  %v1850_v45 = vld [vmem:[%s3350_s0 + $0xb0] sm:$0xf] }
  0x4b   :  { %1559 = vmatpush.bf16.msra.mxu1 %v2577_v46  ;;  %v2495_v46 = vld [vmem:[%s3350_s0 + $0xf4] sm:$0xf0] }
  0x4c   :  { %1578 = vmatpush.bf16.msra.mxu2 %v2585_v44  ;;  %v2615_v44 = vld [vmem:[%s3349_s1 + $0x398] sm:$0xff]  ;;  %v1851_v57 = vor.u32 %v2495_v46, %v1850_v45  ;;  %v2637_v45 = vld [vmem:[%s3349_s1 + $0x448] sm:$0xff]  ;;  %v2628_v46 = vld [vmem:[%s3349_s1 + $0x400] sm:$0xff] }
  0x4d   :  { %1597 = vmatpush.bf16.msra.mxu3 %v2593_v47  ;;  %v2607_v47 = vld [vmem:[%s3349_s1 + $0x358] sm:$0xff] }
  0x4e   :  { %1541 = vmatpush.bf16.msra.mxu0 %v2568_v49  ;;  %v1852_v49 = vld [vmem:[%s3350_s0 + $0xf8] sm:$0xf0] }
  0x4f   :  { %1560 = vmatpush.bf16.msra.mxu1 %v2576_v50  ;;  %v1858_v50 = vld [vmem:[%s3350_s0 + $0xb8] sm:$0xf] }
  0x50   :  { %1579 = vmatpush.bf16.msra.mxu2 %v2584_v48  ;;  %v2486_v48 = vld [vmem:[%s3350_s0 + $0xb4] sm:$0xf] }
  0x51   :  { %1598 = vmatpush.bf16.msra.mxu3 %v2592_v51  ;;  %1475 = vmatmul.bf16.gmra.mxu0 %v1835_v0  ;;  %v2496_v51 = vld [vmem:[%s3350_s0 + $0xfc] sm:$0xf0]  ;;  %v1855_v59 = vor.u32 %v2486_v48, %v1852_v49  ;;  %v2613_v0 = vld [vmem:[%s3349_s1 + $0x388] sm:$0xff] }
  0x52   :  { %1542 = vmatpush.bf16.msra.mxu0 %v2567_v60  ;;  %1494 = vmatmul.bf16.gmra.mxu1 %v1839_v2  ;;  %v1859_v60 = vor.u32 %v2496_v51, %v1858_v50  ;;  %v2597_v2 = vld [vmem:[%s3349_s1 + $0x308] sm:$0xff]  ;;  %v2671_v48 = vld [vmem:[%s3351_s2] ss:$0 sm:$0xff]  ;;  %v1882_v51 = vld [vmem:[%s3350_s0 + $0xd0] sm:$0xf] }
  0x53   :  { %1561 = vmatpush.bf16.msra.mxu1 %v2575_v62  ;;  %1513 = vmatmul.bf16.gmra.mxu2 %v1843_v3  ;;  %v2598_v62 = vld [vmem:[%s3349_s1 + $0x310] sm:$0xff]  ;;  %v2621_v3 = vld [vmem:[%s3349_s1 + $0x3c8] sm:$0xff]  ;;  %v1810_v49 = vld [vmem:[%s3350_s0 + $0x40] sm:$0xf] }
  0x54   :  { %1580 = vmatpush.bf16.msra.mxu2 %v2583_v54  ;;  %1532 = vmatmul.bf16.gmra.mxu3 %v1847_v4  ;;  %v1860_v54 = vld [vmem:[%s3350_s0 + $0x100] sm:$0xf0]  ;;  %v2481_v50 = vld [vmem:[%s3350_s0 + $0x84] sm:$0xf0] }
  0x55   :  { %1599 = vmatpush.bf16.msra.mxu3 %v2591_v63  ;;  %v1863_v61 = vor.u32 %v2487_v52, %v1860_v54  ;;  %v2622_v63 = vld [vmem:[%s3349_s1 + $0x3d0] sm:$0xff]  ;;  %v2612_v4 = vld [vmem:[%s3349_s1 + $0x380] sm:$0xff]  ;;  %v2499_v52 = vld [vmem:[%s3350_s0 + $0x114] sm:$0xf0] }
  0x56   :  { %1543 = vmatpush.bf16.msra.mxu0 %v2566_v5  ;;  %v2604_v5 = vld [vmem:[%s3349_s1 + $0x340] sm:$0xff]  ;;  %v1812_v54 = vld [vmem:[%s3350_s0 + $0x88] sm:$0xf0] }
  0x57   :  { %1562 = vmatpush.bf16.msra.mxu1 %v2574_v6  ;;  %v2635_v6 = vld [vmem:[%s3349_s1 + $0x438] sm:$0xff] }
  0x58   :  { %1581 = vmatpush.bf16.msra.mxu2 %v2582_v1  ;;  %v2605_v1 = vld [vmem:[%s3349_s1 + $0x348] sm:$0xff] }
  0x59   :  { %1600 = vmatpush.bf16.msra.mxu3 %v2590_v7  ;;  %v2643_v7 = vld [vmem:[%s3349_s1 + $0x478] sm:$0xff] }
  0x5a   :  { %1544 = vmatpush.bf16.msra.mxu0 %v2565_v9  ;;  %v2620_v9 = vld [vmem:[%s3349_s1 + $0x3c0] sm:$0xff] }
  0x5b   :  { %1563 = vmatpush.bf16.msra.mxu1 %v2573_v10  ;;  %v1794_v10 = vld [vmem:[%s3350_s0 + $0x30] sm:$0xf] }
  0x5c   :  { %1582 = vmatpush.bf16.msra.mxu2 %v2581_v8  ;;  %v2596_v8 = vld [vmem:[%s3349_s1 + $0x300] sm:$0xff] }
  0x5d   :  { %1601 = vmatpush.bf16.msra.mxu3 %v2589_v11  ;;  %v2634_v11 = vld [vmem:[%s3349_s1 + $0x430] sm:$0xff] }
  0x5e   :  { %1545 = vmatpush.bf16.msra.mxu0 %v2564_v14  ;;  %v2642_v14 = vld [vmem:[%s3349_s1 + $0x470] sm:$0xff] }
  0x5f   :  { %1564 = vmatpush.bf16.msra.mxu1 %v2572_v15  ;;  %v1796_v15 = vld [vmem:[%s3350_s0 + $0x78] sm:$0xf0] }
  0x60   :  { %1583 = vmatpush.bf16.msra.mxu2 %v2580_v12  ;;  %v2479_v12 = vld [vmem:[%s3350_s0 + $0x74] sm:$0xf0] }
  0x61   :  { %1602 = vmatpush.bf16.msra.mxu3 %v2588_v16  ;;  %1546 = vmatmul.bf16.vlgmr.msra.gmra.mxu0 %v1779_v29  ;;  %v1802_v16 = vld [vmem:[%s3350_s0 + $0x38] sm:$0xf] }
  0x62   :  { %1614 = vmatpush.bf16.msrb.mxu0 %v2603_v19  ;;  %1565 = vmatmul.bf16.vlgmr.msra.gmra.mxu1 %v1783_v31  ;;  %v1804_v19 = vld [vmem:[%s3350_s0 + $0x80] sm:$0xf0]  ;;  %v2639_v29 = vld [vmem:[%s3349_s1 + $0x458] sm:$0xff]  ;;  %v2497_v31 = vld [vmem:[%s3350_s0 + $0x104] sm:$0xf0] }
  0x63   :  { %1633 = vmatpush.bf16.msrb.mxu1 %v2611_v20  ;;  %1584 = vmatmul.bf16.vlgmr.msra.gmra.mxu2 %v1787_v32  ;;  %v1795_v20 = vor.u32 %v2479_v12, %v1794_v10  ;;  %v2488_v32 = vld [vmem:[%s3350_s0 + $0xc4] sm:$0xf] }
  0x64   :  { %1652 = vmatpush.bf16.msrb.mxu2 %v2619_v13  ;;  %1603 = vmatmul.bf16.vlgmr.msra.gmra.mxu3 %v1791_v33  ;;  %v2470_v13 = vld [vmem:[%s3350_s0 + $0x34] sm:$0xf]  ;;  %v1868_v33 = vld [vmem:[%s3350_s0 + $0x108] sm:$0xf0] }
  0x65   :  { %1671 = vmatpush.bf16.msrb.mxu3 %v2627_v22  ;;  %v1799_v21 = vor.u32 %v2470_v13, %v1796_v15  ;;  %v1803_v22 = vor.u32 %v2480_v17, %v1802_v16 }
  0x66   :  { %1615 = vmatpush.bf16.msrb.mxu0 %v2602_v34  ;;  %v1874_v34 = vld [vmem:[%s3350_s0 + $0xc8] sm:$0xf] }
  0x67   :  { %1634 = vmatpush.bf16.msrb.mxu1 %v2610_v30  ;;  %v1866_v30 = vld [vmem:[%s3350_s0 + $0xc0] sm:$0xf] }
  0x68   :  { %1653 = vmatpush.bf16.msrb.mxu2 %v2618_v23  ;;  %v1807_v23 = vor.u32 %v2471_v18, %v1804_v19 }
  0x69   :  { %1672 = vmatpush.bf16.msrb.mxu3 %v2626_v35  ;;  %v2498_v35 = vld [vmem:[%s3350_s0 + $0x10c] sm:$0xf0] }
  0x6a   :  { %1616 = vmatpush.bf16.msrb.mxu0 %v2601_v38  ;;  %v1876_v38 = vld [vmem:[%s3350_s0 + $0x110] sm:$0xf0] }
  0x6b   :  { %1635 = vmatpush.bf16.msrb.mxu1 %v2609_v37  ;;  %v2489_v37 = vld [vmem:[%s3350_s0 + $0xcc] sm:$0xf] }
  0x6c   :  { %1654 = vmatpush.bf16.msrb.mxu2 %v2617_v36  ;;  %v2630_v36 = vld [vmem:[%s3349_s1 + $0x410] sm:$0xff] }
  0x6d   :  { %1673 = vmatpush.bf16.msrb.mxu3 %v2625_v39  ;;  %v2638_v39 = vld [vmem:[%s3349_s1 + $0x450] sm:$0xff] }
  0x6e   :  { %1617 = vmatpush.bf16.msrb.mxu0 %v2600_v42  ;;  %v1875_v42 = vor.u32 %v2498_v35, %v1874_v34 }
  0x6f   :  { %1636 = vmatpush.bf16.msrb.mxu1 %v2608_v41  ;;  %v1871_v41 = vor.u32 %v2488_v32, %v1868_v33 }
  0x70   :  { %1655 = vmatpush.bf16.msrb.mxu2 %v2616_v40  ;;  %v1867_v40 = vor.u32 %v2497_v31, %v1866_v30 }
  0x71   :  { %1674 = vmatpush.bf16.msrb.mxu3 %v2624_v43  ;;  %1551 = vmatmul.bf16.gmra.mxu0 %v1851_v57  ;;  %v1879_v43 = vor.u32 %v2489_v37, %v1876_v38  ;;  %v1811_v57 = vor.u32 %v2481_v50, %v1810_v49 }
  0x72   :  { %1618 = vmatpush.bf16.msrb.mxu0 %v2599_v53  ;;  %1570 = vmatmul.bf16.gmra.mxu1 %v1855_v59  ;;  %v2472_v53 = vld [vmem:[%s3350_s0 + $0x44] sm:$0xf] }
  0x73   :  { %1637 = vmatpush.bf16.msrb.mxu1 %v2607_v47  ;;  %1589 = vmatmul.bf16.gmra.mxu2 %v1859_v60  ;;  %v2636_v47 = vld [vmem:[%s3349_s1 + $0x440] sm:$0xff]  ;;  %v1883_v60 = vor.u32 %v2499_v52, %v1882_v51 }
  0x74   :  { %1656 = vmatpush.bf16.msrb.mxu2 %v2615_v44  ;;  %1608 = vmatmul.bf16.gmra.mxu3 %v1863_v61  ;;  %v2629_v44 = vld [vmem:[%s3349_s1 + $0x408] sm:$0xff]  ;;  %v1815_v61 = vor.u32 %v2472_v53, %v1812_v54 }
  0x75   :  { %1675 = vmatpush.bf16.msrb.mxu3 %v2623_v55  ;;  %v2490_v55 = vld [vmem:[%s3350_s0 + $0xd4] sm:$0xf] }
  0x76   :  { %1619 = vmatpush.bf16.msrb.mxu0 %v2598_v62 }
  0x77   :  { %1638 = vmatpush.bf16.msrb.mxu1 %v2606_v58 }
  0x78   :  { %1657 = vmatpush.bf16.msrb.mxu2 %v2614_v56  ;;  %v1884_v56 = vld [vmem:[%s3350_s0 + $0x118] sm:$0xf0] }
  0x79   :  { %1676 = vmatpush.bf16.msrb.mxu3 %v2622_v63  ;;  %v1887_v63 = vor.u32 %v2490_v55, %v1884_v56 }
  0x7a   :  { %1620 = vmatpush.bf16.msrb.mxu0 %v2597_v2 }
  0x7b   :  { %1639 = vmatpush.bf16.msrb.mxu1 %v2605_v1 }
  0x7c   :  { %1658 = vmatpush.bf16.msrb.mxu2 %v2613_v0 }
  0x7d   :  { %1677 = vmatpush.bf16.msrb.mxu3 %v2621_v3 }
  0x7e   :  { %1621 = vmatpush.bf16.msrb.mxu0 %v2596_v8 }
  0x7f   :  { %1640 = vmatpush.bf16.msrb.mxu1 %v2604_v5 }
  0x80   :  { %1659 = vmatpush.bf16.msrb.mxu2 %v2612_v4 }
  0x81   :  { %1678 = vmatpush.bf16.msrb.mxu3 %v2620_v9  ;;  %1622 = vmatmul.bf16.vlgmr.msrb.gmra.mxu0 %v1795_v20 }
  0x82   :  { %1690 = vmatpush.bf16.msra.mxu0 %v2635_v6  ;;  %1641 = vmatmul.bf16.vlgmr.msrb.gmra.mxu1 %v1799_v21 }
  0x83   :  { %1709 = vmatpush.bf16.msra.mxu1 %v2643_v7  ;;  %1660 = vmatmul.bf16.vlgmr.msrb.gmra.mxu2 %v1803_v22 }
  0x84   :  { %2655 = vmatpush.bf16.msra.mxu2 %v2635_v6  ;;  %1679 = vmatmul.bf16.vlgmr.msrb.gmra.mxu3 %v1807_v23 }
  0x85   :  { %2663 = vmatpush.bf16.msra.mxu3 %v2643_v7 }
  0x86   :  { %1691 = vmatpush.bf16.msra.mxu0 %v2634_v11 }
  0x87   :  { %1710 = vmatpush.bf16.msra.mxu1 %v2642_v14 }
  0x88   :  { %2656 = vmatpush.bf16.msra.mxu2 %v2634_v11 }
  0x89   :  { %2664 = vmatpush.bf16.msra.mxu3 %v2642_v14 }
  0x8a   :  { %1692 = vmatpush.bf16.msra.mxu0 %v2633_v24 }
  0x8b   :  { %1711 = vmatpush.bf16.msra.mxu1 %v2641_v25 }
  0x8c   :  { %2657 = vmatpush.bf16.msra.mxu2 %v2633_v24 }
  0x8d   :  { %2665 = vmatpush.bf16.msra.mxu3 %v2641_v25 }
  0x8e   :  { %1693 = vmatpush.bf16.msra.mxu0 %v2632_v26 }
  0x8f   :  { %1712 = vmatpush.bf16.msra.mxu1 %v2640_v27 }
  0x90   :  { %2658 = vmatpush.bf16.msra.mxu2 %v2632_v26 }
  0x91   :  { %2666 = vmatpush.bf16.msra.mxu3 %v2640_v27  ;;  %1627 = vmatmul.bf16.gmra.mxu0 %v1867_v40 }
  0x92   :  { %1694 = vmatpush.bf16.msra.mxu0 %v2631_v28  ;;  %1646 = vmatmul.bf16.gmra.mxu1 %v1871_v41 }
  0x93   :  { %1713 = vmatpush.bf16.msra.mxu1 %v2639_v29  ;;  %1665 = vmatmul.bf16.gmra.mxu2 %v1875_v42 }
  0x94   :  { %2659 = vmatpush.bf16.msra.mxu2 %v2631_v28  ;;  %1684 = vmatmul.bf16.gmra.mxu3 %v1879_v43 }
  0x95   :  { %2667 = vmatpush.bf16.msra.mxu3 %v2639_v29 }
  0x96   :  { %1695 = vmatpush.bf16.msra.mxu0 %v2630_v36 }
  0x97   :  { %1714 = vmatpush.bf16.msra.mxu1 %v2638_v39 }
  0x98   :  { %2660 = vmatpush.bf16.msra.mxu2 %v2630_v36 }
  0x99   :  { %2668 = vmatpush.bf16.msra.mxu3 %v2638_v39 }
  0x9a   :  { %1696 = vmatpush.bf16.msra.mxu0 %v2629_v44 }
  0x9b   :  { %1715 = vmatpush.bf16.msra.mxu1 %v2637_v45 }
  0x9c   :  { %2661 = vmatpush.bf16.msra.mxu2 %v2629_v44 }
  0x9d   :  { %2669 = vmatpush.bf16.msra.mxu3 %v2637_v45 }
  0x9e   :  { %1697 = vmatpush.bf16.msra.mxu0 %v2628_v46  ;;  %v1395_v58 = vpop.f32.mrf.mxu0 }
  0x9f   :  { %1716 = vmatpush.bf16.msra.mxu1 %v2636_v47  ;;  %v1414_v59 = vpop.f32.mrf.mxu1  ;;  %v1396_v62 = vadd.f32 %v2671_v48, %v1395_v58 }
  0xa0   :  { %2662 = vmatpush.bf16.msra.mxu2 %v2628_v46 }
  0xa1   :  { %2670 = vmatpush.bf16.msra.mxu3 %v2636_v47  ;;  %v1415_v0 = vadd.f32 %v1414_v59, %v1396_v62  ;;  %1698 = vmatmul.bf16.vlgmr.msra.gmra.mxu0 %v1811_v57 }
  0xa2   :  { %1717 = vmatmul.bf16.vlgmr.msra.gmra.mxu1 %v1815_v61 }
  0xa3   :  { %1703 = vmatmul.bf16.vlgmr.msra.gmra.mxu2 %v1883_v60 }
  0xa4   :  { %1722 = vmatmul.bf16.vlgmr.msra.gmra.mxu3 %v1887_v63 }
  0xa6   :  { %v1433_v1 = vpop.f32.mrf.mxu2  ;;  %v1397_v4 = vpop.f32.mrf.mxu0 }
  0xa7   :  { %v1452_v2 = vpop.f32.mrf.mxu3  ;;  %v1434_v3 = vadd.f32 %v1433_v1, %v1415_v0  ;;  %v1416_v5 = vpop.f32.mrf.mxu1  ;;  %v1398_v6 = vadd.f32 %v2671_v48, %v1397_v4 }
  0xa9   :  { %v1453_v7 = vadd.f32 %v1452_v2, %v1434_v3  ;;  %v1417_v8 = vadd.f32 %v1416_v5, %v1398_v6 }
  0xae   :  { %v1435_v9 = vpop.f32.mrf.mxu2  ;;  %v1400_v12 = vpop.f32.mrf.mxu0 }
  0xaf   :  { %v1454_v10 = vpop.f32.mrf.mxu3  ;;  %v1436_v11 = vadd.f32 %v1435_v9, %v1417_v8  ;;  %v1419_v13 = vpop.f32.mrf.mxu1  ;;  %v1401_v14 = vadd.f32 %v2671_v48, %v1400_v12 }
  0xb1   :  { %v1455_v15 = vadd.f32 %v1454_v10, %v1436_v11  ;;  %v1420_v16 = vadd.f32 %v1419_v13, %v1401_v14 }
  0xb6   :  { %v1438_v17 = vpop.f32.mrf.mxu2  ;;  %v1402_v20 = vpop.f32.mrf.mxu0 }
  0xb7   :  { %v1457_v18 = vpop.f32.mrf.mxu3  ;;  %v1439_v19 = vadd.f32 %v1438_v17, %v1420_v16  ;;  %v1421_v21 = vpop.f32.mrf.mxu1  ;;  %v1403_v22 = vadd.f32 %v2671_v48, %v1402_v20 }
  0xb9   :  { %v1458_v23 = vadd.f32 %v1457_v18, %v1439_v19  ;;  %v1422_v24 = vadd.f32 %v1421_v21, %v1403_v22 }
  0xbe   :  { %v1440_v25 = vpop.f32.mrf.mxu2  ;;  %v1471_v28 = vpop.f32.mrf.mxu0 }
  0xbf   :  { %v1459_v26 = vpop.f32.mrf.mxu3  ;;  %v1441_v27 = vadd.f32 %v1440_v25, %v1422_v24  ;;  %v1472_v29 = vadd.f32 %v1471_v28, %v1453_v7  ;;  %v1490_v30 = vpop.f32.mrf.mxu1 }
  0xc1   :  { %v1460_v31 = vadd.f32 %v1459_v26, %v1441_v27  ;;  %v1491_v32 = vadd.f32 %v1490_v30, %v1472_v29 }
  0xc6   :  { %v1509_v33 = vpop.f32.mrf.mxu2  ;;  %v1473_v36 = vpop.f32.mrf.mxu0 }
  0xc7   :  { %v1510_v34 = vadd.f32 %v1509_v33, %v1491_v32  ;;  %v1528_v35 = vpop.f32.mrf.mxu3  ;;  %v1474_v37 = vadd.f32 %v1473_v36, %v1455_v15  ;;  %v1492_v38 = vpop.f32.mrf.mxu1 }
  0xc9   :  { %v1529_v39 = vadd.f32 %v1528_v35, %v1510_v34  ;;  %v1493_v40 = vadd.f32 %v1492_v38, %v1474_v37 }
  0xce   :  { %v1511_v41 = vpop.f32.mrf.mxu2  ;;  %v1476_v44 = vpop.f32.mrf.mxu0 }
  0xcf   :  { %v1512_v42 = vadd.f32 %v1511_v41, %v1493_v40  ;;  %v1530_v43 = vpop.f32.mrf.mxu3  ;;  %v1477_v45 = vadd.f32 %v1476_v44, %v1458_v23  ;;  %v1495_v46 = vpop.f32.mrf.mxu1 }
  0xd1   :  { %v1531_v47 = vadd.f32 %v1530_v43, %v1512_v42  ;;  %v1496_v48 = vadd.f32 %v1495_v46, %v1477_v45 }
  0xd6   :  { %v1514_v49 = vpop.f32.mrf.mxu2  ;;  %v1478_v52 = vpop.f32.mrf.mxu0 }
  0xd7   :  { %v1515_v50 = vadd.f32 %v1514_v49, %v1496_v48  ;;  %v1533_v51 = vpop.f32.mrf.mxu3  ;;  %v1497_v53 = vpop.f32.mrf.mxu1  ;;  %v1479_v15 = vadd.f32 %v1478_v52, %v1460_v31 }
  0xd9   :  { %v1534_v54 = vadd.f32 %v1533_v51, %v1515_v50  ;;  %v1498_v18 = vadd.f32 %v1497_v53, %v1479_v15 }
  0xde   :  { %v1516_v55 = vpop.f32.mrf.mxu2  ;;  %v1547_v57 = vpop.f32.mrf.mxu0 }
  0xdf   :  { %v1535_v56 = vpop.f32.mrf.mxu3  ;;  %v1566_v58 = vpop.f32.mrf.mxu1  ;;  %v1548_v16 = vadd.f32 %v1547_v57, %v1529_v39  ;;  %v1517_v24 = vadd.f32 %v1516_v55, %v1498_v18 }
  0xe1   :  { %v1567_v21 = vadd.f32 %v1566_v58, %v1548_v16  ;;  %v1536_v28 = vadd.f32 %v1535_v56, %v1517_v24 }
  0xe6   :  { %v1585_v59 = vpop.f32.mrf.mxu2  ;;  %v1549_v61 = vpop.f32.mrf.mxu0 }
  0xe7   :  { %v1604_v60 = vpop.f32.mrf.mxu3  ;;  %v1568_v62 = vpop.f32.mrf.mxu1  ;;  %v1550_v22 = vadd.f32 %v1549_v61, %v1531_v47  ;;  %v1586_v25 = vadd.f32 %v1585_v59, %v1567_v21 }
  0xe9   :  { %v1569_v27 = vadd.f32 %v1568_v62, %v1550_v22  ;;  %v1605_v29 = vadd.f32 %v1604_v60, %v1586_v25 }
  0xee   :  { %v1587_v63 = vpop.f32.mrf.mxu2  ;;  %v1552_v1 = vpop.f32.mrf.mxu0 }
  0xef   :  { %v1606_v0 = vpop.f32.mrf.mxu3  ;;  %v1571_v2 = vpop.f32.mrf.mxu1  ;;  %v1553_v26 = vadd.f32 %v1552_v1, %v1534_v54  ;;  %v1588_v30 = vadd.f32 %v1587_v63, %v1569_v27 }
  0xf1   :  { %v1572_v33 = vadd.f32 %v1571_v2, %v1553_v26  ;;  %v1607_v39 = vadd.f32 %v1606_v0, %v1588_v30 }
  0xf6   :  { %v1590_v3 = vpop.f32.mrf.mxu2  ;;  %v1554_v5 = vpop.f32.mrf.mxu0 }
  0xf7   :  { %v1609_v4 = vpop.f32.mrf.mxu3  ;;  %v1573_v6 = vpop.f32.mrf.mxu1  ;;  %v1555_v34 = vadd.f32 %v1554_v5, %v1536_v28  ;;  %v1591_v38 = vadd.f32 %v1590_v3, %v1572_v33 }
  0xf9   :  { %v1574_v40 = vadd.f32 %v1573_v6, %v1555_v34  ;;  %v1610_v43 = vadd.f32 %v1609_v4, %v1591_v38 }
  0xfe   :  { %v1592_v7 = vpop.f32.mrf.mxu2  ;;  %v1623_v9 = vpop.f32.mrf.mxu0 }
  0xff   :  { %v1611_v8 = vpop.f32.mrf.mxu3  ;;  %v1642_v10 = vpop.f32.mrf.mxu1  ;;  %v1624_v36 = vadd.f32 %v1623_v9, %v1605_v29  ;;  %v1593_v44 = vadd.f32 %v1592_v7, %v1574_v40 }
 0x101   :  { %v1643_v41 = vadd.f32 %v1642_v10, %v1624_v36  ;;  %v1612_v52 = vadd.f32 %v1611_v8, %v1593_v44 }
 0x106   :  { %v1661_v11 = vpop.f32.mrf.mxu2  ;;  %v1625_v13 = vpop.f32.mrf.mxu0 }
 0x107   :  { %v1680_v12 = vpop.f32.mrf.mxu3  ;;  %v1644_v14 = vpop.f32.mrf.mxu1  ;;  %v1626_v42 = vadd.f32 %v1625_v13, %v1607_v39  ;;  %v1662_v45 = vadd.f32 %v1661_v11, %v1643_v41 }
 0x109   :  { %v1645_v50 = vadd.f32 %v1644_v14, %v1626_v42  ;;  %v1681_v53 = vadd.f32 %v1680_v12, %v1662_v45 }
 0x10e   :  { %v1663_v17 = vpop.f32.mrf.mxu2  ;;  %v1628_v20 = vpop.f32.mrf.mxu0 }
 0x10f   :  { %v1682_v19 = vpop.f32.mrf.mxu3  ;;  %v1647_v23 = vpop.f32.mrf.mxu1  ;;  %v1629_v47 = vadd.f32 %v1628_v20, %v1610_v43  ;;  %v1664_v54 = vadd.f32 %v1663_v17, %v1645_v50 }
 0x111   :  { %v1648_v55 = vadd.f32 %v1647_v23, %v1629_v47  ;;  %v1683_v59 = vadd.f32 %v1682_v19, %v1664_v54 }
 0x116   :  { %v1666_v32 = vpop.f32.mrf.mxu2  ;;  %v1630_v31 = vpop.f32.mrf.mxu0 }
 0x117   :  { %v1685_v35 = vpop.f32.mrf.mxu3  ;;  %v1649_v37 = vpop.f32.mrf.mxu1  ;;  %v1631_v56 = vadd.f32 %v1630_v31, %v1612_v52  ;;  %v1667_v58 = vadd.f32 %v1666_v32, %v1648_v55 }
 0x119   :  { %v1650_v61 = vadd.f32 %v1649_v37, %v1631_v56  ;;  %v1686_v2 = vadd.f32 %v1685_v35, %v1667_v58 }
 0x11e   :  { %v1668_v46 = vpop.f32.mrf.mxu2  ;;  %v1699_v49 = vpop.f32.mrf.mxu0 }
 0x11f   :  { %v1687_v48 = vpop.f32.mrf.mxu3  ;;  %v1718_v51 = vpop.f32.mrf.mxu1  ;;  %v1700_v57 = vadd.f32 %v1699_v49, %v1681_v53  ;;  %v1669_v3 = vadd.f32 %v1668_v46, %v1650_v61 }
 0x121   :  { %v1719_v0 = vadd.f32 %v1718_v51, %v1700_v57  ;;  %v1688_v9 = vadd.f32 %v1687_v48, %v1669_v3 }
 0x123   :  { %v1728_v7 = vmax.f32 %v1719_v0, 0.0 }
 0x126   :  { %v1704_v60 = vpop.f32.mrf.mxu2  ;;  %v1701_v63 = vpop.f32.mrf.mxu0 }
 0x127   :  { %v1723_v62 = vpop.f32.mrf.mxu3  ;;  %v1702_v1 = vadd.f32 %v1701_v63, %v1683_v59  ;;  %v1720_v4 = vpop.f32.mrf.mxu1  ;;  %v1705_v6 = vadd.f32 %v1704_v60, %v1686_v2 }
 0x129   :  { %v1721_v5 = vadd.f32 %v1720_v4, %v1702_v1  ;;  %v1724_v12 = vadd.f32 %v1723_v62, %v1705_v6 }
 0x12b   :  { %v1729_v8 = vmax.f32 %v1721_v5, 0.0  ;;  %v1730_v16 = vmax.f32 %v1724_v12, 0.0 }
 0x12d   :  { %v2647_v10 = vpack.c.bf16 %v1729_v8, %v1728_v7 }
 0x12e   :  { %v1706_v11 = vpop.f32.mrf.mxu2 }
 0x12f   :  { %v1707_v13 = vadd.f32 %v1706_v11, %v1688_v9  ;;  %2648 = vst [vmem:[%s3352_s3] sm:$0xff] %v2647_v10   ;;  %v1725_v14 = vpop.f32.mrf.mxu3 }
 0x131   :  { %v1726_v15 = vadd.f32 %v1725_v14, %v1707_v13 }
 0x133   :  { %v1731_v17 = vmax.f32 %v1726_v15, 0.0 }
 0x135   :  { %v2652_v18 = vpack.c.bf16 %v1731_v17, %v1730_v16 }
 0x137   :  { %2654 = vst [vmem:[%s3352_s3 + $0x8] sm:$0xff] %v2652_v18  }

// kernel: autoencoder_forward.10
= control target key start
LH: loop header
LB: loop body
LE: loop exit
PB: predicated region body
PF: predicated region fallthrough
CT: control target
= control target key end

     0   :  { %s3124_s1 = inlined_call_operand.vmem [shape: bf16[1152,128], index: 1, kind: input, shape index: {}]   ;;  %s3125_s2 = inlined_call_operand.vmem [shape: f32[1,128], index: 2, kind: input, shape index: {}]   ;;  %s3126_s0 = inlined_call_operand.vmem [shape: bf16[128,1152], index: 0, kind: input, shape index: {}]   ;;  %s3127_s3 = inlined_call_operand.vmem [shape: bf16[128,128], index: 3, kind: output, shape index: {}]  }
   0x1   :  { %v2190_v0 = vld [vmem:[%s3124_s1 + $0x38] sm:$0xff]  ;;  %v2189_v1 = vld [vmem:[%s3124_s1 + $0x30] sm:$0xff]  ;;  %v2188_v2 = vld [vmem:[%s3124_s1 + $0x28] sm:$0xff] }
   0x2   :  { %2302 = vmatpush.bf16.msra.mxu1 %v2190_v0  ;;  %2303 = vmatpush.bf16.msra.mxu2 %v2190_v0  ;;  %v2187_v3 = vld [vmem:[%s3124_s1 + $0x20] sm:$0xff]  ;;  %v2186_v4 = vld [vmem:[%s3124_s1 + $0x18] sm:$0xff]  ;;  %v2185_v5 = vld [vmem:[%s3124_s1 + $0x10] sm:$0xff] }
   0x3   :  { %2304 = vmatpush.bf16.msra.mxu3 %v2190_v0  ;;  %1042 = vmatpush.bf16.msra.mxu0 %v2190_v0  ;;  %v2184_v6 = vld [vmem:[%s3124_s1 + $0x8] sm:$0xff]  ;;  %v2183_v7 = vld [vmem:[%s3124_s1] sm:$0xff]  ;;  %v1609_v8 = vld [vmem:[%s3126_s0 + $0x90] sm:$0xf] }
   0x4   :  { %v2133_v9 = vld [vmem:[%s3126_s0 + $0xb0] sm:$0xf0]  ;;  %v1681_v10 = vld [vmem:[%s3126_s0 + $0x120] sm:$0xf]  ;;  %v2151_v11 = vld [vmem:[%s3126_s0 + $0x140] sm:$0xf0] }
   0x5   :  { %v1753_v12 = vld [vmem:[%s3126_s0 + $0x1b0] sm:$0xf]  ;;  %v2169_v13 = vld [vmem:[%s3126_s0 + $0x1d0] sm:$0xf0]  ;;  %v1537_v14 = vld [vmem:[%s3126_s0] sm:$0xf]  ;;  %v1610_v18 = vor.u32 %v2133_v9, %v1609_v8  ;;  %v1682_v19 = vor.u32 %v2151_v11, %v1681_v10 }
   0x6   :  { %2305 = vmatpush.bf16.msra.mxu1 %v2189_v1  ;;  %2306 = vmatpush.bf16.msra.mxu2 %v2189_v1  ;;  %v2115_v15 = vld [vmem:[%s3126_s0 + $0x20] sm:$0xf0]  ;;  %v2206_v16 = vld [vmem:[%s3124_s1 + $0xb8] sm:$0xff]  ;;  %v1754_v20 = vor.u32 %v2169_v13, %v1753_v12  ;;  %v2205_v24 = vld [vmem:[%s3124_s1 + $0xb0] sm:$0xff] }
   0x7   :  { %2307 = vmatpush.bf16.msra.mxu3 %v2189_v1  ;;  %1043 = vmatpush.bf16.msra.mxu0 %v2189_v1  ;;  %v2198_v17 = vld [vmem:[%s3124_s1 + $0x78] sm:$0xff]  ;;  %v1538_v21 = vor.u32 %v2115_v15, %v1537_v14  ;;  %v2197_v25 = vld [vmem:[%s3124_s1 + $0x70] sm:$0xff]  ;;  %v2204_v28 = vld [vmem:[%s3124_s1 + $0xa8] sm:$0xff] }
   0x8   :  { %v2214_v22 = vld [vmem:[%s3124_s1 + $0xf8] sm:$0xff]  ;;  %v2213_v26 = vld [vmem:[%s3124_s1 + $0xf0] sm:$0xff]  ;;  %v2196_v29 = vld [vmem:[%s3124_s1 + $0x68] sm:$0xff] }
   0x9   :  { %v2222_v23 = vld [vmem:[%s3124_s1 + $0x138] sm:$0xff]  ;;  %v2221_v27 = vld [vmem:[%s3124_s1 + $0x130] sm:$0xff]  ;;  %v2212_v30 = vld [vmem:[%s3124_s1 + $0xe8] sm:$0xff] }
   0xa   :  { %2308 = vmatpush.bf16.msra.mxu1 %v2188_v2  ;;  %2309 = vmatpush.bf16.msra.mxu2 %v2188_v2  ;;  %v2220_v31 = vld [vmem:[%s3124_s1 + $0x128] sm:$0xff]  ;;  %v2203_v32 = vld [vmem:[%s3124_s1 + $0xa0] sm:$0xff]  ;;  %v1645_v36 = vld [vmem:[%s3126_s0 + $0xd8] sm:$0xf] }
   0xb   :  { %2310 = vmatpush.bf16.msra.mxu3 %v2188_v2  ;;  %1044 = vmatpush.bf16.msra.mxu0 %v2188_v2  ;;  %v2195_v33 = vld [vmem:[%s3124_s1 + $0x60] sm:$0xff]  ;;  %v2142_v37 = vld [vmem:[%s3126_s0 + $0xf8] sm:$0xf0]  ;;  %v1717_v38 = vld [vmem:[%s3126_s0 + $0x168] sm:$0xf] }
   0xc   :  { %v2211_v34 = vld [vmem:[%s3124_s1 + $0xe0] sm:$0xff]  ;;  %v2160_v39 = vld [vmem:[%s3126_s0 + $0x188] sm:$0xf0]  ;;  %v1789_v40 = vld [vmem:[%s3126_s0 + $0x1f8] sm:$0xf]  ;;  %v1646_v46 = vor.u32 %v2142_v37, %v1645_v36 }
   0xd   :  { %v2219_v35 = vld [vmem:[%s3124_s1 + $0x120] sm:$0xff]  ;;  %v2178_v41 = vld [vmem:[%s3126_s0 + $0x218] sm:$0xf0]  ;;  %v1573_v42 = vld [vmem:[%s3126_s0 + $0x48] sm:$0xf]  ;;  %v1718_v47 = vor.u32 %v2160_v39, %v1717_v38 }
   0xe   :  { %2311 = vmatpush.bf16.msra.mxu1 %v2187_v3  ;;  %2312 = vmatpush.bf16.msra.mxu2 %v2187_v3  ;;  %v2124_v43 = vld [vmem:[%s3126_s0 + $0x68] sm:$0xf0]  ;;  %v2202_v44 = vld [vmem:[%s3124_s1 + $0x98] sm:$0xff]  ;;  %v1790_v48 = vor.u32 %v2178_v41, %v1789_v40  ;;  %v2201_v52 = vld [vmem:[%s3124_s1 + $0x90] sm:$0xff] }
   0xf   :  { %2313 = vmatpush.bf16.msra.mxu3 %v2187_v3  ;;  %1045 = vmatpush.bf16.msra.mxu0 %v2187_v3  ;;  %v2194_v45 = vld [vmem:[%s3124_s1 + $0x58] sm:$0xff]  ;;  %v1574_v49 = vor.u32 %v2124_v43, %v1573_v42  ;;  %v2193_v53 = vld [vmem:[%s3124_s1 + $0x50] sm:$0xff]  ;;  %v2200_v56 = vld [vmem:[%s3124_s1 + $0x88] sm:$0xff] }
  0x10   :  { %v2210_v50 = vld [vmem:[%s3124_s1 + $0xd8] sm:$0xff]  ;;  %v2209_v54 = vld [vmem:[%s3124_s1 + $0xd0] sm:$0xff]  ;;  %v2192_v57 = vld [vmem:[%s3124_s1 + $0x48] sm:$0xff] }
  0x11   :  { %v2218_v51 = vld [vmem:[%s3124_s1 + $0x118] sm:$0xff]  ;;  %v2217_v55 = vld [vmem:[%s3124_s1 + $0x110] sm:$0xff]  ;;  %v2208_v58 = vld [vmem:[%s3124_s1 + $0xc8] sm:$0xff] }
  0x12   :  { %2314 = vmatpush.bf16.msra.mxu1 %v2186_v4  ;;  %2315 = vmatpush.bf16.msra.mxu2 %v2186_v4  ;;  %v2216_v59 = vld [vmem:[%s3124_s1 + $0x108] sm:$0xff]  ;;  %v2199_v60 = vld [vmem:[%s3124_s1 + $0x80] sm:$0xff]  ;;  %v2238_v2 = vld [vmem:[%s3124_s1 + $0x1b8] sm:$0xff] }
  0x13   :  { %2316 = vmatpush.bf16.msra.mxu3 %v2186_v4  ;;  %1046 = vmatpush.bf16.msra.mxu0 %v2186_v4  ;;  %v2191_v61 = vld [vmem:[%s3124_s1 + $0x40] sm:$0xff]  ;;  %v1539_v1 = vld [vmem:[%s3126_s0 + $0x24] sm:$0xf0]  ;;  %v2230_v3 = vld [vmem:[%s3124_s1 + $0x178] sm:$0xff] }
  0x14   :  { %v2111_v62 = vld [vmem:[%s3126_s0 + $0x4] sm:$0xf]  ;;  %v1545_v4 = vld [vmem:[%s3126_s0 + $0x8] sm:$0xf]  ;;  %v1553_v8 = vld [vmem:[%s3126_s0 + $0x10] sm:$0xf] }
  0x15   :  { %v2207_v63 = vld [vmem:[%s3124_s1 + $0xc0] sm:$0xff]  ;;  %v2117_v9 = vld [vmem:[%s3126_s0 + $0x30] sm:$0xf0]  ;;  %v2246_v10 = vld [vmem:[%s3124_s1 + $0x1f8] sm:$0xff]  ;;  %v1542_v12 = vor.u32 %v2111_v62, %v1539_v1 }
  0x16   :  { %2317 = vmatpush.bf16.msra.mxu1 %v2185_v5  ;;  %2318 = vmatpush.bf16.msra.mxu2 %v2185_v5  ;;  %v2215_v0 = vld [vmem:[%s3124_s1 + $0x100] sm:$0xff]  ;;  %v2254_v11 = vld [vmem:[%s3124_s1 + $0x238] sm:$0xff]  ;;  %v1554_v15 = vor.u32 %v2117_v9, %v1553_v8  ;;  %v2129_v40 = vld [vmem:[%s3126_s0 + $0x94] sm:$0xf] }
  0x17   :  { %2319 = vmatpush.bf16.msra.mxu3 %v2185_v5  ;;  %1047 = vmatpush.bf16.msra.mxu0 %v2185_v5  ;;  %v2116_v5 = vld [vmem:[%s3126_s0 + $0x28] sm:$0xf0]  ;;  %v2235_v36 = vld [vmem:[%s3124_s1 + $0x1a0] sm:$0xff]  ;;  %v1611_v41 = vld [vmem:[%s3126_s0 + $0xb4] sm:$0xf0] }
  0x18   :  { %v1546_v13 = vor.u32 %v2116_v5, %v1545_v4  ;;  %v2243_v37 = vld [vmem:[%s3124_s1 + $0x1e0] sm:$0xff]  ;;  %v1617_v42 = vld [vmem:[%s3126_s0 + $0x98] sm:$0xf]  ;;  %v2134_v43 = vld [vmem:[%s3126_s0 + $0xb8] sm:$0xf0] }
  0x19   :  { %v2227_v38 = vld [vmem:[%s3124_s1 + $0x160] sm:$0xff]  ;;  %v1661_v62 = vld [vmem:[%s3126_s0 + $0xe8] sm:$0xf]  ;;  %v2233_v4 = vld [vmem:[%s3124_s1 + $0x190] sm:$0xff] }
  0x1a   :  { %2320 = vmatpush.bf16.msra.mxu1 %v2184_v6  ;;  %2321 = vmatpush.bf16.msra.mxu2 %v2184_v6  ;;  %v2251_v39 = vld [vmem:[%s3124_s1 + $0x220] sm:$0xff]  ;;  %v2241_v5 = vld [vmem:[%s3124_s1 + $0x1d0] sm:$0xff]  ;;  %v1683_v9 = vld [vmem:[%s3126_s0 + $0x144] sm:$0xf0] }
  0x1b   :  { %2322 = vmatpush.bf16.msra.mxu3 %v2184_v6  ;;  %1048 = vmatpush.bf16.msra.mxu0 %v2184_v6  ;;  %v2112_v6 = vld [vmem:[%s3126_s0 + $0xc] sm:$0xf]  ;;  %v2147_v8 = vld [vmem:[%s3126_s0 + $0x124] sm:$0xf] }
  0x1e   :  { %2323 = vmatpush.bf16.msra.mxu1 %v2183_v7  ;;  %2324 = vmatpush.bf16.msra.mxu2 %v2183_v7 }
  0x1f   :  { %2325 = vmatpush.bf16.msra.mxu3 %v2183_v7  ;;  %1049 = vmatpush.bf16.msra.mxu0 %v2183_v7  ;;  %v1547_v7 = vld [vmem:[%s3126_s0 + $0x2c] sm:$0xf0] }
  0x20   :  { %v1550_v14 = vor.u32 %v2112_v6, %v1547_v7  ;;  %v2225_v6 = vld [vmem:[%s3124_s1 + $0x150] sm:$0xff] }
  0x21   :  { %1060 = vmatmul.bf16.vlgmr.msra.gmra.mxu1 %v1610_v18  ;;  %1070 = vmatmul.bf16.vlgmr.msra.gmra.mxu2 %v1682_v19  ;;  %v2245_v18 = vld [vmem:[%s3124_s1 + $0x1f0] sm:$0xff] }
  0x22   :  { %1140 = vmatpush.bf16.msrb.mxu2 %v2206_v16  ;;  %1091 = vmatpush.bf16.msrb.mxu1 %v2198_v17  ;;  %v2237_v16 = vld [vmem:[%s3124_s1 + $0x1b0] sm:$0xff] }
  0x23   :  { %1080 = vmatmul.bf16.vlgmr.msra.gmra.mxu3 %v1754_v20  ;;  %1050 = vmatmul.bf16.vlgmr.msra.gmra.mxu0 %v1538_v21  ;;  %v2229_v17 = vld [vmem:[%s3124_s1 + $0x170] sm:$0xff]  ;;  %v2236_v20 = vld [vmem:[%s3124_s1 + $0x1a8] sm:$0xff] }
  0x24   :  { %1189 = vmatpush.bf16.msrb.mxu3 %v2214_v22  ;;  %1238 = vmatpush.bf16.msrb.mxu0 %v2222_v23  ;;  %v2253_v19 = vld [vmem:[%s3124_s1 + $0x230] sm:$0xff]  ;;  %v2228_v21 = vld [vmem:[%s3124_s1 + $0x168] sm:$0xff] }
  0x25   :  { %v2244_v22 = vld [vmem:[%s3124_s1 + $0x1e8] sm:$0xff]  ;;  %v2249_v7 = vld [vmem:[%s3124_s1 + $0x210] sm:$0xff] }
  0x26   :  { %1141 = vmatpush.bf16.msrb.mxu2 %v2205_v24  ;;  %1092 = vmatpush.bf16.msrb.mxu1 %v2197_v25  ;;  %v2252_v23 = vld [vmem:[%s3124_s1 + $0x228] sm:$0xff]  ;;  %v1575_v25 = vld [vmem:[%s3126_s0 + $0x6c] sm:$0xf0] }
  0x27   :  { %v2120_v24 = vld [vmem:[%s3126_s0 + $0x4c] sm:$0xf] }
  0x28   :  { %1190 = vmatpush.bf16.msrb.mxu3 %v2213_v26  ;;  %1239 = vmatpush.bf16.msrb.mxu0 %v2221_v27  ;;  %v1581_v26 = vld [vmem:[%s3126_s0 + $0x50] sm:$0xf]  ;;  %v2125_v27 = vld [vmem:[%s3126_s0 + $0x70] sm:$0xf0] }
  0x2a   :  { %1142 = vmatpush.bf16.msrb.mxu2 %v2204_v28  ;;  %1093 = vmatpush.bf16.msrb.mxu1 %v2196_v29  ;;  %v2121_v28 = vld [vmem:[%s3126_s0 + $0x54] sm:$0xf]  ;;  %v1583_v29 = vld [vmem:[%s3126_s0 + $0x74] sm:$0xf0] }
  0x2c   :  { %1191 = vmatpush.bf16.msrb.mxu3 %v2212_v30  ;;  %1240 = vmatpush.bf16.msrb.mxu0 %v2220_v31  ;;  %v1589_v30 = vld [vmem:[%s3126_s0 + $0x58] sm:$0xf]  ;;  %v2126_v31 = vld [vmem:[%s3126_s0 + $0x78] sm:$0xf0] }
  0x2e   :  { %1143 = vmatpush.bf16.msrb.mxu2 %v2203_v32  ;;  %1094 = vmatpush.bf16.msrb.mxu1 %v2195_v33  ;;  %v1578_v32 = vor.u32 %v2120_v24, %v1575_v25  ;;  %v1582_v33 = vor.u32 %v2125_v27, %v1581_v26  ;;  %v2156_v24 = vld [vmem:[%s3126_s0 + $0x16c] sm:$0xf]  ;;  %v1719_v25 = vld [vmem:[%s3126_s0 + $0x18c] sm:$0xf0]  ;;  %v2161_v27 = vld [vmem:[%s3126_s0 + $0x190] sm:$0xf0] }
  0x2f   :  { %v1725_v26 = vld [vmem:[%s3126_s0 + $0x170] sm:$0xf] }
  0x30   :  { %1192 = vmatpush.bf16.msrb.mxu3 %v2211_v34  ;;  %1241 = vmatpush.bf16.msrb.mxu0 %v2219_v35  ;;  %v1586_v34 = vor.u32 %v2121_v28, %v1583_v29  ;;  %v1590_v35 = vor.u32 %v2126_v31, %v1589_v30  ;;  %v2157_v28 = vld [vmem:[%s3126_s0 + $0x174] sm:$0xf]  ;;  %v1727_v29 = vld [vmem:[%s3126_s0 + $0x194] sm:$0xf0]  ;;  %v2162_v31 = vld [vmem:[%s3126_s0 + $0x198] sm:$0xf0] }
  0x31   :  { %1065 = vmatmul.bf16.gmra.mxu1 %v1646_v46  ;;  %1075 = vmatmul.bf16.gmra.mxu2 %v1718_v47  ;;  %v1625_v46 = vld [vmem:[%s3126_s0 + $0xa0] sm:$0xf]  ;;  %v2135_v47 = vld [vmem:[%s3126_s0 + $0xc0] sm:$0xf0]  ;;  %v1733_v30 = vld [vmem:[%s3126_s0 + $0x178] sm:$0xf] }
  0x32   :  { %1144 = vmatpush.bf16.msrb.mxu2 %v2202_v44  ;;  %1095 = vmatpush.bf16.msrb.mxu1 %v2194_v45  ;;  %v2130_v44 = vld [vmem:[%s3126_s0 + $0x9c] sm:$0xf]  ;;  %v1619_v45 = vld [vmem:[%s3126_s0 + $0xbc] sm:$0xf0] }
  0x33   :  { %1085 = vmatmul.bf16.gmra.mxu3 %v1790_v48  ;;  %1055 = vmatmul.bf16.gmra.mxu0 %v1574_v49  ;;  %v1614_v48 = vor.u32 %v2129_v40, %v1611_v41  ;;  %v1618_v49 = vor.u32 %v2134_v43, %v1617_v42  ;;  %v2165_v40 = vld [vmem:[%s3126_s0 + $0x1b4] sm:$0xf]  ;;  %v1755_v41 = vld [vmem:[%s3126_s0 + $0x1d4] sm:$0xf0]  ;;  %v2170_v43 = vld [vmem:[%s3126_s0 + $0x1d8] sm:$0xf0] }
  0x34   :  { %1193 = vmatpush.bf16.msrb.mxu3 %v2210_v50  ;;  %1242 = vmatpush.bf16.msrb.mxu0 %v2218_v51  ;;  %v1622_v50 = vor.u32 %v2130_v44, %v1619_v45  ;;  %v1626_v51 = vor.u32 %v2135_v47, %v1625_v46  ;;  %v1761_v42 = vld [vmem:[%s3126_s0 + $0x1b8] sm:$0xf]  ;;  %v2166_v44 = vld [vmem:[%s3126_s0 + $0x1bc] sm:$0xf]  ;;  %v1763_v45 = vld [vmem:[%s3126_s0 + $0x1dc] sm:$0xf0] }
  0x35   :  { %v1769_v46 = vld [vmem:[%s3126_s0 + $0x1c0] sm:$0xf]  ;;  %v2171_v47 = vld [vmem:[%s3126_s0 + $0x1e0] sm:$0xf0] }
  0x36   :  { %1145 = vmatpush.bf16.msrb.mxu2 %v2201_v52  ;;  %1096 = vmatpush.bf16.msrb.mxu1 %v2193_v53  ;;  %v2234_v52 = vld [vmem:[%s3124_s1 + $0x198] sm:$0xff] }
  0x37   :  { %v2242_v53 = vld [vmem:[%s3124_s1 + $0x1d8] sm:$0xff] }
  0x38   :  { %1194 = vmatpush.bf16.msrb.mxu3 %v2209_v54  ;;  %1243 = vmatpush.bf16.msrb.mxu0 %v2217_v55  ;;  %v2226_v54 = vld [vmem:[%s3124_s1 + $0x158] sm:$0xff] }
  0x39   :  { %v2250_v55 = vld [vmem:[%s3124_s1 + $0x218] sm:$0xff] }
  0x3a   :  { %1146 = vmatpush.bf16.msrb.mxu2 %v2200_v56  ;;  %1097 = vmatpush.bf16.msrb.mxu1 %v2192_v57  ;;  %v2138_v56 = vld [vmem:[%s3126_s0 + $0xdc] sm:$0xf]  ;;  %v1647_v57 = vld [vmem:[%s3126_s0 + $0xfc] sm:$0xf0] }
  0x3c   :  { %1195 = vmatpush.bf16.msrb.mxu3 %v2208_v58  ;;  %1244 = vmatpush.bf16.msrb.mxu0 %v2216_v59  ;;  %v1653_v58 = vld [vmem:[%s3126_s0 + $0xe0] sm:$0xf]  ;;  %v2143_v59 = vld [vmem:[%s3126_s0 + $0x100] sm:$0xf0] }
  0x3d   :  { %v1654_v1 = vor.u32 %v2143_v59, %v1653_v58 }
  0x3e   :  { %1147 = vmatpush.bf16.msrb.mxu2 %v2199_v60  ;;  %1098 = vmatpush.bf16.msrb.mxu1 %v2191_v61  ;;  %v2139_v60 = vld [vmem:[%s3126_s0 + $0xe4] sm:$0xf]  ;;  %v1655_v61 = vld [vmem:[%s3126_s0 + $0x104] sm:$0xf0] }
  0x40   :  { %1196 = vmatpush.bf16.msrb.mxu3 %v2207_v63  ;;  %1245 = vmatpush.bf16.msrb.mxu0 %v2215_v0  ;;  %v2144_v63 = vld [vmem:[%s3126_s0 + $0x108] sm:$0xf0]  ;;  %v1650_v0 = vor.u32 %v2138_v56, %v1647_v57 }
  0x41   :  { %1099 = vmatmul.bf16.vlgmr.msrb.gmra.mxu1 %v1542_v12  ;;  %1148 = vmatmul.bf16.vlgmr.msrb.gmra.mxu2 %v1546_v13  ;;  %v2148_v12 = vld [vmem:[%s3126_s0 + $0x12c] sm:$0xf]  ;;  %v1691_v13 = vld [vmem:[%s3126_s0 + $0x14c] sm:$0xf0] }
  0x42   :  { %1336 = vmatpush.bf16.msra.mxu2 %v2238_v2  ;;  %1287 = vmatpush.bf16.msra.mxu1 %v2230_v3  ;;  %v1658_v2 = vor.u32 %v2139_v60, %v1655_v61  ;;  %v1662_v3 = vor.u32 %v2144_v63, %v1661_v62  ;;  %v2174_v61 = vld [vmem:[%s3126_s0 + $0x1fc] sm:$0xf]  ;;  %v1791_v62 = vld [vmem:[%s3126_s0 + $0x21c] sm:$0xf0] }
  0x43   :  { %1197 = vmatmul.bf16.vlgmr.msrb.gmra.mxu3 %v1550_v14  ;;  %1246 = vmatmul.bf16.vlgmr.msrb.gmra.mxu0 %v1554_v15  ;;  %v1697_v14 = vld [vmem:[%s3126_s0 + $0x130] sm:$0xf]  ;;  %v2153_v15 = vld [vmem:[%s3126_s0 + $0x150] sm:$0xf0]  ;;  %v1797_v63 = vld [vmem:[%s3126_s0 + $0x200] sm:$0xf] }
  0x44   :  { %1385 = vmatpush.bf16.msra.mxu3 %v2246_v10  ;;  %1434 = vmatpush.bf16.msra.mxu0 %v2254_v11  ;;  %v1689_v10 = vld [vmem:[%s3126_s0 + $0x128] sm:$0xf]  ;;  %v2152_v11 = vld [vmem:[%s3126_s0 + $0x148] sm:$0xf0] }
  0x46   :  { %1337 = vmatpush.bf16.msra.mxu2 %v2237_v16  ;;  %1288 = vmatpush.bf16.msra.mxu1 %v2229_v17  ;;  %v1686_v16 = vor.u32 %v2147_v8, %v1683_v9  ;;  %v1690_v17 = vor.u32 %v2152_v11, %v1689_v10  ;;  %v1794_v8 = vor.u32 %v2174_v61, %v1791_v62  ;;  %v1605_v61 = vld [vmem:[%s3126_s0 + $0x68] sm:$0xf]  ;;  %v2128_v62 = vld [vmem:[%s3126_s0 + $0x88] sm:$0xf0] }
  0x48   :  { %1386 = vmatpush.bf16.msra.mxu3 %v2245_v18  ;;  %1435 = vmatpush.bf16.msra.mxu0 %v2253_v19  ;;  %v1694_v18 = vor.u32 %v2148_v12, %v1691_v13  ;;  %v1698_v19 = vor.u32 %v2153_v15, %v1697_v14 }
  0x4a   :  { %1338 = vmatpush.bf16.msra.mxu2 %v2236_v20  ;;  %1289 = vmatpush.bf16.msra.mxu1 %v2228_v21  ;;  %v2232_v20 = vld [vmem:[%s3124_s1 + $0x188] sm:$0xff] }
  0x4b   :  { %v2240_v21 = vld [vmem:[%s3124_s1 + $0x1c8] sm:$0xff] }
  0x4c   :  { %1387 = vmatpush.bf16.msra.mxu3 %v2244_v22  ;;  %1436 = vmatpush.bf16.msra.mxu0 %v2252_v23  ;;  %v2224_v22 = vld [vmem:[%s3124_s1 + $0x148] sm:$0xff] }
  0x4d   :  { %v2248_v23 = vld [vmem:[%s3124_s1 + $0x208] sm:$0xff] }
  0x4e   :  { %1339 = vmatpush.bf16.msra.mxu2 %v2235_v36  ;;  %1290 = vmatpush.bf16.msra.mxu1 %v2227_v38  ;;  %v2231_v36 = vld [vmem:[%s3124_s1 + $0x180] sm:$0xff] }
  0x4f   :  { %v2223_v38 = vld [vmem:[%s3124_s1 + $0x140] sm:$0xff] }
  0x50   :  { %1388 = vmatpush.bf16.msra.mxu3 %v2243_v37  ;;  %1437 = vmatpush.bf16.msra.mxu0 %v2251_v39  ;;  %v2239_v37 = vld [vmem:[%s3124_s1 + $0x1c0] sm:$0xff] }
  0x51   :  { %1104 = vmatmul.bf16.gmra.mxu1 %v1578_v32  ;;  %1153 = vmatmul.bf16.gmra.mxu2 %v1582_v33  ;;  %v1722_v32 = vor.u32 %v2156_v24, %v1719_v25  ;;  %v1726_v33 = vor.u32 %v2161_v27, %v1725_v26  ;;  %v2247_v39 = vld [vmem:[%s3124_s1 + $0x200] sm:$0xff]  ;;  %v2118_v24 = vld [vmem:[%s3126_s0 + $0x38] sm:$0xf0] }
  0x52   :  { %1340 = vmatpush.bf16.msra.mxu2 %v2234_v52  ;;  %1291 = vmatpush.bf16.msra.mxu1 %v2226_v54  ;;  %v1770_v52 = vor.u32 %v2171_v47, %v1769_v46  ;;  %v2784_v54 = vld [vmem:[%s3125_s2] ss:$0 sm:$0xff]  ;;  %v2114_v25 = vld [vmem:[%s3126_s0 + $0x1c] sm:$0xf] }
  0x53   :  { %1202 = vmatmul.bf16.gmra.mxu3 %v1586_v34  ;;  %1251 = vmatmul.bf16.gmra.mxu0 %v1590_v35  ;;  %v1730_v34 = vor.u32 %v2157_v28, %v1727_v29  ;;  %v1734_v35 = vor.u32 %v2162_v31, %v1733_v30  ;;  %v1563_v26 = vld [vmem:[%s3126_s0 + $0x3c] sm:$0xf0]  ;;  %v2119_v28 = vld [vmem:[%s3126_s0 + $0x40] sm:$0xf0] }
  0x54   :  { %1389 = vmatpush.bf16.msra.mxu3 %v2242_v53  ;;  %1438 = vmatpush.bf16.msra.mxu0 %v2250_v55  ;;  %v1569_v27 = vld [vmem:[%s3126_s0 + $0x20] sm:$0xf] }
  0x56   :  { %1341 = vmatpush.bf16.msra.mxu2 %v2233_v4  ;;  %1292 = vmatpush.bf16.msra.mxu1 %v2225_v6  ;;  %v2180_v4 = vld [vmem:[%s3126_s0 + $0x228] sm:$0xf0] }
  0x58   :  { %1390 = vmatpush.bf16.msra.mxu3 %v2241_v5  ;;  %1439 = vmatpush.bf16.msra.mxu0 %v2249_v7 }
  0x5a   :  { %1342 = vmatpush.bf16.msra.mxu2 %v2232_v20  ;;  %1293 = vmatpush.bf16.msra.mxu1 %v2224_v22  ;;  %v1555_v22 = vld [vmem:[%s3126_s0 + $0x34] sm:$0xf0] }
  0x5c   :  { %1391 = vmatpush.bf16.msra.mxu3 %v2240_v21  ;;  %1440 = vmatpush.bf16.msra.mxu0 %v2248_v23  ;;  %v2113_v21 = vld [vmem:[%s3126_s0 + $0x14] sm:$0xf]  ;;  %v1561_v23 = vld [vmem:[%s3126_s0 + $0x18] sm:$0xf] }
  0x5e   :  { %1343 = vmatpush.bf16.msra.mxu2 %v2231_v36  ;;  %1294 = vmatpush.bf16.msra.mxu1 %v2223_v38  ;;  %v1570_v38 = vor.u32 %v2119_v28, %v1569_v27  ;;  %v2131_v27 = vld [vmem:[%s3126_s0 + $0xa4] sm:$0xf]  ;;  %v1627_v28 = vld [vmem:[%s3126_s0 + $0xc4] sm:$0xf0] }
  0x60   :  { %1392 = vmatpush.bf16.msra.mxu3 %v2239_v37  ;;  %1441 = vmatpush.bf16.msra.mxu0 %v2247_v39  ;;  %v1566_v37 = vor.u32 %v2114_v25, %v1563_v26 }
  0x61   :  { %1109 = vmatmul.bf16.gmra.mxu1 %v1614_v48  ;;  %1158 = vmatmul.bf16.gmra.mxu2 %v1618_v49  ;;  %v1758_v48 = vor.u32 %v2165_v40, %v1755_v41  ;;  %v1762_v49 = vor.u32 %v2170_v43, %v1761_v42 }
  0x63   :  { %1207 = vmatmul.bf16.gmra.mxu3 %v1622_v50  ;;  %1256 = vmatmul.bf16.gmra.mxu0 %v1626_v51  ;;  %v1766_v51 = vor.u32 %v2166_v44, %v1763_v45 }
  0x71   :  { %1114 = vmatmul.bf16.gmra.mxu1 %v1650_v0  ;;  %1163 = vmatmul.bf16.gmra.mxu2 %v1654_v1  ;;  %v2179_v0 = vld [vmem:[%s3126_s0 + $0x220] sm:$0xf0] }
  0x72   :  { %v2175_v1 = vld [vmem:[%s3126_s0 + $0x204] sm:$0xf]  ;;  %v1798_v9 = vor.u32 %v2179_v0, %v1797_v63 }
  0x73   :  { %1212 = vmatmul.bf16.gmra.mxu3 %v1658_v2  ;;  %1261 = vmatmul.bf16.gmra.mxu0 %v1662_v3  ;;  %v1799_v2 = vld [vmem:[%s3126_s0 + $0x224] sm:$0xf0] }
  0x74   :  { %v1805_v3 = vld [vmem:[%s3126_s0 + $0x208] sm:$0xf]  ;;  %v1802_v12 = vor.u32 %v2175_v1, %v1799_v2 }
  0x75   :  { %v1806_v13 = vor.u32 %v2180_v4, %v1805_v3 }
  0x81   :  { %1119 = vmatmul.bf16.gmra.mxu1 %v1686_v16  ;;  %1168 = vmatmul.bf16.gmra.mxu2 %v1690_v17 }
  0x83   :  { %1217 = vmatmul.bf16.gmra.mxu3 %v1694_v18  ;;  %1266 = vmatmul.bf16.gmra.mxu0 %v1698_v19 }
  0x91   :  { %1124 = vmatmul.bf16.gmra.mxu1 %v1722_v32  ;;  %1173 = vmatmul.bf16.gmra.mxu2 %v1726_v33  ;;  %v1558_v33 = vor.u32 %v2113_v21, %v1555_v22 }
  0x93   :  { %1222 = vmatmul.bf16.gmra.mxu3 %v1730_v34  ;;  %1271 = vmatmul.bf16.gmra.mxu0 %v1734_v35  ;;  %v1562_v34 = vor.u32 %v2118_v24, %v1561_v23 }
  0x9e   :  { %v2779_v50 = vpop.f32.mrf.mxu1 }
  0xa0   :  { %v1051_v53 = vpop.f32.mrf.mxu0 }
  0xa1   :  { %1129 = vmatmul.bf16.gmra.mxu1 %v1758_v48  ;;  %1178 = vmatmul.bf16.gmra.mxu2 %v1762_v49  ;;  %v1052_v30 = vadd.f32 %v2784_v54, %v1051_v53  ;;  %v2122_v49 = vld [vmem:[%s3126_s0 + $0x5c] sm:$0xf]  ;;  %v1597_v53 = vld [vmem:[%s3126_s0 + $0x60] sm:$0xf] }
  0xa3   :  { %1227 = vmatmul.bf16.gmra.mxu3 %v1766_v51  ;;  %1276 = vmatmul.bf16.gmra.mxu0 %v1770_v52  ;;  %v1591_v51 = vld [vmem:[%s3126_s0 + $0x7c] sm:$0xf0] }
  0xa4   :  { %v1071_v55 = vpop.f32.mrf.mxu2  ;;  %v1594_v3 = vor.u32 %v2122_v49, %v1591_v51 }
  0xa5   :  { %v2787_v56 = vadd.f32 %v2784_v54, %v1071_v55  ;;  %v2127_v55 = vld [vmem:[%s3126_s0 + $0x80] sm:$0xf0] }
  0xa6   :  { %v1081_v57 = vpop.f32.mrf.mxu3  ;;  %v2792_v59 = vpop.f32.mrf.mxu1  ;;  %v1598_v4 = vor.u32 %v2127_v55, %v1597_v53 }
  0xa7   :  { %v2790_v58 = vadd.f32 %v2784_v54, %v1081_v57  ;;  %v2123_v57 = vld [vmem:[%s3126_s0 + $0x64] sm:$0xf] }
  0xa8   :  { %v1053_v60 = vpop.f32.mrf.mxu0 }
  0xa9   :  { %v1054_v42 = vadd.f32 %v2784_v54, %v1053_v60  ;;  %v1599_v60 = vld [vmem:[%s3126_s0 + $0x84] sm:$0xf0] }
  0xac   :  { %v1073_v5 = vpop.f32.mrf.mxu2 }
  0xad   :  { %v2819_v6 = vadd.f32 %v2784_v54, %v1073_v5 }
  0xae   :  { %v1083_v7 = vpop.f32.mrf.mxu3  ;;  %v2824_v11 = vpop.f32.mrf.mxu1 }
  0xaf   :  { %v2822_v10 = vadd.f32 %v2784_v54, %v1083_v7  ;;  %v1602_v7 = vor.u32 %v2123_v57, %v1599_v60 }
  0xb0   :  { %v1056_v14 = vpop.f32.mrf.mxu0 }
  0xb1   :  { %1134 = vmatmul.bf16.gmra.mxu1 %v1794_v8  ;;  %1183 = vmatmul.bf16.gmra.mxu2 %v1798_v9  ;;  %v1057_v0 = vadd.f32 %v2784_v54, %v1056_v14  ;;  %v1606_v8 = vor.u32 %v2128_v62, %v1605_v61 }
  0xb3   :  { %1232 = vmatmul.bf16.gmra.mxu3 %v1802_v12  ;;  %1281 = vmatmul.bf16.gmra.mxu0 %v1806_v13 }
  0xb4   :  { %v1076_v15 = vpop.f32.mrf.mxu2 }
  0xb5   :  { %v2827_v16 = vadd.f32 %v2784_v54, %v1076_v15 }
  0xb6   :  { %v1086_v17 = vpop.f32.mrf.mxu3  ;;  %v2832_v19 = vpop.f32.mrf.mxu1 }
  0xb7   :  { %v2830_v18 = vadd.f32 %v2784_v54, %v1086_v17 }
  0xb8   :  { %v1058_v20 = vpop.f32.mrf.mxu0 }
  0xb9   :  { %v1059_v21 = vadd.f32 %v2784_v54, %v1058_v20  ;;  %v1633_v20 = vld [vmem:[%s3126_s0 + $0xa8] sm:$0xf] }
  0xbc   :  { %v1078_v29 = vpop.f32.mrf.mxu2 }
  0xbd   :  { %v2860_v31 = vadd.f32 %v2784_v54, %v1078_v29 }
  0xbe   :  { %v1088_v32 = vpop.f32.mrf.mxu3  ;;  %v1100_v36 = vpop.f32.mrf.mxu1 }
  0xbf   :  { %v2863_v35 = vadd.f32 %v2784_v54, %v1088_v32  ;;  %v1101_v39 = vadd.f32 %v1100_v36, %v1052_v30  ;;  %v2136_v30 = vld [vmem:[%s3126_s0 + $0xc8] sm:$0xf0]  ;;  %v2137_v36 = vld [vmem:[%s3126_s0 + $0xd0] sm:$0xf0] }
  0xc0   :  { %v1247_v40 = vpop.f32.mrf.mxu0  ;;  %v2132_v32 = vld [vmem:[%s3126_s0 + $0xac] sm:$0xf] }
  0xc1   :  { %1295 = vmatmul.bf16.vlgmr.msra.gmra.mxu1 %v1558_v33  ;;  %1344 = vmatmul.bf16.vlgmr.msra.gmra.mxu2 %v1562_v34  ;;  %v1635_v33 = vld [vmem:[%s3126_s0 + $0xcc] sm:$0xf0] }
  0xc2   :  { %v1641_v34 = vld [vmem:[%s3126_s0 + $0xb0] sm:$0xf] }
  0xc3   :  { %1393 = vmatmul.bf16.vlgmr.msra.gmra.mxu3 %v1566_v37  ;;  %1442 = vmatmul.bf16.vlgmr.msra.gmra.mxu0 %v1570_v38  ;;  %v1062_v38 = vadd.f32 %v2784_v54, %v2779_v50  ;;  %v1064_v50 = vadd.f32 %v2784_v54, %v2792_v59  ;;  %v1669_v59 = vld [vmem:[%s3126_s0 + $0xf0] sm:$0xf] }
  0xc4   :  { %v1149_v41 = vpop.f32.mrf.mxu2 }
  0xc5   :  { %v1150_v43 = vadd.f32 %v1149_v41, %v1101_v39  ;;  %v1630_v41 = vor.u32 %v2131_v27, %v1627_v28 }
  0xc6   :  { %v1198_v44 = vpop.f32.mrf.mxu3  ;;  %v1102_v45 = vpop.f32.mrf.mxu1 }
  0xc7   :  { %v1199_v46 = vadd.f32 %v1198_v44, %v1150_v43  ;;  %v1103_v47 = vadd.f32 %v1102_v45, %v1054_v42  ;;  %v1634_v42 = vor.u32 %v2136_v30, %v1633_v20  ;;  %v1638_v44 = vor.u32 %v2132_v32, %v1635_v33 }
  0xc8   :  { %v1249_v48 = vpop.f32.mrf.mxu0  ;;  %v1642_v45 = vor.u32 %v2137_v36, %v1641_v34 }
  0xc9   :  { %v2872_v52 = vadd.f32 %v1247_v40, %v1199_v46 }
  0xcc   :  { %v1151_v63 = vpop.f32.mrf.mxu2 }
  0xcd   :  { %v1152_v1 = vadd.f32 %v1151_v63, %v1103_v47  ;;  %v2140_v63 = vld [vmem:[%s3126_s0 + $0xec] sm:$0xf] }
  0xce   :  { %v1200_v2 = vpop.f32.mrf.mxu3  ;;  %v1105_v5 = vpop.f32.mrf.mxu1 }
  0xcf   :  { %v1201_v9 = vadd.f32 %v1200_v2, %v1152_v1  ;;  %v1106_v12 = vadd.f32 %v1105_v5, %v1057_v0  ;;  %v1663_v0 = vld [vmem:[%s3126_s0 + $0x10c] sm:$0xf0]  ;;  %v2145_v2 = vld [vmem:[%s3126_s0 + $0x110] sm:$0xf0]  ;;  %v1677_v5 = vld [vmem:[%s3126_s0 + $0xf8] sm:$0xf] }
  0xd0   :  { %v1252_v13 = vpop.f32.mrf.mxu0 }
  0xd1   :  { %1300 = vmatmul.bf16.gmra.mxu1 %v1594_v3  ;;  %1349 = vmatmul.bf16.gmra.mxu2 %v1598_v4  ;;  %v2893_v15 = vadd.f32 %v1249_v48, %v1201_v9  ;;  %v2141_v3 = vld [vmem:[%s3126_s0 + $0xf4] sm:$0xf]  ;;  %v1671_v4 = vld [vmem:[%s3126_s0 + $0x114] sm:$0xf0]  ;;  %v1067_v9 = vadd.f32 %v2784_v54, %v2824_v11  ;;  %v1069_v11 = vadd.f32 %v2784_v54, %v2832_v19  ;;  %v2154_v19 = vld [vmem:[%s3126_s0 + $0x158] sm:$0xf0] }
  0xd2   :  { %v1705_v54 = vld [vmem:[%s3126_s0 + $0x138] sm:$0xf] }
  0xd3   :  { %1398 = vmatmul.bf16.gmra.mxu3 %v1602_v7  ;;  %1447 = vmatmul.bf16.gmra.mxu0 %v1606_v8  ;;  %v2146_v7 = vld [vmem:[%s3126_s0 + $0x118] sm:$0xf0] }
  0xd4   :  { %v1154_v17 = vpop.f32.mrf.mxu2 }
  0xd5   :  { %v1155_v14 = vadd.f32 %v1154_v17, %v1106_v12  ;;  %v1666_v17 = vor.u32 %v2140_v63, %v1663_v0 }
  0xd6   :  { %v1203_v22 = vpop.f32.mrf.mxu3  ;;  %v1107_v23 = vpop.f32.mrf.mxu1 }
  0xd7   :  { %v1204_v24 = vadd.f32 %v1203_v22, %v1155_v14  ;;  %v1108_v25 = vadd.f32 %v1107_v23, %v1059_v21  ;;  %v1670_v21 = vor.u32 %v2145_v2, %v1669_v59  ;;  %v1674_v22 = vor.u32 %v2141_v3, %v1671_v4 }
  0xd8   :  { %v1254_v26 = vpop.f32.mrf.mxu0  ;;  %v1678_v23 = vor.u32 %v2146_v7, %v1677_v5  ;;  %v2158_v5 = vld [vmem:[%s3126_s0 + $0x17c] sm:$0xf] }
  0xd9   :  { %v2902_v29 = vadd.f32 %v1252_v13, %v1204_v24 }
  0xdc   :  { %v1156_v37 = vpop.f32.mrf.mxu2 }
  0xdd   :  { %v1157_v39 = vadd.f32 %v1156_v37, %v1108_v25  ;;  %v2149_v37 = vld [vmem:[%s3126_s0 + $0x134] sm:$0xf] }
  0xde   :  { %v1205_v40 = vpop.f32.mrf.mxu3  ;;  %v1110_v43 = vpop.f32.mrf.mxu1 }
  0xdf   :  { %v1206_v46 = vadd.f32 %v1205_v40, %v1157_v39  ;;  %v1111_v47 = vadd.f32 %v1110_v43, %v1062_v38  ;;  %v1699_v38 = vld [vmem:[%s3126_s0 + $0x154] sm:$0xf0]  ;;  %v2150_v40 = vld [vmem:[%s3126_s0 + $0x13c] sm:$0xf]  ;;  %v2155_v43 = vld [vmem:[%s3126_s0 + $0x160] sm:$0xf0] }
  0xe0   :  { %v1257_v48 = vpop.f32.mrf.mxu0 }
  0xe1   :  { %1305 = vmatmul.bf16.gmra.mxu1 %v1630_v41  ;;  %1354 = vmatmul.bf16.gmra.mxu2 %v1634_v42  ;;  %v2924_v49 = vadd.f32 %v1254_v26, %v1206_v46  ;;  %v1707_v41 = vld [vmem:[%s3126_s0 + $0x15c] sm:$0xf0] }
  0xe2   :  { %v1713_v42 = vld [vmem:[%s3126_s0 + $0x140] sm:$0xf] }
  0xe3   :  { %1403 = vmatmul.bf16.gmra.mxu3 %v1638_v44  ;;  %1452 = vmatmul.bf16.gmra.mxu0 %v1642_v45 }
  0xe4   :  { %v1159_v51 = vpop.f32.mrf.mxu2 }
  0xe5   :  { %v1160_v53 = vadd.f32 %v1159_v51, %v1111_v47  ;;  %v1702_v47 = vor.u32 %v2149_v37, %v1699_v38 }
  0xe6   :  { %v1208_v55 = vpop.f32.mrf.mxu3  ;;  %v1112_v57 = vpop.f32.mrf.mxu1 }
  0xe7   :  { %v1209_v60 = vadd.f32 %v1208_v55, %v1160_v53  ;;  %v1113_v61 = vadd.f32 %v1112_v57, %v1064_v50  ;;  %v1710_v50 = vor.u32 %v2150_v40, %v1707_v41  ;;  %v1714_v53 = vor.u32 %v2155_v43, %v1713_v42  ;;  %v2167_v40 = vld [vmem:[%s3126_s0 + $0x1c4] sm:$0xf]  ;;  %v1777_v42 = vld [vmem:[%s3126_s0 + $0x1c8] sm:$0xf]  ;;  %v2172_v43 = vld [vmem:[%s3126_s0 + $0x1e8] sm:$0xf0] }
  0xe8   :  { %v1259_v62 = vpop.f32.mrf.mxu0 }
  0xe9   :  { %v2934_v1 = vadd.f32 %v1257_v48, %v1209_v60  ;;  %v1706_v48 = vor.u32 %v2154_v19, %v1705_v54 }
  0xec   :  { %v1161_v8 = vpop.f32.mrf.mxu2 }
  0xed   :  { %v1162_v12 = vadd.f32 %v1161_v8, %v1113_v61  ;;  %v1741_v8 = vld [vmem:[%s3126_s0 + $0x180] sm:$0xf] }
  0xee   :  { %v1210_v13 = vpop.f32.mrf.mxu3  ;;  %v1115_v14 = vpop.f32.mrf.mxu1 }
  0xef   :  { %v1211_v24 = vadd.f32 %v1210_v13, %v1162_v12  ;;  %v1116_v25 = vadd.f32 %v1115_v14, %v1067_v9  ;;  %v2163_v9 = vld [vmem:[%s3126_s0 + $0x1a0] sm:$0xf0]  ;;  %v1743_v12 = vld [vmem:[%s3126_s0 + $0x1a4] sm:$0xf0] }
  0xf0   :  { %v1262_v26 = vpop.f32.mrf.mxu0  ;;  %v1749_v13 = vld [vmem:[%s3126_s0 + $0x188] sm:$0xf] }
  0xf1   :  { %1310 = vmatmul.bf16.gmra.mxu1 %v1666_v17  ;;  %1359 = vmatmul.bf16.gmra.mxu2 %v1670_v21  ;;  %v2956_v27 = vadd.f32 %v1259_v62, %v1211_v24  ;;  %v2164_v17 = vld [vmem:[%s3126_s0 + $0x1a8] sm:$0xf0]  ;;  %v1742_v24 = vor.u32 %v2163_v9, %v1741_v8 }
  0xf3   :  { %1408 = vmatmul.bf16.gmra.mxu3 %v1674_v22  ;;  %1457 = vmatmul.bf16.gmra.mxu0 %v1678_v23 }
  0xf4   :  { %v1164_v28 = vpop.f32.mrf.mxu2 }
  0xf5   :  { %v1165_v20 = vadd.f32 %v1164_v28, %v1116_v25  ;;  %v1750_v28 = vor.u32 %v2164_v17, %v1749_v13  ;;  %v1813_v13 = vld [vmem:[%s3126_s0 + $0x210] sm:$0xf]  ;;  %v2181_v17 = vld [vmem:[%s3126_s0 + $0x230] sm:$0xf0] }
  0xf6   :  { %v1213_v30 = vpop.f32.mrf.mxu3  ;;  %v1117_v32 = vpop.f32.mrf.mxu1 }
  0xf7   :  { %v1214_v33 = vadd.f32 %v1213_v30, %v1165_v20  ;;  %v1118_v34 = vadd.f32 %v1117_v32, %v1069_v11 }
  0xf8   :  { %v1264_v36 = vpop.f32.mrf.mxu0 }
  0xf9   :  { %v2966_v39 = vadd.f32 %v1262_v26, %v1214_v33 }
  0xfc   :  { %v1166_v44 = vpop.f32.mrf.mxu2 }
  0xfd   :  { %v1167_v45 = vadd.f32 %v1166_v44, %v1118_v34  ;;  %v1779_v44 = vld [vmem:[%s3126_s0 + $0x1ec] sm:$0xf0] }
  0xfe   :  { %v1215_v46 = vpop.f32.mrf.mxu3  ;;  %v1120_v51 = vpop.f32.mrf.mxu1 }
  0xff   :  { %v1216_v55 = vadd.f32 %v1215_v46, %v1167_v45  ;;  %v1121_v57 = vadd.f32 %v1120_v51, %v2787_v56  ;;  %v1735_v56 = vld [vmem:[%s3126_s0 + $0x19c] sm:$0xf0]  ;;  %v1785_v45 = vld [vmem:[%s3126_s0 + $0x1d0] sm:$0xf]  ;;  %v2173_v46 = vld [vmem:[%s3126_s0 + $0x1f0] sm:$0xf0] }
 0x100   :  { %v1267_v60 = vpop.f32.mrf.mxu0  ;;  %v1738_v23 = vor.u32 %v2158_v5, %v1735_v56 }
 0x101   :  { %1315 = vmatmul.bf16.gmra.mxu1 %v1702_v47  ;;  %1364 = vmatmul.bf16.gmra.mxu2 %v1706_v48  ;;  %v2987_v61 = vadd.f32 %v1264_v36, %v1216_v55 }
 0x103   :  { %1413 = vmatmul.bf16.gmra.mxu3 %v1710_v50  ;;  %1462 = vmatmul.bf16.gmra.mxu0 %v1714_v53  ;;  %v1778_v53 = vor.u32 %v2172_v43, %v1777_v42 }
 0x104   :  { %v1169_v62 = vpop.f32.mrf.mxu2 }
 0x105   :  { %v1170_v63 = vadd.f32 %v1169_v62, %v1121_v57 }
 0x106   :  { %v1218_v0 = vpop.f32.mrf.mxu3  ;;  %v1122_v59 = vpop.f32.mrf.mxu1 }
 0x107   :  { %v1219_v2 = vadd.f32 %v1218_v0, %v1170_v63  ;;  %v1123_v3 = vadd.f32 %v1122_v59, %v2819_v6  ;;  %v2159_v6 = vld [vmem:[%s3126_s0 + $0x184] sm:$0xf] }
 0x108   :  { %v1269_v4 = vpop.f32.mrf.mxu0  ;;  %v1746_v26 = vor.u32 %v2159_v6, %v1743_v12  ;;  %v2176_v6 = vld [vmem:[%s3126_s0 + $0x20c] sm:$0xf] }
 0x109   :  { %v2996_v7 = vadd.f32 %v1267_v60, %v1219_v2  ;;  %v1786_v60 = vor.u32 %v2173_v46, %v1785_v45 }
 0x10c   :  { %v1171_v21 = vpop.f32.mrf.mxu2 }
 0x10d   :  { %v1172_v14 = vadd.f32 %v1171_v21, %v1123_v3  ;;  %v1815_v21 = vld [vmem:[%s3126_s0 + $0x234] sm:$0xf0] }
 0x10e   :  { %v1220_v22 = vpop.f32.mrf.mxu3  ;;  %v1125_v25 = vpop.f32.mrf.mxu1 }
 0x10f   :  { %v1221_v11 = vadd.f32 %v1220_v22, %v1172_v14  ;;  %v1126_v20 = vadd.f32 %v1125_v25, %v2827_v16  ;;  %v1771_v16 = vld [vmem:[%s3126_s0 + $0x1e4] sm:$0xf0]  ;;  %v1821_v14 = vld [vmem:[%s3126_s0 + $0x218] sm:$0xf]  ;;  %v2182_v22 = vld [vmem:[%s3126_s0 + $0x238] sm:$0xf0] }
 0x110   :  { %v1272_v30 = vpop.f32.mrf.mxu0  ;;  %v1774_v50 = vor.u32 %v2167_v40, %v1771_v16 }
 0x111   :  { %1320 = vmatmul.bf16.gmra.mxu1 %v1738_v23  ;;  %1369 = vmatmul.bf16.gmra.mxu2 %v1742_v24  ;;  %v3017_v32 = vadd.f32 %v1269_v4, %v1221_v11 }
 0x113   :  { %1418 = vmatmul.bf16.gmra.mxu3 %v1746_v26  ;;  %1467 = vmatmul.bf16.gmra.mxu0 %v1750_v28  ;;  %v1814_v28 = vor.u32 %v2181_v17, %v1813_v13 }
 0x114   :  { %v1174_v33 = vpop.f32.mrf.mxu2 }
 0x115   :  { %v1175_v34 = vadd.f32 %v1174_v33, %v1126_v20 }
 0x116   :  { %v1223_v36 = vpop.f32.mrf.mxu3  ;;  %v1127_v37 = vpop.f32.mrf.mxu1 }
 0x117   :  { %v1224_v38 = vadd.f32 %v1223_v36, %v1175_v34  ;;  %v1128_v54 = vadd.f32 %v1127_v37, %v2860_v31  ;;  %v2168_v31 = vld [vmem:[%s3126_s0 + $0x1cc] sm:$0xf] }
 0x118   :  { %v1274_v19 = vpop.f32.mrf.mxu0  ;;  %v1782_v57 = vor.u32 %v2168_v31, %v1779_v44 }
 0x119   :  { %v3026_v41 = vadd.f32 %v1272_v30, %v1224_v38  ;;  %v1822_v30 = vor.u32 %v2182_v22, %v1821_v14 }
 0x11c   :  { %v1176_v47 = vpop.f32.mrf.mxu2 }
 0x11d   :  { %v1177_v48 = vadd.f32 %v1176_v47, %v1128_v54 }
 0x11e   :  { %v1225_v51 = vpop.f32.mrf.mxu3  ;;  %v1130_v55 = vpop.f32.mrf.mxu1 }
 0x11f   :  { %v1226_v62 = vadd.f32 %v1225_v51, %v1177_v48  ;;  %v1131_v63 = vadd.f32 %v1130_v55, %v2790_v58  ;;  %v1807_v58 = vld [vmem:[%s3126_s0 + $0x22c] sm:$0xf0] }
 0x120   :  { %v1277_v0 = vpop.f32.mrf.mxu0  ;;  %v1810_v26 = vor.u32 %v2176_v6, %v1807_v58 }
 0x121   :  { %1325 = vmatmul.bf16.gmra.mxu1 %v1774_v50  ;;  %1374 = vmatmul.bf16.gmra.mxu2 %v1778_v53  ;;  %v3047_v59 = vadd.f32 %v1274_v19, %v1226_v62 }
 0x123   :  { %1423 = vmatmul.bf16.gmra.mxu3 %v1782_v57  ;;  %1472 = vmatmul.bf16.gmra.mxu0 %v1786_v60 }
 0x124   :  { %v1179_v2 = vpop.f32.mrf.mxu2 }
 0x125   :  { %v1180_v3 = vadd.f32 %v1179_v2, %v1131_v63 }
 0x126   :  { %v1228_v4 = vpop.f32.mrf.mxu3  ;;  %v1132_v5 = vpop.f32.mrf.mxu1 }
 0x127   :  { %v1229_v56 = vadd.f32 %v1228_v4, %v1180_v3  ;;  %v1133_v8 = vadd.f32 %v1132_v5, %v2822_v10  ;;  %v2177_v10 = vld [vmem:[%s3126_s0 + $0x214] sm:$0xf] }
 0x128   :  { %v1279_v9 = vpop.f32.mrf.mxu0  ;;  %v1818_v20 = vor.u32 %v2177_v10, %v1815_v21 }
 0x129   :  { %v3056_v12 = vadd.f32 %v1277_v0, %v1229_v56 }
 0x12c   :  { %v1181_v23 = vpop.f32.mrf.mxu2 }
 0x12d   :  { %v1182_v24 = vadd.f32 %v1181_v23, %v1133_v8 }
 0x12e   :  { %v1230_v25 = vpop.f32.mrf.mxu3  ;;  %v1135_v11 = vpop.f32.mrf.mxu1 }
 0x12f   :  { %v1231_v33 = vadd.f32 %v1230_v25, %v1182_v24  ;;  %v1136_v34 = vadd.f32 %v1135_v11, %v2830_v18 }
 0x130   :  { %v1282_v36 = vpop.f32.mrf.mxu0 }
 0x131   :  { %1330 = vmatmul.bf16.gmra.mxu1 %v1810_v26  ;;  %1379 = vmatmul.bf16.gmra.mxu2 %v1814_v28  ;;  %v3077_v37 = vadd.f32 %v1279_v9, %v1231_v33 }
 0x133   :  { %1428 = vmatmul.bf16.gmra.mxu3 %v1818_v20  ;;  %1477 = vmatmul.bf16.gmra.mxu0 %v1822_v30 }
 0x134   :  { %v1184_v38 = vpop.f32.mrf.mxu2 }
 0x135   :  { %v1185_v54 = vadd.f32 %v1184_v38, %v1136_v34 }
 0x136   :  { %v1233_v19 = vpop.f32.mrf.mxu3  ;;  %v1137_v40 = vpop.f32.mrf.mxu1 }
 0x137   :  { %v1234_v16 = vadd.f32 %v1233_v19, %v1185_v54  ;;  %v1138_v42 = vadd.f32 %v1137_v40, %v2863_v35 }
 0x138   :  { %v1284_v43 = vpop.f32.mrf.mxu0 }
 0x139   :  { %v3080_v31 = vadd.f32 %v1282_v36, %v1234_v16 }
 0x13c   :  { %v1186_v44 = vpop.f32.mrf.mxu2 }
 0x13d   :  { %v1187_v45 = vadd.f32 %v1186_v44, %v1138_v42 }
 0x13e   :  { %v1235_v18 = vpop.f32.mrf.mxu3  ;;  %v1296_v46 = vpop.f32.mrf.mxu1 }
 0x13f   :  { %v1236_v47 = vadd.f32 %v1235_v18, %v1187_v45  ;;  %v1297_v53 = vadd.f32 %v1296_v46, %v2872_v52 }
 0x140   :  { %v1443_v48 = vpop.f32.mrf.mxu0 }
 0x141   :  { %v3082_v51 = vadd.f32 %v1284_v43, %v1236_v47 }
 0x144   :  { %v1345_v50 = vpop.f32.mrf.mxu2 }
 0x145   :  { %v1346_v60 = vadd.f32 %v1345_v50, %v1297_v53 }
 0x146   :  { %v1394_v55 = vpop.f32.mrf.mxu3  ;;  %v1298_v57 = vpop.f32.mrf.mxu1 }
 0x147   :  { %v1395_v63 = vadd.f32 %v1394_v55, %v1346_v60  ;;  %v1299_v35 = vadd.f32 %v1298_v57, %v2893_v15 }
 0x148   :  { %v1445_v62 = vpop.f32.mrf.mxu0 }
 0x149   :  { %v1444_v5 = vadd.f32 %v1443_v48, %v1395_v63 }
 0x14b   :  { %v1483_v6 = vmax.f32 %v1444_v5, 0.0 }
 0x14c   :  { %v1347_v0 = vpop.f32.mrf.mxu2 }
 0x14d   :  { %v1348_v2 = vadd.f32 %v1347_v0, %v1299_v35 }
 0x14e   :  { %v1396_v3 = vpop.f32.mrf.mxu3  ;;  %v1301_v4 = vpop.f32.mrf.mxu1 }
 0x14f   :  { %v1397_v56 = vadd.f32 %v1396_v3, %v1348_v2  ;;  %v1302_v52 = vadd.f32 %v1301_v4, %v2902_v29 }
 0x150   :  { %v1448_v8 = vpop.f32.mrf.mxu0 }
 0x151   :  { %v1446_v9 = vadd.f32 %v1445_v62, %v1397_v56 }
 0x153   :  { %v1484_v58 = vmax.f32 %v1446_v9, 0.0 }
 0x154   :  { %v1350_v13 = vpop.f32.mrf.mxu2 }
 0x155   :  { %v2258_v17 = vpack.c.bf16 %v1484_v58, %v1483_v6  ;;  %v1351_v15 = vadd.f32 %v1350_v13, %v1302_v52 }
 0x156   :  { %v1399_v10 = vpop.f32.mrf.mxu3  ;;  %v1303_v21 = vpop.f32.mrf.mxu1 }
 0x157   :  { %2259 = vst [vmem:[%s3127_s3] sm:$0xff] %v2258_v17   ;;  %v1400_v22 = vadd.f32 %v1399_v10, %v1351_v15  ;;  %v1304_v23 = vadd.f32 %v1303_v21, %v2924_v49 }
 0x158   :  { %v1450_v14 = vpop.f32.mrf.mxu0 }
 0x159   :  { %v1449_v11 = vadd.f32 %v1448_v8, %v1400_v22 }
 0x15b   :  { %v1485_v29 = vmax.f32 %v1449_v11, 0.0 }
 0x15c   :  { %v1352_v24 = vpop.f32.mrf.mxu2 }
 0x15d   :  { %v1353_v25 = vadd.f32 %v1352_v24, %v1304_v23 }
 0x15e   :  { %v1401_v26 = vpop.f32.mrf.mxu3  ;;  %v1306_v28 = vpop.f32.mrf.mxu1 }
 0x15f   :  { %v1402_v20 = vadd.f32 %v1401_v26, %v1353_v25  ;;  %v1307_v54 = vadd.f32 %v1306_v28, %v2934_v1 }
 0x160   :  { %v1453_v30 = vpop.f32.mrf.mxu0 }
 0x161   :  { %v1451_v33 = vadd.f32 %v1450_v14, %v1402_v20 }
 0x163   :  { %v1486_v34 = vmax.f32 %v1451_v33, 0.0 }
 0x164   :  { %v1355_v36 = vpop.f32.mrf.mxu2 }
 0x165   :  { %v2263_v38 = vpack.c.bf16 %v1486_v34, %v1485_v29  ;;  %v1356_v49 = vadd.f32 %v1355_v36, %v1307_v54 }
 0x166   :  { %v1404_v19 = vpop.f32.mrf.mxu3  ;;  %v1308_v40 = vpop.f32.mrf.mxu1 }
 0x167   :  { %2295 = vst [vmem:[%s3127_s3 + $0x8] sm:$0xff] %v2263_v38   ;;  %v1405_v42 = vadd.f32 %v1404_v19, %v1356_v49  ;;  %v1309_v43 = vadd.f32 %v1308_v40, %v2956_v27 }
 0x168   :  { %v1455_v16 = vpop.f32.mrf.mxu0 }
 0x169   :  { %v1454_v47 = vadd.f32 %v1453_v30, %v1405_v42 }
 0x16b   :  { %v1487_v1 = vmax.f32 %v1454_v47, 0.0 }
 0x16c   :  { %v1357_v44 = vpop.f32.mrf.mxu2 }
 0x16d   :  { %v1358_v45 = vadd.f32 %v1357_v44, %v1309_v43 }
 0x16e   :  { %v1406_v18 = vpop.f32.mrf.mxu3  ;;  %v1311_v46 = vpop.f32.mrf.mxu1 }
 0x16f   :  { %v1407_v48 = vadd.f32 %v1406_v18, %v1358_v45  ;;  %v1312_v62 = vadd.f32 %v1311_v46, %v2966_v39 }
 0x170   :  { %v1458_v50 = vpop.f32.mrf.mxu0 }
 0x171   :  { %v1456_v53 = vadd.f32 %v1455_v16, %v1407_v48 }
 0x173   :  { %v1488_v55 = vmax.f32 %v1456_v53, 0.0 }
 0x174   :  { %v1360_v57 = vpop.f32.mrf.mxu2 }
 0x175   :  { %v2268_v60 = vpack.c.bf16 %v1488_v55, %v1487_v1  ;;  %v1361_v27 = vadd.f32 %v1360_v57, %v1312_v62 }
 0x176   :  { %v1409_v63 = vpop.f32.mrf.mxu3  ;;  %v1313_v35 = vpop.f32.mrf.mxu1 }
 0x177   :  { %2296 = vst [vmem:[%s3127_s3 + $0x10] sm:$0xff] %v2268_v60   ;;  %v1410_v2 = vadd.f32 %v1409_v63, %v1361_v27  ;;  %v1314_v3 = vadd.f32 %v1313_v35, %v2987_v61 }
 0x178   :  { %v1460_v0 = vpop.f32.mrf.mxu0 }
 0x179   :  { %v1459_v9 = vadd.f32 %v1458_v50, %v1410_v2 }
 0x17b   :  { %v1489_v39 = vmax.f32 %v1459_v9, 0.0 }
 0x17c   :  { %v1362_v4 = vpop.f32.mrf.mxu2 }
 0x17d   :  { %v1363_v5 = vadd.f32 %v1362_v4, %v1314_v3 }
 0x17e   :  { %v1411_v56 = vpop.f32.mrf.mxu3  ;;  %v1316_v8 = vpop.f32.mrf.mxu1 }
 0x17f   :  { %v1412_v6 = vadd.f32 %v1411_v56, %v1363_v5  ;;  %v1317_v21 = vadd.f32 %v1316_v8, %v2996_v7 }
 0x180   :  { %v1463_v58 = vpop.f32.mrf.mxu0 }
 0x181   :  { %v1461_v13 = vadd.f32 %v1460_v0, %v1412_v6 }
 0x183   :  { %v1490_v17 = vmax.f32 %v1461_v13, 0.0 }
 0x184   :  { %v1365_v52 = vpop.f32.mrf.mxu2 }
 0x185   :  { %v2273_v10 = vpack.c.bf16 %v1490_v17, %v1489_v39  ;;  %v1366_v61 = vadd.f32 %v1365_v52, %v1317_v21 }
 0x186   :  { %v1414_v15 = vpop.f32.mrf.mxu3  ;;  %v1318_v14 = vpop.f32.mrf.mxu1 }
 0x187   :  { %2297 = vst [vmem:[%s3127_s3 + $0x18] sm:$0xff] %v2273_v10   ;;  %v1415_v23 = vadd.f32 %v1414_v15, %v1366_v61  ;;  %v1319_v24 = vadd.f32 %v1318_v14, %v3017_v32 }
 0x188   :  { %v1465_v22 = vpop.f32.mrf.mxu0 }
 0x189   :  { %v1464_v20 = vadd.f32 %v1463_v58, %v1415_v23 }
 0x18b   :  { %v1491_v7 = vmax.f32 %v1464_v20, 0.0 }
 0x18c   :  { %v1367_v25 = vpop.f32.mrf.mxu2 }
 0x18d   :  { %v1368_v26 = vadd.f32 %v1367_v25, %v1319_v24 }
 0x18e   :  { %v1416_v28 = vpop.f32.mrf.mxu3  ;;  %v1321_v11 = vpop.f32.mrf.mxu1 }
 0x18f   :  { %v1417_v30 = vadd.f32 %v1416_v28, %v1368_v26  ;;  %v1322_v54 = vadd.f32 %v1321_v11, %v3026_v41 }
 0x190   :  { %v1468_v33 = vpop.f32.mrf.mxu0 }
 0x191   :  { %v1466_v29 = vadd.f32 %v1465_v22, %v1417_v30 }
 0x193   :  { %v1492_v34 = vmax.f32 %v1466_v29, 0.0 }
 0x194   :  { %v1370_v36 = vpop.f32.mrf.mxu2 }
 0x195   :  { %v2278_v38 = vpack.c.bf16 %v1492_v34, %v1491_v7  ;;  %v1371_v32 = vadd.f32 %v1370_v36, %v1322_v54 }
 0x196   :  { %v1419_v19 = vpop.f32.mrf.mxu3  ;;  %v1323_v40 = vpop.f32.mrf.mxu1 }
 0x197   :  { %2298 = vst [vmem:[%s3127_s3 + $0x20] sm:$0xff] %v2278_v38   ;;  %v1420_v16 = vadd.f32 %v1419_v19, %v1371_v32  ;;  %v1324_v42 = vadd.f32 %v1323_v40, %v3047_v59 }
 0x198   :  { %v1470_v49 = vpop.f32.mrf.mxu0 }
 0x199   :  { %v1469_v46 = vadd.f32 %v1468_v33, %v1420_v16 }
 0x19b   :  { %v1493_v41 = vmax.f32 %v1469_v46, 0.0 }
 0x19c   :  { %v1372_v43 = vpop.f32.mrf.mxu2 }
 0x19d   :  { %v1373_v44 = vadd.f32 %v1372_v43, %v1324_v42 }
 0x19e   :  { %v1421_v45 = vpop.f32.mrf.mxu3  ;;  %v1326_v18 = vpop.f32.mrf.mxu1 }
 0x19f   :  { %v1422_v47 = vadd.f32 %v1421_v45, %v1373_v44  ;;  %v1327_v57 = vadd.f32 %v1326_v18, %v3056_v12 }
 0x1a0   :  { %v1473_v50 = vpop.f32.mrf.mxu0 }
 0x1a1   :  { %v1471_v48 = vadd.f32 %v1470_v49, %v1422_v47 }
 0x1a3   :  { %v1494_v53 = vmax.f32 %v1471_v48, 0.0 }
 0x1a4   :  { %v1375_v1 = vpop.f32.mrf.mxu2 }
 0x1a5   :  { %v2283_v55 = vpack.c.bf16 %v1494_v53, %v1493_v41  ;;  %v1376_v59 = vadd.f32 %v1375_v1, %v1327_v57 }
 0x1a6   :  { %v1424_v60 = vpop.f32.mrf.mxu3  ;;  %v1328_v62 = vpop.f32.mrf.mxu1 }
 0x1a7   :  { %2299 = vst [vmem:[%s3127_s3 + $0x28] sm:$0xff] %v2283_v55   ;;  %v1425_v63 = vadd.f32 %v1424_v60, %v1376_v59  ;;  %v1329_v35 = vadd.f32 %v1328_v62, %v3077_v37 }
 0x1a8   :  { %v1475_v27 = vpop.f32.mrf.mxu0 }
 0x1a9   :  { %v1474_v5 = vadd.f32 %v1473_v50, %v1425_v63 }
 0x1ab   :  { %v1495_v9 = vmax.f32 %v1474_v5, 0.0 }
 0x1ac   :  { %v1377_v0 = vpop.f32.mrf.mxu2 }
 0x1ad   :  { %v1378_v2 = vadd.f32 %v1377_v0, %v1329_v35 }
 0x1ae   :  { %v1426_v3 = vpop.f32.mrf.mxu3  ;;  %v1331_v4 = vpop.f32.mrf.mxu1 }
 0x1af   :  { %v1427_v56 = vadd.f32 %v1426_v3, %v1378_v2  ;;  %v1332_v13 = vadd.f32 %v1331_v4, %v3080_v31 }
 0x1b0   :  { %v1478_v17 = vpop.f32.mrf.mxu0 }
 0x1b1   :  { %v1476_v8 = vadd.f32 %v1475_v27, %v1427_v56 }
 0x1b3   :  { %v1496_v12 = vmax.f32 %v1476_v8, 0.0 }
 0x1b4   :  { %v1380_v6 = vpop.f32.mrf.mxu2 }
 0x1b5   :  { %v2288_v58 = vpack.c.bf16 %v1496_v12, %v1495_v9  ;;  %v1381_v37 = vadd.f32 %v1380_v6, %v1332_v13 }
 0x1b6   :  { %v1429_v39 = vpop.f32.mrf.mxu3  ;;  %v1333_v52 = vpop.f32.mrf.mxu1 }
 0x1b7   :  { %2300 = vst [vmem:[%s3127_s3 + $0x30] sm:$0xff] %v2288_v58   ;;  %v1430_v10 = vadd.f32 %v1429_v39, %v1381_v37  ;;  %v1334_v21 = vadd.f32 %v1333_v52, %v3082_v51 }
 0x1b8   :  { %v1480_v24 = vpop.f32.mrf.mxu0 }
 0x1b9   :  { %v1479_v22 = vadd.f32 %v1478_v17, %v1430_v10 }
 0x1bb   :  { %v1497_v26 = vmax.f32 %v1479_v22, 0.0 }
 0x1bc   :  { %v1382_v15 = vpop.f32.mrf.mxu2 }
 0x1bd   :  { %v1383_v14 = vadd.f32 %v1382_v15, %v1334_v21 }
 0x1be   :  { %v1431_v61 = vpop.f32.mrf.mxu3 }
 0x1bf   :  { %v1432_v23 = vadd.f32 %v1431_v61, %v1383_v14 }
 0x1c1   :  { %v1481_v25 = vadd.f32 %v1480_v24, %v1432_v23 }
 0x1c3   :  { %v1498_v31 = vmax.f32 %v1481_v25, 0.0 }
 0x1c5   :  { %v2293_v28 = vpack.c.bf16 %v1498_v31, %v1497_v26 }
 0x1c7   :  { %2301 = vst [vmem:[%s3127_s3 + $0x38] sm:$0xff] %v2293_v28  }

// kernel: autoencoder_forward.11
= control target key start
LH: loop header
LB: loop body
LE: loop exit
PB: predicated region body
PF: predicated region fallthrough
CT: control target
= control target key end

     0   :  { %s2217_s12 = smov 0   ;;  %s2691_s0 = inlined_call_operand.vmem [shape: bf16[512,576], index: 0, kind: input, shape index: {}]   ;;  %s2692_s1 = inlined_call_operand.vmem [shape: bf16[576,128], index: 1, kind: input, shape index: {}]   ;;  %s2693_s2 = inlined_call_operand.vmem [shape: f32[1,128], index: 2, kind: input, shape index: {}]   ;;  %s2694_s3 = inlined_call_operand.vmem [shape: f32[512,128], index: 3, kind: output, shape index: {}]  }
   0x1 LB: > { %s1548_s13 = sadd.s32 4294967295, %s2195_s12   ;;  %p1552_p0 = scmp.ge.s32.totalorder %s2195_s12, 1  ;;  %s2195_s12 = sphi %s2217_s12, %s13_s12  }
   0x2   : > { %p139_p1 = scmp.lt.s32.totalorder %s2195_s12, 3 }
   0x4   : > { %p140_p2 = pnand %p1552_p0, %p139_p1 }
   0x5   : > { %s1553_s20 = sshll.u32 (!%p140_p2), %s1548_s13, 5 }
   0x6   : > { %143 = sbr.rel (%p140_p2) target bundleno = 494 (0x1ee), region = 32  ;;  %p165_p3 = scmp.lt.s32.totalorder (!%p140_p2), %s1553_s20, 63 }
   0xb   : > { %v2126_v0 = vld [vmem:[%s2692_s1 + $0x38] sm:$0xff]  ;;  %v2125_v1 = vld [vmem:[%s2692_s1 + $0x30] sm:$0xff]  ;;  %v2124_v2 = vld [vmem:[%s2692_s1 + $0x28] sm:$0xff]  ;;  %s2696_s20 = smov (!%p165_p3, %s1553_s20), 63  ;;  %vm966_vm0 = vcmask 523264  }
   0xc   : > { %2155 = vmatpush.bf16.msra.mxu1 %v2126_v0  ;;  %2156 = vmatpush.bf16.msra.mxu2 %v2126_v0  ;;  %v2123_v3 = vld [vmem:[%s2692_s1 + $0x20] sm:$0xff]  ;;  %v2122_v4 = vld [vmem:[%s2692_s1 + $0x18] sm:$0xff]  ;;  %v2121_v5 = vld [vmem:[%s2692_s1 + $0x10] sm:$0xff]  ;;  %s2179_s27 = smul.u32 20, %s2696_s20  ;;  %s1556_s19 = sshll.u32 %s2696_s20, 3 }
   0xd   : > { %2157 = vmatpush.bf16.msra.mxu3 %v2126_v0  ;;  %1015 = vmatpush.bf16.msra.mxu0 %v2126_v0  ;;  %v2120_v6 = vld [vmem:[%s2692_s1 + $0x8] sm:$0xff]  ;;  %v2119_v7 = vld [vmem:[%s2692_s1] sm:$0xff]  ;;  %v2142_v16 = vld [vmem:[%s2692_s1 + $0xb8] sm:$0xff]  ;;  %s2553_s23 = scalar_lea.vmem %s2694_s3, %s1556_s19 }
   0xe   : > { %s2252_s5 = scalar_lea.vmem %s2691_s0, %s2179_s27  ;;  %v2150_v17 = vld [vmem:[%s2692_s1 + $0xf8] sm:$0xff]  ;;  %v2141_v24 = vld [vmem:[%s2692_s1 + $0xb0] sm:$0xff]  ;;  %v2140_v28 = vld [vmem:[%s2692_s1 + $0xa8] sm:$0xff] }
   0xf   : > { %v1639_v8 = vld [vmem:[%s2252_s5 + $0xa0] sm:$0xf]  ;;  %v2061_v9 = vld [vmem:[%s2252_s5 + $0xb0] sm:$0xf0]  ;;  %v2134_v22 = vld [vmem:[%s2692_s1 + $0x78] sm:$0xff] }
  0x10   : > { %2158 = vmatpush.bf16.msra.mxu1 %v2125_v1  ;;  %2159 = vmatpush.bf16.msra.mxu2 %v2125_v1  ;;  %v1719_v10 = vld [vmem:[%s2252_s5 + $0x140] sm:$0xf]  ;;  %v2081_v11 = vld [vmem:[%s2252_s5 + $0x150] sm:$0xf0]  ;;  %v1640_v18 = vor.u32 %v2061_v9, %v1639_v8  ;;  %v2154_v23 = vld [vmem:[%s2692_s1 + $0x118] sm:$0xff] }
  0x11   : > { %2160 = vmatpush.bf16.msra.mxu3 %v2125_v1  ;;  %1016 = vmatpush.bf16.msra.mxu0 %v2125_v1  ;;  %v1799_v12 = vld [vmem:[%s2252_s5 + $0x1e0] sm:$0xf]  ;;  %v2101_v13 = vld [vmem:[%s2252_s5 + $0x1f0] sm:$0xf0]  ;;  %v1720_v19 = vor.u32 %v2081_v11, %v1719_v10  ;;  %v2148_v29 = vld [vmem:[%s2692_s1 + $0xe8] sm:$0xff] }
  0x12   : > { %v1559_v14 = vld [vmem:[%s2252_s5] sm:$0xf]  ;;  %v2041_v15 = vld [vmem:[%s2252_s5 + $0x10] sm:$0xf0]  ;;  %v1800_v20 = vor.u32 %v2101_v13, %v1799_v12  ;;  %v2132_v30 = vld [vmem:[%s2692_s1 + $0x68] sm:$0xff] }
  0x13   : > { %v1560_v21 = vor.u32 %v2041_v15, %v1559_v14  ;;  %v2149_v25 = vld [vmem:[%s2692_s1 + $0xf0] sm:$0xff]  ;;  %v2152_v31 = vld [vmem:[%s2692_s1 + $0x108] sm:$0xff]  ;;  %v2139_v32 = vld [vmem:[%s2692_s1 + $0xa0] sm:$0xff] }
  0x14   : > { %2161 = vmatpush.bf16.msra.mxu1 %v2124_v2  ;;  %2162 = vmatpush.bf16.msra.mxu2 %v2124_v2  ;;  %v2133_v26 = vld [vmem:[%s2692_s1 + $0x70] sm:$0xff]  ;;  %v2147_v33 = vld [vmem:[%s2692_s1 + $0xe0] sm:$0xff]  ;;  %v1659_v34 = vld [vmem:[%s2252_s5 + $0xc8] sm:$0xf] }
  0x15   : > { %2163 = vmatpush.bf16.msra.mxu3 %v2124_v2  ;;  %1017 = vmatpush.bf16.msra.mxu0 %v2124_v2  ;;  %v2153_v27 = vld [vmem:[%s2692_s1 + $0x110] sm:$0xff]  ;;  %v2066_v35 = vld [vmem:[%s2252_s5 + $0xd8] sm:$0xf0]  ;;  %v1739_v36 = vld [vmem:[%s2252_s5 + $0x168] sm:$0xf] }
  0x16   : > { %v2086_v37 = vld [vmem:[%s2252_s5 + $0x178] sm:$0xf0]  ;;  %v1819_v38 = vld [vmem:[%s2252_s5 + $0x208] sm:$0xf]  ;;  %v2131_v42 = vld [vmem:[%s2692_s1 + $0x60] sm:$0xff]  ;;  %v1660_v45 = vor.u32 %v2066_v35, %v1659_v34 }
  0x17   : > { %v2106_v39 = vld [vmem:[%s2252_s5 + $0x218] sm:$0xf0]  ;;  %v1579_v40 = vld [vmem:[%s2252_s5 + $0x28] sm:$0xf]  ;;  %v1740_v46 = vor.u32 %v2086_v37, %v1739_v36  ;;  %v2137_v50 = vld [vmem:[%s2692_s1 + $0x90] sm:$0xff] }
  0x18   : > { %2164 = vmatpush.bf16.msra.mxu1 %v2123_v3  ;;  %2165 = vmatpush.bf16.msra.mxu2 %v2123_v3  ;;  %v2046_v41 = vld [vmem:[%s2252_s5 + $0x38] sm:$0xf0]  ;;  %v1820_v47 = vor.u32 %v2106_v39, %v1819_v38  ;;  %v2145_v51 = vld [vmem:[%s2692_s1 + $0xd0] sm:$0xff]  ;;  %v2151_v53 = vld [vmem:[%s2692_s1 + $0x100] sm:$0xff] }
  0x19   : > { %2166 = vmatpush.bf16.msra.mxu3 %v2123_v3  ;;  %1018 = vmatpush.bf16.msra.mxu0 %v2123_v3  ;;  %v2138_v43 = vld [vmem:[%s2692_s1 + $0x98] sm:$0xff]  ;;  %v1580_v48 = vor.u32 %v2046_v41, %v1579_v40  ;;  %v2129_v52 = vld [vmem:[%s2692_s1 + $0x50] sm:$0xff]  ;;  %v2136_v54 = vld [vmem:[%s2692_s1 + $0x88] sm:$0xff] }
  0x1a   : > { %v2146_v44 = vld [vmem:[%s2692_s1 + $0xd8] sm:$0xff]  ;;  %v2144_v55 = vld [vmem:[%s2692_s1 + $0xc8] sm:$0xff]  ;;  %v2135_v57 = vld [vmem:[%s2692_s1 + $0x80] sm:$0xff] }
  0x1b   : > { %v2130_v49 = vld [vmem:[%s2692_s1 + $0x58] sm:$0xff]  ;;  %v2128_v56 = vld [vmem:[%s2692_s1 + $0x48] sm:$0xff]  ;;  %v2143_v58 = vld [vmem:[%s2692_s1 + $0xc0] sm:$0xff] }
  0x1c   : > { %2167 = vmatpush.bf16.msra.mxu1 %v2122_v4  ;;  %2168 = vmatpush.bf16.msra.mxu2 %v2122_v4  ;;  %v1679_v59 = vld [vmem:[%s2252_s5 + $0xf0] sm:$0xf]  ;;  %v2071_v60 = vld [vmem:[%s2252_s5 + $0x100] sm:$0xf0]  ;;  %v1699_v8 = vld [vmem:[%s2252_s5 + $0x118] sm:$0xf] }
  0x1d   : > { %2169 = vmatpush.bf16.msra.mxu3 %v2122_v4  ;;  %1019 = vmatpush.bf16.msra.mxu0 %v2122_v4  ;;  %v1759_v61 = vld [vmem:[%s2252_s5 + $0x190] sm:$0xf]  ;;  %v2091_v62 = vld [vmem:[%s2252_s5 + $0x1a0] sm:$0xf0]  ;;  %v1680_v4 = vor.u32 %v2071_v60, %v1679_v59  ;;  %v2076_v9 = vld [vmem:[%s2252_s5 + $0x128] sm:$0xf0] }
  0x1e   : > { %v1839_v63 = vld [vmem:[%s2252_s5 + $0x230] sm:$0xf]  ;;  %v2111_v0 = vld [vmem:[%s2252_s5 + $0x240] sm:$0xf0]  ;;  %v1779_v10 = vld [vmem:[%s2252_s5 + $0x1b8] sm:$0xf] }
  0x1f   : > { %v1599_v1 = vld [vmem:[%s2252_s5 + $0x50] sm:$0xf]  ;;  %v2051_v2 = vld [vmem:[%s2252_s5 + $0x60] sm:$0xf0]  ;;  %v2096_v11 = vld [vmem:[%s2252_s5 + $0x1c8] sm:$0xf0] }
  0x20   : > { %2170 = vmatpush.bf16.msra.mxu1 %v2121_v5  ;;  %2171 = vmatpush.bf16.msra.mxu2 %v2121_v5  ;;  %v2127_v3 = vld [vmem:[%s2692_s1 + $0x40] sm:$0xff]  ;;  %v1859_v12 = vld [vmem:[%s2252_s5 + $0x258] sm:$0xf]  ;;  %v2116_v13 = vld [vmem:[%s2252_s5 + $0x268] sm:$0xf0] }
  0x21   : > { %2172 = vmatpush.bf16.msra.mxu3 %v2121_v5  ;;  %1020 = vmatpush.bf16.msra.mxu0 %v2121_v5  ;;  %v1760_v5 = vor.u32 %v2091_v62, %v1759_v61  ;;  %v1619_v14 = vld [vmem:[%s2252_s5 + $0x78] sm:$0xf]  ;;  %v2056_v15 = vld [vmem:[%s2252_s5 + $0x88] sm:$0xf0]  ;;  %v1587_v34 = vld [vmem:[%s2252_s5 + $0x30] sm:$0xf] }
  0x22   : > { %v2047_v35 = vld [vmem:[%s2252_s5 + $0x40] sm:$0xf0]  ;;  %v2045_v36 = vld [vmem:[%s2252_s5 + $0x34] sm:$0xf]  ;;  %v1589_v37 = vld [vmem:[%s2252_s5 + $0x44] sm:$0xf0] }
  0x23   : > { %v1595_v38 = vld [vmem:[%s2252_s5 + $0x38] sm:$0xf]  ;;  %v2048_v39 = vld [vmem:[%s2252_s5 + $0x48] sm:$0xf0]  ;;  %v1588_v41 = vor.u32 %v2047_v35, %v1587_v34  ;;  %v2057_v59 = vld [vmem:[%s2252_s5 + $0x90] sm:$0xf0] }
  0x24   : > { %2173 = vmatpush.bf16.msra.mxu1 %v2120_v6  ;;  %2174 = vmatpush.bf16.msra.mxu2 %v2120_v6  ;;  %v2055_v60 = vld [vmem:[%s2252_s5 + $0x84] sm:$0xf]  ;;  %v1629_v61 = vld [vmem:[%s2252_s5 + $0x94] sm:$0xf0]  ;;  %v1635_v62 = vld [vmem:[%s2252_s5 + $0x88] sm:$0xf] }
  0x25   : > { %2175 = vmatpush.bf16.msra.mxu3 %v2120_v6  ;;  %1021 = vmatpush.bf16.msra.mxu0 %v2120_v6  ;;  %v1840_v6 = vor.u32 %v2111_v0, %v1839_v63  ;;  %v2058_v63 = vld [vmem:[%s2252_s5 + $0x98] sm:$0xf0]  ;;  %v2068_v34 = vld [vmem:[%s2252_s5 + $0xe8] sm:$0xf0] }
  0x28   : > { %2176 = vmatpush.bf16.msra.mxu1 %v2119_v7  ;;  %2177 = vmatpush.bf16.msra.mxu2 %v2119_v7 }
  0x29   : > { %2178 = vmatpush.bf16.msra.mxu3 %v2119_v7  ;;  %1022 = vmatpush.bf16.msra.mxu0 %v2119_v7  ;;  %v1600_v7 = vor.u32 %v2051_v2, %v1599_v1  ;;  %v1632_v2 = vor.u32 %v2055_v60, %v1629_v61  ;;  %v2073_v60 = vld [vmem:[%s2252_s5 + $0x110] sm:$0xf0] }
  0x2b   : > { %1043 = vmatmul.bf16.vlgmr.msra.gmra.mxu1 %v1640_v18  ;;  %1063 = vmatmul.bf16.vlgmr.msra.gmra.mxu2 %v1720_v19  ;;  %v1860_v18 = vor.u32 %v2116_v13, %v1859_v12  ;;  %v1620_v19 = vor.u32 %v2056_v15, %v1619_v14  ;;  %v2063_v12 = vld [vmem:[%s2252_s5 + $0xc0] sm:$0xf0] }
  0x2c   : > { %1193 = vmatpush.bf16.msrb.mxu2 %v2142_v16  ;;  %1083 = vmatmul.bf16.vlgmr.msra.gmra.mxu3 %v1800_v20  ;;  %v1700_v16 = vor.u32 %v2076_v9, %v1699_v8  ;;  %v2039_v20 = vld [vmem:[%s2252_s5 + $0x4] sm:$0xf]  ;;  %v2062_v8 = vld [vmem:[%s2252_s5 + $0xb8] sm:$0xf0]  ;;  %v2060_v9 = vld [vmem:[%s2252_s5 + $0xac] sm:$0xf] }
  0x2d   : > { %1282 = vmatpush.bf16.msrb.mxu3 %v2150_v17  ;;  %1023 = vmatmul.bf16.vlgmr.msra.gmra.mxu0 %v1560_v21  ;;  %v1780_v17 = vor.u32 %v2096_v11, %v1779_v10  ;;  %v1561_v21 = vld [vmem:[%s2252_s5 + $0x14] sm:$0xf0]  ;;  %v1649_v10 = vld [vmem:[%s2252_s5 + $0xbc] sm:$0xf0]  ;;  %v1655_v11 = vld [vmem:[%s2252_s5 + $0xb0] sm:$0xf] }
  0x2e   : > { %1104 = vmatpush.bf16.msrb.mxu1 %v2134_v22  ;;  %1375 = vmatpush.bf16.msrb.mxu0 %v2154_v23  ;;  %v1567_v22 = vld [vmem:[%s2252_s5 + $0x8] sm:$0xf]  ;;  %v2042_v23 = vld [vmem:[%s2252_s5 + $0x18] sm:$0xf0] }
  0x30   : > { %1194 = vmatpush.bf16.msrb.mxu2 %v2141_v24  ;;  %v2040_v24 = vld [vmem:[%s2252_s5 + $0xc] sm:$0xf] }
  0x31   : > { %1283 = vmatpush.bf16.msrb.mxu3 %v2149_v25  ;;  %v1569_v25 = vld [vmem:[%s2252_s5 + $0x1c] sm:$0xf0] }
  0x32   : > { %1105 = vmatpush.bf16.msrb.mxu1 %v2133_v26  ;;  %1376 = vmatpush.bf16.msrb.mxu0 %v2153_v27  ;;  %v1575_v26 = vld [vmem:[%s2252_s5 + $0x10] sm:$0xf]  ;;  %v2043_v27 = vld [vmem:[%s2252_s5 + $0x20] sm:$0xf0] }
  0x34   : > { %1195 = vmatpush.bf16.msrb.mxu2 %v2140_v28  ;;  %v1564_v28 = vor.u32 %v2039_v20, %v1561_v21 }
  0x35   : > { %1284 = vmatpush.bf16.msrb.mxu3 %v2148_v29  ;;  %v1568_v29 = vor.u32 %v2042_v23, %v1567_v22 }
  0x36   : > { %1106 = vmatpush.bf16.msrb.mxu1 %v2132_v30  ;;  %1377 = vmatpush.bf16.msrb.mxu0 %v2152_v31  ;;  %v1572_v30 = vor.u32 %v2040_v24, %v1569_v25  ;;  %v1576_v31 = vor.u32 %v2043_v27, %v1575_v26  ;;  %v2064_v27 = vld [vmem:[%s2252_s5 + $0xcc] sm:$0xf] }
  0x38   : > { %1196 = vmatpush.bf16.msrb.mxu2 %v2139_v32  ;;  %v2044_v32 = vld [vmem:[%s2252_s5 + $0x2c] sm:$0xf] }
  0x39   : > { %1285 = vmatpush.bf16.msrb.mxu3 %v2147_v33  ;;  %v1581_v33 = vld [vmem:[%s2252_s5 + $0x3c] sm:$0xf0] }
  0x3a   : > { %1107 = vmatpush.bf16.msrb.mxu1 %v2131_v42  ;;  %1378 = vmatpush.bf16.msrb.mxu0 %v2151_v53  ;;  %v1584_v40 = vor.u32 %v2044_v32, %v1581_v33  ;;  %v1592_v42 = vor.u32 %v2045_v36, %v1589_v37  ;;  %v1669_v32 = vld [vmem:[%s2252_s5 + $0xe4] sm:$0xf0]  ;;  %v1675_v33 = vld [vmem:[%s2252_s5 + $0xd8] sm:$0xf] }
  0x3b   : > { %1048 = vmatmul.bf16.gmra.mxu1 %v1660_v45  ;;  %1068 = vmatmul.bf16.gmra.mxu2 %v1740_v46  ;;  %v1601_v45 = vld [vmem:[%s2252_s5 + $0x64] sm:$0xf0]  ;;  %v1607_v46 = vld [vmem:[%s2252_s5 + $0x58] sm:$0xf] }
  0x3c   : > { %1197 = vmatpush.bf16.msrb.mxu2 %v2138_v43  ;;  %1088 = vmatmul.bf16.gmra.mxu3 %v1820_v47  ;;  %v1596_v43 = vor.u32 %v2048_v39, %v1595_v38  ;;  %v2052_v47 = vld [vmem:[%s2252_s5 + $0x68] sm:$0xf0] }
  0x3d   : > { %1286 = vmatpush.bf16.msrb.mxu3 %v2146_v44  ;;  %1028 = vmatmul.bf16.gmra.mxu0 %v1580_v48  ;;  %v2049_v44 = vld [vmem:[%s2252_s5 + $0x54] sm:$0xf]  ;;  %v2050_v48 = vld [vmem:[%s2252_s5 + $0x5c] sm:$0xf]  ;;  %v1608_v53 = vor.u32 %v2052_v47, %v1607_v46 }
  0x3e   : > { %1108 = vmatpush.bf16.msrb.mxu1 %v2130_v49  ;;  %v1609_v49 = vld [vmem:[%s2252_s5 + $0x6c] sm:$0xf0] }
  0x40   : > { %1198 = vmatpush.bf16.msrb.mxu2 %v2137_v50  ;;  %v1615_v50 = vld [vmem:[%s2252_s5 + $0x60] sm:$0xf] }
  0x41   : > { %1287 = vmatpush.bf16.msrb.mxu3 %v2145_v51  ;;  %v2053_v51 = vld [vmem:[%s2252_s5 + $0x70] sm:$0xf0] }
  0x42   : > { %1109 = vmatpush.bf16.msrb.mxu1 %v2129_v52  ;;  %v1604_v52 = vor.u32 %v2049_v44, %v1601_v45 }
  0x44   : > { %1199 = vmatpush.bf16.msrb.mxu2 %v2136_v54  ;;  %v1612_v54 = vor.u32 %v2050_v48, %v1609_v49 }
  0x45   : > { %1288 = vmatpush.bf16.msrb.mxu3 %v2144_v55  ;;  %v1616_v55 = vor.u32 %v2053_v51, %v1615_v50 }
  0x46   : > { %1110 = vmatpush.bf16.msrb.mxu1 %v2128_v56  ;;  %v2054_v56 = vld [vmem:[%s2252_s5 + $0x7c] sm:$0xf] }
  0x48   : > { %1200 = vmatpush.bf16.msrb.mxu2 %v2135_v57  ;;  %v1621_v57 = vld [vmem:[%s2252_s5 + $0x8c] sm:$0xf0] }
  0x49   : > { %1289 = vmatpush.bf16.msrb.mxu3 %v2143_v58  ;;  %v1627_v58 = vld [vmem:[%s2252_s5 + $0x80] sm:$0xf]  ;;  %v1624_v0 = vor.u32 %v2054_v56, %v1621_v57  ;;  %v2072_v56 = vld [vmem:[%s2252_s5 + $0x108] sm:$0xf0]  ;;  %v2070_v57 = vld [vmem:[%s2252_s5 + $0xfc] sm:$0xf] }
  0x4a   : > { %1111 = vmatpush.bf16.msrb.mxu1 %v2127_v3  ;;  %v1628_v1 = vor.u32 %v2057_v59, %v1627_v58  ;;  %v1636_v3 = vor.u32 %v2058_v63, %v1635_v62  ;;  %v1689_v58 = vld [vmem:[%s2252_s5 + $0x10c] sm:$0xf0]  ;;  %v1695_v59 = vld [vmem:[%s2252_s5 + $0x100] sm:$0xf] }
  0x4b   : > { %1053 = vmatmul.bf16.gmra.mxu1 %v1680_v4  ;;  %1073 = vmatmul.bf16.gmra.mxu2 %v1760_v5  ;;  %v2412_v4 = vld [vmem:[%s2693_s2] ss:$0 sm:$0xff]  ;;  %v2059_v5 = vld [vmem:[%s2252_s5 + $0xa4] sm:$0xf] }
  0x4c   : > { %1093 = vmatmul.bf16.gmra.mxu3 %v1840_v6  ;;  %v1641_v6 = vld [vmem:[%s2252_s5 + $0xb4] sm:$0xf0] }
  0x4d   : > { %1033 = vmatmul.bf16.gmra.mxu0 %v1600_v7  ;;  %v1647_v7 = vld [vmem:[%s2252_s5 + $0xa8] sm:$0xf]  ;;  %v1644_v13 = vor.u32 %v2059_v5, %v1641_v6  ;;  %v1692_v5 = vor.u32 %v2070_v57, %v1689_v58  ;;  %v1696_v6 = vor.u32 %v2073_v60, %v1695_v59  ;;  %v1721_v57 = vld [vmem:[%s2252_s5 + $0x154] sm:$0xf0]  ;;  %v2082_v59 = vld [vmem:[%s2252_s5 + $0x158] sm:$0xf0] }
  0x4e   : > { %v1648_v14 = vor.u32 %v2062_v8, %v1647_v7  ;;  %v1727_v58 = vld [vmem:[%s2252_s5 + $0x148] sm:$0xf]  ;;  %v2080_v60 = vld [vmem:[%s2252_s5 + $0x14c] sm:$0xf] }
  0x5b   : > { %1058 = vmatmul.bf16.gmra.mxu1 %v1700_v16  ;;  %1078 = vmatmul.bf16.gmra.mxu2 %v1780_v17  ;;  %v1652_v16 = vor.u32 %v2060_v9, %v1649_v10  ;;  %v1656_v17 = vor.u32 %v2063_v12, %v1655_v11 }
  0x5c   : > { %1098 = vmatmul.bf16.gmra.mxu3 %v1860_v18 }
  0x5d   : > { %1038 = vmatmul.bf16.gmra.mxu0 %v1620_v19 }
  0x6b   : > { %1112 = vmatmul.bf16.vlgmr.msrb.gmra.mxu1 %v1564_v28  ;;  %1201 = vmatmul.bf16.vlgmr.msrb.gmra.mxu2 %v1568_v29  ;;  %v1661_v28 = vld [vmem:[%s2252_s5 + $0xdc] sm:$0xf0]  ;;  %v1667_v29 = vld [vmem:[%s2252_s5 + $0xd0] sm:$0xf] }
  0x6c   : > { %1290 = vmatmul.bf16.vlgmr.msrb.gmra.mxu3 %v1572_v30  ;;  %v2067_v30 = vld [vmem:[%s2252_s5 + $0xe0] sm:$0xf0]  ;;  %v1664_v38 = vor.u32 %v2064_v27, %v1661_v28  ;;  %v1709_v27 = vld [vmem:[%s2252_s5 + $0x134] sm:$0xf0]  ;;  %v1715_v28 = vld [vmem:[%s2252_s5 + $0x128] sm:$0xf] }
  0x6d   : > { %2021 = vmatmul.msk.bf16.vlgmr.msrb.gmra.mxu0 %vm966_vm0, %v1576_v31  ;;  %v2065_v31 = vld [vmem:[%s2252_s5 + $0xd4] sm:$0xf]  ;;  %v1668_v39 = vor.u32 %v2067_v30, %v1667_v29  ;;  %v2078_v29 = vld [vmem:[%s2252_s5 + $0x138] sm:$0xf0] }
  0x7b   : > { %1117 = vmatmul.bf16.gmra.mxu1 %v1584_v40  ;;  %1206 = vmatmul.bf16.gmra.mxu2 %v1588_v41 }
  0x7c   : > { %1295 = vmatmul.bf16.gmra.mxu3 %v1592_v42  ;;  %v1672_v42 = vor.u32 %v2065_v31, %v1669_v32 }
  0x7d   : > { %2022 = vmatmul.msk.bf16.gmra.mxu0 %vm966_vm0, %v1596_v43  ;;  %v1676_v43 = vor.u32 %v2068_v34, %v1675_v33 }
  0x8b   : > { %1122 = vmatmul.bf16.gmra.mxu1 %v1604_v52  ;;  %1211 = vmatmul.bf16.gmra.mxu2 %v1608_v53  ;;  %v2069_v53 = vld [vmem:[%s2252_s5 + $0xf4] sm:$0xf] }
  0x8c   : > { %1300 = vmatmul.bf16.gmra.mxu3 %v1612_v54  ;;  %v1681_v54 = vld [vmem:[%s2252_s5 + $0x104] sm:$0xf0] }
  0x8d   : > { %2023 = vmatmul.msk.bf16.gmra.mxu0 %vm966_vm0, %v1616_v55  ;;  %v1687_v55 = vld [vmem:[%s2252_s5 + $0xf8] sm:$0xf] }
  0x9b   : > { %1127 = vmatmul.bf16.gmra.mxu1 %v1624_v0  ;;  %1216 = vmatmul.bf16.gmra.mxu2 %v1628_v1  ;;  %v1684_v0 = vor.u32 %v2069_v53, %v1681_v54  ;;  %v1688_v1 = vor.u32 %v2072_v56, %v1687_v55  ;;  %v2079_v56 = vld [vmem:[%s2252_s5 + $0x144] sm:$0xf] }
  0x9c   : > { %1305 = vmatmul.bf16.gmra.mxu3 %v1632_v2 }
  0x9d   : > { %2024 = vmatmul.msk.bf16.gmra.mxu0 %vm966_vm0, %v1636_v3 }
  0xa8   : > { %v1044_v15 = vpop.f32.mrf.mxu1 }
  0xa9   : > { %v2423_v18 = vadd.f32 %v2412_v4, %v1044_v15 }
  0xaa   : > { %v2425_v19 = vpop.f32.mrf.mxu0 }
  0xab   : > { %1132 = vmatmul.bf16.gmra.mxu1 %v1644_v13  ;;  %1221 = vmatmul.bf16.gmra.mxu2 %v1648_v14 }
  0xac   : > { %1310 = vmatmul.bf16.gmra.mxu3 %v1652_v16  ;;  %v2074_v16 = vld [vmem:[%s2252_s5 + $0x11c] sm:$0xf] }
  0xad   : > { %2025 = vmatmul.msk.bf16.gmra.mxu0 %vm966_vm0, %v1656_v17  ;;  %v1701_v17 = vld [vmem:[%s2252_s5 + $0x12c] sm:$0xf0] }
  0xae   : > { %v1064_v20 = vpop.f32.mrf.mxu2  ;;  %v1704_v33 = vor.u32 %v2074_v16, %v1701_v17 }
  0xaf   : > { %v2429_v21 = vadd.f32 %v2412_v4, %v1064_v20  ;;  %v1084_v22 = vpop.f32.mrf.mxu3  ;;  %v1707_v20 = vld [vmem:[%s2252_s5 + $0x120] sm:$0xf] }
  0xb0   : > { %v2432_v23 = vadd.f32 %v2412_v4, %v1084_v22  ;;  %v1046_v24 = vpop.f32.mrf.mxu1  ;;  %v2077_v22 = vld [vmem:[%s2252_s5 + $0x130] sm:$0xf0] }
  0xb1   : > { %v2435_v25 = vadd.f32 %v2412_v4, %v1046_v24  ;;  %v2075_v24 = vld [vmem:[%s2252_s5 + $0x124] sm:$0xf]  ;;  %v1708_v34 = vor.u32 %v2077_v22, %v1707_v20  ;;  %v1025_v22 = vadd.f32 %v2412_v4, %v2425_v19 }
  0xb2   : > { %v2437_v26 = vpop.f32.mrf.mxu0 }
  0xb6   : > { %v1066_v35 = vpop.f32.mrf.mxu2 }
  0xb7   : > { %v2448_v36 = vadd.f32 %v2412_v4, %v1066_v35  ;;  %v1086_v37 = vpop.f32.mrf.mxu3 }
  0xb8   : > { %v2451_v40 = vadd.f32 %v2412_v4, %v1086_v37  ;;  %v1049_v41 = vpop.f32.mrf.mxu1 }
  0xb9   : > { %v2454_v44 = vadd.f32 %v2412_v4, %v1049_v41 }
  0xba   : > { %v2456_v45 = vpop.f32.mrf.mxu0 }
  0xbb   : > { %1137 = vmatmul.bf16.gmra.mxu1 %v1664_v38  ;;  %1226 = vmatmul.bf16.gmra.mxu2 %v1668_v39  ;;  %v1712_v38 = vor.u32 %v2075_v24, %v1709_v27  ;;  %v1716_v39 = vor.u32 %v2078_v29, %v1715_v28 }
  0xbc   : > { %1315 = vmatmul.bf16.gmra.mxu3 %v1672_v42 }
  0xbd   : > { %2026 = vmatmul.msk.bf16.gmra.mxu0 %vm966_vm0, %v1676_v43 }
  0xbe   : > { %v1069_v46 = vpop.f32.mrf.mxu2 }
  0xbf   : > { %v2460_v47 = vadd.f32 %v2412_v4, %v1069_v46  ;;  %v1089_v48 = vpop.f32.mrf.mxu3 }
  0xc0   : > { %v2463_v49 = vadd.f32 %v2412_v4, %v1089_v48  ;;  %v1051_v50 = vpop.f32.mrf.mxu1 }
  0xc1   : > { %v2466_v51 = vadd.f32 %v2412_v4, %v1051_v50 }
  0xc2   : > { %v2468_v52 = vpop.f32.mrf.mxu0 }
  0xc6   : > { %v1071_v61 = vpop.f32.mrf.mxu2 }
  0xc7   : > { %v2479_v62 = vadd.f32 %v2412_v4, %v1071_v61  ;;  %v1091_v63 = vpop.f32.mrf.mxu3  ;;  %v1729_v61 = vld [vmem:[%s2252_s5 + $0x15c] sm:$0xf0] }
  0xc8   : > { %v2482_v2 = vadd.f32 %v2412_v4, %v1091_v63  ;;  %v1054_v3 = vpop.f32.mrf.mxu1  ;;  %v1735_v63 = vld [vmem:[%s2252_s5 + $0x150] sm:$0xf]  ;;  %v1732_v16 = vor.u32 %v2080_v60, %v1729_v61 }
  0xc9   : > { %v2485_v7 = vadd.f32 %v2412_v4, %v1054_v3 }
  0xca   : > { %v2487_v8 = vpop.f32.mrf.mxu0 }
  0xcb   : > { %1142 = vmatmul.bf16.gmra.mxu1 %v1684_v0  ;;  %1231 = vmatmul.bf16.gmra.mxu2 %v1688_v1  ;;  %v2083_v0 = vld [vmem:[%s2252_s5 + $0x160] sm:$0xf0] }
  0xcc   : > { %1320 = vmatmul.bf16.gmra.mxu3 %v1692_v5  ;;  %v1736_v17 = vor.u32 %v2083_v0, %v1735_v63 }
  0xcd   : > { %2027 = vmatmul.msk.bf16.gmra.mxu0 %vm966_vm0, %v1696_v6  ;;  %v1724_v6 = vor.u32 %v2079_v56, %v1721_v57  ;;  %v1749_v56 = vld [vmem:[%s2252_s5 + $0x184] sm:$0xf0]  ;;  %v1755_v57 = vld [vmem:[%s2252_s5 + $0x178] sm:$0xf] }
  0xce   : > { %v1074_v9 = vpop.f32.mrf.mxu2 }
  0xcf   : > { %v2491_v10 = vadd.f32 %v2412_v4, %v1074_v9  ;;  %v1094_v11 = vpop.f32.mrf.mxu3  ;;  %v1728_v9 = vor.u32 %v2082_v59, %v1727_v58  ;;  %v2088_v58 = vld [vmem:[%s2252_s5 + $0x188] sm:$0xf0] }
  0xd0   : > { %v2494_v12 = vadd.f32 %v2412_v4, %v1094_v11  ;;  %v1056_v13 = vpop.f32.mrf.mxu1 }
  0xd1   : > { %v2497_v14 = vadd.f32 %v2412_v4, %v1056_v13 }
  0xd2   : > { %v2499_v15 = vpop.f32.mrf.mxu0 }
  0xd6   : > { %v1076_v30 = vpop.f32.mrf.mxu2 }
  0xd7   : > { %v2510_v31 = vadd.f32 %v2412_v4, %v1076_v30  ;;  %v1096_v32 = vpop.f32.mrf.mxu3 }
  0xd8   : > { %v2513_v35 = vadd.f32 %v2412_v4, %v1096_v32  ;;  %v1059_v37 = vpop.f32.mrf.mxu1 }
  0xd9   : > { %v2516_v41 = vadd.f32 %v2412_v4, %v1059_v37  ;;  %v2084_v37 = vld [vmem:[%s2252_s5 + $0x16c] sm:$0xf] }
  0xda   : > { %v2518_v42 = vpop.f32.mrf.mxu0 }
  0xdb   : > { %1147 = vmatmul.bf16.gmra.mxu1 %v1704_v33  ;;  %1236 = vmatmul.bf16.gmra.mxu2 %v1708_v34  ;;  %v1027_v33 = vadd.f32 %v2412_v4, %v2437_v26  ;;  %v1756_v26 = vor.u32 %v2088_v58, %v1755_v57 }
  0xdc   : > { %1325 = vmatmul.bf16.gmra.mxu3 %v1712_v38  ;;  %v1741_v38 = vld [vmem:[%s2252_s5 + $0x17c] sm:$0xf0] }
  0xdd   : > { %2028 = vmatmul.msk.bf16.gmra.mxu0 %vm966_vm0, %v1716_v39  ;;  %v1747_v39 = vld [vmem:[%s2252_s5 + $0x170] sm:$0xf]  ;;  %v1744_v63 = vor.u32 %v2084_v37, %v1741_v38  ;;  %v2090_v37 = vld [vmem:[%s2252_s5 + $0x19c] sm:$0xf] }
  0xde   : > { %v1079_v43 = vpop.f32.mrf.mxu2  ;;  %v1769_v38 = vld [vmem:[%s2252_s5 + $0x1ac] sm:$0xf0] }
  0xdf   : > { %v2522_v46 = vadd.f32 %v2412_v4, %v1079_v43  ;;  %v1099_v48 = vpop.f32.mrf.mxu3  ;;  %v2087_v43 = vld [vmem:[%s2252_s5 + $0x180] sm:$0xf0] }
  0xe0   : > { %v2525_v50 = vadd.f32 %v2412_v4, %v1099_v48  ;;  %v1061_v53 = vpop.f32.mrf.mxu1  ;;  %v2085_v48 = vld [vmem:[%s2252_s5 + $0x174] sm:$0xf]  ;;  %v1748_v0 = vor.u32 %v2087_v43, %v1747_v39  ;;  %v1775_v43 = vld [vmem:[%s2252_s5 + $0x1a0] sm:$0xf] }
  0xe1   : > { %v2528_v54 = vadd.f32 %v2412_v4, %v1061_v53 }
  0xe2   : > { %v2530_v55 = vpop.f32.mrf.mxu0 }
  0xe6   : > { %v1081_v1 = vpop.f32.mrf.mxu2 }
  0xe7   : > { %v2541_v3 = vadd.f32 %v2412_v4, %v1081_v1  ;;  %v1101_v5 = vpop.f32.mrf.mxu3 }
  0xe8   : > { %v2544_v11 = vadd.f32 %v2412_v4, %v1101_v5  ;;  %v1113_v13 = vpop.f32.mrf.mxu1  ;;  %v1752_v5 = vor.u32 %v2085_v48, %v1749_v56  ;;  %v2093_v48 = vld [vmem:[%s2252_s5 + $0x1b0] sm:$0xf0] }
  0xe9   : > { %v1114_v24 = vadd.f32 %v1113_v13, %v1025_v22  ;;  %v1030_v13 = vadd.f32 %v2412_v4, %v2456_v45 }
  0xea   : > { %v1380_v20 = vpop.f32.mrf.mxu0 }
  0xeb   : > { %1152 = vmatmul.bf16.gmra.mxu1 %v1724_v6  ;;  %1241 = vmatmul.bf16.gmra.mxu2 %v1728_v9 }
  0xec   : > { %1330 = vmatmul.bf16.gmra.mxu3 %v1732_v16 }
  0xed   : > { %2029 = vmatmul.msk.bf16.gmra.mxu0 %vm966_vm0, %v1736_v17 }
  0xee   : > { %v1202_v27 = vpop.f32.mrf.mxu2 }
  0xef   : > { %v1203_v28 = vadd.f32 %v1202_v27, %v1114_v24  ;;  %v1291_v29 = vpop.f32.mrf.mxu3 }
  0xf0   : > { %v1115_v30 = vpop.f32.mrf.mxu1 }
  0xf1   : > { %v1292_v19 = vadd.f32 %v1291_v29, %v1203_v28  ;;  %v1116_v53 = vadd.f32 %v1115_v30, %v1027_v33  ;;  %v1032_v29 = vadd.f32 %v2412_v4, %v2468_v52  ;;  %v1767_v33 = vld [vmem:[%s2252_s5 + $0x198] sm:$0xf]  ;;  %v1776_v52 = vor.u32 %v2093_v48, %v1775_v43 }
  0xf2   : > { %v1382_v32 = vpop.f32.mrf.mxu0 }
  0xf3   : > { %v1381_v34 = vadd.f32 %v1380_v20, %v1292_v19  ;;  %v2089_v19 = vld [vmem:[%s2252_s5 + $0x194] sm:$0xf] }
  0xf5   : > { %1460 = vst [vmem:[%s2553_s23] sm:$0xff] %v1381_v34  ;;  %v2092_v34 = vld [vmem:[%s2252_s5 + $0x1a8] sm:$0xf0] }
  0xf6   : > { %v1204_v59 = vpop.f32.mrf.mxu2 }
  0xf7   : > { %v1205_v60 = vadd.f32 %v1204_v59, %v1116_v53  ;;  %v1293_v61 = vpop.f32.mrf.mxu3  ;;  %v1768_v59 = vor.u32 %v2092_v34, %v1767_v33  ;;  %v2098_v33 = vld [vmem:[%s2252_s5 + $0x1d8] sm:$0xf0] }
  0xf8   : > { %v1118_v1 = vpop.f32.mrf.mxu1 }
  0xf9   : > { %v1294_v6 = vadd.f32 %v1293_v61, %v1205_v60  ;;  %v1119_v17 = vadd.f32 %v1118_v1, %v1030_v13  ;;  %v1772_v61 = vor.u32 %v2090_v37, %v1769_v38  ;;  %v1035_v1 = vadd.f32 %v2412_v4, %v2487_v8 }
  0xfa   : > { %v1385_v9 = vpop.f32.mrf.mxu0 }
  0xfb   : > { %v1383_v16 = vadd.f32 %v1382_v32, %v1294_v6  ;;  %1157 = vmatmul.bf16.gmra.mxu1 %v1744_v63  ;;  %1246 = vmatmul.bf16.gmra.mxu2 %v1748_v0  ;;  %v1761_v32 = vld [vmem:[%s2252_s5 + $0x1a4] sm:$0xf0] }
  0xfc   : > { %1335 = vmatmul.bf16.gmra.mxu3 %v1752_v5  ;;  %v1764_v58 = vor.u32 %v2089_v19, %v1761_v32  ;;  %v1795_v32 = vld [vmem:[%s2252_s5 + $0x1c8] sm:$0xf] }
  0xfd   : > { %2030 = vmatmul.msk.bf16.gmra.mxu0 %vm966_vm0, %v1756_v26  ;;  %1461 = vst [vmem:[%s2553_s23 + $0x8] sm:$0xff] %v1383_v16 }
  0xfe   : > { %v1207_v20 = vpop.f32.mrf.mxu2 }
  0xff   : > { %v1208_v22 = vadd.f32 %v1207_v20, %v1119_v17  ;;  %v1296_v45 = vpop.f32.mrf.mxu3  ;;  %v1037_v20 = vadd.f32 %v2412_v4, %v2499_v15  ;;  %v1796_v15 = vor.u32 %v2098_v33, %v1795_v32 }
 0x100   : > { %v1120_v24 = vpop.f32.mrf.mxu1 }
 0x101   : > { %v1297_v27 = vadd.f32 %v1296_v45, %v1208_v22  ;;  %v1121_v39 = vadd.f32 %v1120_v24, %v1032_v29  ;;  %v2094_v45 = vld [vmem:[%s2252_s5 + $0x1bc] sm:$0xf]  ;;  %v1781_v24 = vld [vmem:[%s2252_s5 + $0x1cc] sm:$0xf0]  ;;  %v2095_v29 = vld [vmem:[%s2252_s5 + $0x1c4] sm:$0xf] }
 0x102   : > { %v1387_v28 = vpop.f32.mrf.mxu0 }
 0x103   : > { %v1386_v30 = vadd.f32 %v1385_v9, %v1297_v27  ;;  %v1787_v27 = vld [vmem:[%s2252_s5 + $0x1c0] sm:$0xf] }
 0x105   : > { %1462 = vst [vmem:[%s2553_s23 + $0x10] sm:$0xff] %v1386_v30  ;;  %v1789_v30 = vld [vmem:[%s2252_s5 + $0x1d4] sm:$0xf0] }
 0x106   : > { %v1209_v53 = vpop.f32.mrf.mxu2 }
 0x107   : > { %v1210_v56 = vadd.f32 %v1209_v53, %v1121_v39  ;;  %v1298_v57 = vpop.f32.mrf.mxu3  ;;  %v1784_v39 = vor.u32 %v2094_v45, %v1781_v24  ;;  %v1792_v53 = vor.u32 %v2095_v29, %v1789_v30  ;;  %v2103_v45 = vld [vmem:[%s2252_s5 + $0x200] sm:$0xf0] }
 0x108   : > { %v1123_v60 = vpop.f32.mrf.mxu1 }
 0x109   : > { %v1299_v63 = vadd.f32 %v1298_v57, %v1210_v56  ;;  %v1124_v26 = vadd.f32 %v1123_v60, %v1035_v1 }
 0x10a   : > { %v1390_v0 = vpop.f32.mrf.mxu0 }
 0x10b   : > { %v1388_v5 = vadd.f32 %v1387_v28, %v1299_v63  ;;  %1162 = vmatmul.bf16.gmra.mxu1 %v1764_v58  ;;  %1251 = vmatmul.bf16.gmra.mxu2 %v1768_v59  ;;  %v2097_v28 = vld [vmem:[%s2252_s5 + $0x1d0] sm:$0xf0]  ;;  %v1040_v58 = vadd.f32 %v2412_v4, %v2518_v42 }
 0x10c   : > { %1340 = vmatmul.bf16.gmra.mxu3 %v1772_v61  ;;  %v1788_v43 = vor.u32 %v2097_v28, %v1787_v27 }
 0x10d   : > { %2031 = vmatmul.msk.bf16.gmra.mxu0 %vm966_vm0, %v1776_v52  ;;  %1463 = vst [vmem:[%s2553_s23 + $0x18] sm:$0xff] %v1388_v5  ;;  %v1042_v5 = vadd.f32 %v2412_v4, %v2530_v55 }
 0x10e   : > { %v1212_v6 = vpop.f32.mrf.mxu2 }
 0x10f   : > { %v1213_v9 = vadd.f32 %v1212_v6, %v1124_v26  ;;  %v1301_v8 = vpop.f32.mrf.mxu3  ;;  %v2099_v6 = vld [vmem:[%s2252_s5 + $0x1e4] sm:$0xf] }
 0x110   : > { %v1125_v13 = vpop.f32.mrf.mxu1 }
 0x111   : > { %v1302_v16 = vadd.f32 %v1301_v8, %v1213_v9  ;;  %v1126_v19 = vadd.f32 %v1125_v13, %v1037_v20  ;;  %v1801_v9 = vld [vmem:[%s2252_s5 + $0x1f4] sm:$0xf0]  ;;  %v1807_v8 = vld [vmem:[%s2252_s5 + $0x1e8] sm:$0xf]  ;;  %v2102_v13 = vld [vmem:[%s2252_s5 + $0x1f8] sm:$0xf0] }
 0x112   : > { %v1392_v17 = vpop.f32.mrf.mxu0  ;;  %v1804_v29 = vor.u32 %v2099_v6, %v1801_v9  ;;  %v1808_v30 = vor.u32 %v2102_v13, %v1807_v8 }
 0x113   : > { %v1391_v22 = vadd.f32 %v1390_v0, %v1302_v16  ;;  %v2100_v16 = vld [vmem:[%s2252_s5 + $0x1ec] sm:$0xf] }
 0x115   : > { %1464 = vst [vmem:[%s2553_s23 + $0x20] sm:$0xff] %v1391_v22  ;;  %v1815_v22 = vld [vmem:[%s2252_s5 + $0x1f0] sm:$0xf] }
 0x116   : > { %v1214_v34 = vpop.f32.mrf.mxu2  ;;  %v1816_v4 = vor.u32 %v2103_v45, %v1815_v22 }
 0x117   : > { %v1215_v37 = vadd.f32 %v1214_v34, %v1126_v19  ;;  %v1303_v38 = vpop.f32.mrf.mxu3 }
 0x118   : > { %v1128_v48 = vpop.f32.mrf.mxu1 }
 0x119   : > { %v1304_v56 = vadd.f32 %v1303_v38, %v1215_v37  ;;  %v1129_v60 = vadd.f32 %v1128_v48, %v1040_v58  ;;  %v1821_v58 = vld [vmem:[%s2252_s5 + $0x21c] sm:$0xf0] }
 0x11a   : > { %v1395_v57 = vpop.f32.mrf.mxu0 }
 0x11b   : > { %v1393_v59 = vadd.f32 %v1392_v17, %v1304_v56  ;;  %1167 = vmatmul.bf16.gmra.mxu1 %v1784_v39  ;;  %1256 = vmatmul.bf16.gmra.mxu2 %v1788_v43  ;;  %v1809_v17 = vld [vmem:[%s2252_s5 + $0x1fc] sm:$0xf0] }
 0x11c   : > { %1345 = vmatmul.bf16.gmra.mxu3 %v1792_v53  ;;  %v1812_v32 = vor.u32 %v2100_v16, %v1809_v17 }
 0x11d   : > { %2032 = vmatmul.msk.bf16.gmra.mxu0 %vm966_vm0, %v1796_v15  ;;  %1465 = vst [vmem:[%s2553_s23 + $0x28] sm:$0xff] %v1393_v59  ;;  %v1827_v59 = vld [vmem:[%s2252_s5 + $0x210] sm:$0xf] }
 0x11e   : > { %v1217_v61 = vpop.f32.mrf.mxu2 }
 0x11f   : > { %v1218_v52 = vadd.f32 %v1217_v61, %v1129_v60  ;;  %v1306_v42 = vpop.f32.mrf.mxu3  ;;  %v2107_v60 = vld [vmem:[%s2252_s5 + $0x220] sm:$0xf0]  ;;  %v2105_v61 = vld [vmem:[%s2252_s5 + $0x214] sm:$0xf] }
 0x120   : > { %v1130_v63 = vpop.f32.mrf.mxu1  ;;  %v1828_v6 = vor.u32 %v2107_v60, %v1827_v59 }
 0x121   : > { %v1307_v0 = vadd.f32 %v1306_v42, %v1218_v52  ;;  %v1131_v20 = vadd.f32 %v1130_v63, %v1042_v5  ;;  %v1829_v52 = vld [vmem:[%s2252_s5 + $0x224] sm:$0xf0]  ;;  %v1835_v63 = vld [vmem:[%s2252_s5 + $0x218] sm:$0xf] }
 0x122   : > { %v1397_v1 = vpop.f32.mrf.mxu0  ;;  %v1832_v8 = vor.u32 %v2105_v61, %v1829_v52 }
 0x123   : > { %v1396_v26 = vadd.f32 %v1395_v57, %v1307_v0  ;;  %v2104_v57 = vld [vmem:[%s2252_s5 + $0x20c] sm:$0xf] }
 0x125   : > { %1466 = vst [vmem:[%s2553_s23 + $0x30] sm:$0xff] %v1396_v26  ;;  %v1824_v26 = vor.u32 %v2104_v57, %v1821_v58 }
 0x126   : > { %v1219_v24 = vpop.f32.mrf.mxu2 }
 0x127   : > { %v1220_v27 = vadd.f32 %v1219_v24, %v1131_v20  ;;  %v1308_v28 = vpop.f32.mrf.mxu3 }
 0x128   : > { %v1133_v19 = vpop.f32.mrf.mxu1 }
 0x129   : > { %v1309_v55 = vadd.f32 %v1308_v28, %v1220_v27  ;;  %v1134_v37 = vadd.f32 %v1133_v19, %v2423_v18  ;;  %v2108_v18 = vld [vmem:[%s2252_s5 + $0x228] sm:$0xf0]  ;;  %v2109_v19 = vld [vmem:[%s2252_s5 + $0x234] sm:$0xf] }
 0x12a   : > { %v1400_v33 = vpop.f32.mrf.mxu0  ;;  %v1836_v13 = vor.u32 %v2108_v18, %v1835_v63 }
 0x12b   : > { %v1398_v34 = vadd.f32 %v1397_v1, %v1309_v55  ;;  %1172 = vmatmul.bf16.gmra.mxu1 %v1804_v29  ;;  %1261 = vmatmul.bf16.gmra.mxu2 %v1808_v30  ;;  %v2112_v55 = vld [vmem:[%s2252_s5 + $0x248] sm:$0xf0] }
 0x12c   : > { %1350 = vmatmul.bf16.gmra.mxu3 %v1812_v32  ;;  %v1841_v32 = vld [vmem:[%s2252_s5 + $0x244] sm:$0xf0] }
 0x12d   : > { %2033 = vmatmul.msk.bf16.gmra.mxu0 %vm966_vm0, %v1816_v4  ;;  %1467 = vst [vmem:[%s2553_s23 + $0x38] sm:$0xff] %v1398_v34  ;;  %v1847_v4 = vld [vmem:[%s2252_s5 + $0x238] sm:$0xf]  ;;  %v1849_v34 = vld [vmem:[%s2252_s5 + $0x24c] sm:$0xf0] }
 0x12e   : > { %v1222_v38 = vpop.f32.mrf.mxu2 }
 0x12f   : > { %v1223_v39 = vadd.f32 %v1222_v38, %v1134_v37  ;;  %v1311_v43 = vpop.f32.mrf.mxu3  ;;  %v1855_v38 = vld [vmem:[%s2252_s5 + $0x240] sm:$0xf] }
 0x130   : > { %v1135_v48 = vpop.f32.mrf.mxu1 }
 0x131   : > { %v1312_v53 = vadd.f32 %v1311_v43, %v1223_v39  ;;  %v1136_v42 = vadd.f32 %v1135_v48, %v2435_v25 }
 0x132   : > { %v1402_v15 = vpop.f32.mrf.mxu0 }
 0x133   : > { %v1401_v56 = vadd.f32 %v1400_v33, %v1312_v53  ;;  %v2110_v33 = vld [vmem:[%s2252_s5 + $0x23c] sm:$0xf]  ;;  %v1844_v53 = vor.u32 %v2109_v19, %v1841_v32 }
 0x134   : > { %v1852_v57 = vor.u32 %v2110_v33, %v1849_v34 }
 0x135   : > { %1468 = vst [vmem:[%s2553_s23 + $0x40] sm:$0xff] %v1401_v56 }
 0x136   : > { %v1224_v0 = vpop.f32.mrf.mxu2 }
 0x137   : > { %v1225_v1 = vadd.f32 %v1224_v0, %v1136_v42  ;;  %v1313_v5 = vpop.f32.mrf.mxu3 }
 0x138   : > { %v1138_v9 = vpop.f32.mrf.mxu1 }
 0x139   : > { %v1314_v16 = vadd.f32 %v1313_v5, %v1225_v1  ;;  %v1139_v25 = vadd.f32 %v1138_v9, %v2454_v44  ;;  %v2113_v44 = vld [vmem:[%s2252_s5 + $0x250] sm:$0xf0]  ;;  %v1867_v9 = vld [vmem:[%s2252_s5 + $0x260] sm:$0xf] }
 0x13a   : > { %v1405_v17 = vpop.f32.mrf.mxu0  ;;  %v1856_v58 = vor.u32 %v2113_v44, %v1855_v38 }
 0x13b   : > { %v1403_v20 = vadd.f32 %v1402_v15, %v1314_v16  ;;  %1177 = vmatmul.bf16.gmra.mxu1 %v1824_v26  ;;  %1266 = vmatmul.bf16.gmra.mxu2 %v1828_v6  ;;  %v1848_v15 = vor.u32 %v2112_v55, %v1847_v4  ;;  %v2114_v26 = vld [vmem:[%s2252_s5 + $0x25c] sm:$0xf]  ;;  %v1861_v6 = vld [vmem:[%s2252_s5 + $0x26c] sm:$0xf0]  ;;  %v1869_v16 = vld [vmem:[%s2252_s5 + $0x274] sm:$0xf0] }
 0x13c   : > { %1355 = vmatmul.bf16.gmra.mxu3 %v1832_v8  ;;  %v2117_v8 = vld [vmem:[%s2252_s5 + $0x270] sm:$0xf0] }
 0x13d   : > { %2034 = vmatmul.msk.bf16.gmra.mxu0 %vm966_vm0, %v1836_v13  ;;  %1469 = vst [vmem:[%s2553_s23 + $0x48] sm:$0xff] %v1403_v20  ;;  %v2115_v13 = vld [vmem:[%s2252_s5 + $0x264] sm:$0xf]  ;;  %v1875_v20 = vld [vmem:[%s2252_s5 + $0x268] sm:$0xf] }
 0x13e   : > { %v1227_v22 = vpop.f32.mrf.mxu2 }
 0x13f   : > { %v1228_v45 = vadd.f32 %v1227_v22, %v1139_v25  ;;  %v1316_v24 = vpop.f32.mrf.mxu3 }
 0x140   : > { %v1140_v27 = vpop.f32.mrf.mxu1 }
 0x141   : > { %v1317_v28 = vadd.f32 %v1316_v24, %v1228_v45  ;;  %v1141_v37 = vadd.f32 %v1140_v27, %v2466_v51  ;;  %v1864_v24 = vor.u32 %v2114_v26, %v1861_v6  ;;  %v1868_v27 = vor.u32 %v2117_v8, %v1867_v9 }
 0x142   : > { %v1407_v29 = vpop.f32.mrf.mxu0 }
 0x143   : > { %v1406_v30 = vadd.f32 %v1405_v17, %v1317_v28 }
 0x145   : > { %1470 = vst [vmem:[%s2553_s23 + $0x50] sm:$0xff] %v1406_v30 }
 0x146   : > { %v1229_v39 = vpop.f32.mrf.mxu2 }
 0x147   : > { %v1230_v43 = vadd.f32 %v1229_v39, %v1141_v37  ;;  %v1318_v48 = vpop.f32.mrf.mxu3 }
 0x148   : > { %v1143_v56 = vpop.f32.mrf.mxu1 }
 0x149   : > { %v1319_v59 = vadd.f32 %v1318_v48, %v1230_v43  ;;  %v1144_v51 = vadd.f32 %v1143_v56, %v2485_v7  ;;  %v2118_v7 = vld [vmem:[%s2252_s5 + $0x278] sm:$0xf0] }
 0x14a   : > { %v1410_v60 = vpop.f32.mrf.mxu0  ;;  %v1876_v30 = vor.u32 %v2118_v7, %v1875_v20 }
 0x14b   : > { %v1408_v61 = vadd.f32 %v1407_v29, %v1319_v59  ;;  %1182 = vmatmul.bf16.gmra.mxu1 %v1844_v53  ;;  %1271 = vmatmul.bf16.gmra.mxu2 %v1848_v15  ;;  %v1872_v29 = vor.u32 %v2115_v13, %v1869_v16 }
 0x14c   : > { %1360 = vmatmul.bf16.gmra.mxu3 %v1852_v57 }
 0x14d   : > { %2035 = vmatmul.msk.bf16.gmra.mxu0 %vm966_vm0, %v1856_v58  ;;  %1471 = vst [vmem:[%s2553_s23 + $0x58] sm:$0xff] %v1408_v61 }
 0x14e   : > { %v1232_v52 = vpop.f32.mrf.mxu2 }
 0x14f   : > { %v1233_v42 = vadd.f32 %v1232_v52, %v1144_v51  ;;  %v1321_v63 = vpop.f32.mrf.mxu3 }
 0x150   : > { %v1145_v18 = vpop.f32.mrf.mxu1 }
 0x151   : > { %v1322_v0 = vadd.f32 %v1321_v63, %v1233_v42  ;;  %v1146_v17 = vadd.f32 %v1145_v18, %v2497_v14 }
 0x152   : > { %v1412_v1 = vpop.f32.mrf.mxu0 }
 0x153   : > { %v1411_v5 = vadd.f32 %v1410_v60, %v1322_v0 }
 0x155   : > { %1472 = vst [vmem:[%s2553_s23 + $0x60] sm:$0xff] %v1411_v5 }
 0x156   : > { %v1234_v25 = vpop.f32.mrf.mxu2 }
 0x157   : > { %v1235_v22 = vadd.f32 %v1234_v25, %v1146_v17  ;;  %v1323_v45 = vpop.f32.mrf.mxu3 }
 0x158   : > { %v1148_v28 = vpop.f32.mrf.mxu1 }
 0x159   : > { %v1324_v19 = vadd.f32 %v1323_v45, %v1235_v22  ;;  %v1149_v14 = vadd.f32 %v1148_v28, %v2516_v41 }
 0x15a   : > { %v1415_v32 = vpop.f32.mrf.mxu0 }
 0x15b   : > { %v1413_v4 = vadd.f32 %v1412_v1, %v1324_v19  ;;  %1187 = vmatmul.bf16.gmra.mxu1 %v1864_v24  ;;  %1276 = vmatmul.bf16.gmra.mxu2 %v1868_v27 }
 0x15c   : > { %1365 = vmatmul.bf16.gmra.mxu3 %v1872_v29 }
 0x15d   : > { %2036 = vmatmul.msk.bf16.gmra.mxu0 %vm966_vm0, %v1876_v30  ;;  %1473 = vst [vmem:[%s2553_s23 + $0x68] sm:$0xff] %v1413_v4 }
 0x15e   : > { %v1237_v55 = vpop.f32.mrf.mxu2 }
 0x15f   : > { %v1238_v33 = vadd.f32 %v1237_v55, %v1149_v14  ;;  %v1326_v34 = vpop.f32.mrf.mxu3 }
 0x160   : > { %v1150_v37 = vpop.f32.mrf.mxu1 }
 0x161   : > { %v1327_v38 = vadd.f32 %v1326_v34, %v1238_v33  ;;  %v1151_v43 = vadd.f32 %v1150_v37, %v2528_v54 }
 0x162   : > { %v1417_v44 = vpop.f32.mrf.mxu0 }
 0x163   : > { %v1416_v39 = vadd.f32 %v1415_v32, %v1327_v38 }
 0x165   : > { %1474 = vst [vmem:[%s2553_s23 + $0x70] sm:$0xff] %v1416_v39 }
 0x166   : > { %v1239_v48 = vpop.f32.mrf.mxu2 }
 0x167   : > { %v1240_v53 = vadd.f32 %v1239_v48, %v1151_v43  ;;  %v1328_v15 = vpop.f32.mrf.mxu3 }
 0x168   : > { %v1153_v56 = vpop.f32.mrf.mxu1 }
 0x169   : > { %v1329_v57 = vadd.f32 %v1328_v15, %v1240_v53  ;;  %v1154_v41 = vadd.f32 %v1153_v56, %v2429_v21 }
 0x16a   : > { %v1420_v58 = vpop.f32.mrf.mxu0 }
 0x16b   : > { %v1418_v59 = vadd.f32 %v1417_v44, %v1329_v57 }
 0x16d   : > { %1475 = vst [vmem:[%s2553_s23 + $0x78] sm:$0xff] %v1418_v59 }
 0x16e   : > { %v1242_v60 = vpop.f32.mrf.mxu2 }
 0x16f   : > { %v1243_v61 = vadd.f32 %v1242_v60, %v1154_v41  ;;  %v1331_v51 = vpop.f32.mrf.mxu3 }
 0x170   : > { %v1155_v52 = vpop.f32.mrf.mxu1 }
 0x171   : > { %v1332_v42 = vadd.f32 %v1331_v51, %v1243_v61  ;;  %v1156_v54 = vadd.f32 %v1155_v52, %v2448_v36 }
 0x172   : > { %v1422_v63 = vpop.f32.mrf.mxu0 }
 0x173   : > { %v1421_v18 = vadd.f32 %v1420_v58, %v1332_v42 }
 0x175   : > { %1476 = vst [vmem:[%s2553_s23 + $0x80] sm:$0xff] %v1421_v18 }
 0x176   : > { %v1244_v0 = vpop.f32.mrf.mxu2 }
 0x177   : > { %v1245_v1 = vadd.f32 %v1244_v0, %v1156_v54  ;;  %v1333_v5 = vpop.f32.mrf.mxu3 }
 0x178   : > { %v1158_v26 = vpop.f32.mrf.mxu1 }
 0x179   : > { %v1334_v6 = vadd.f32 %v1333_v5, %v1245_v1  ;;  %v1159_v21 = vadd.f32 %v1158_v26, %v2460_v47 }
 0x17a   : > { %v1425_v9 = vpop.f32.mrf.mxu0 }
 0x17b   : > { %v1423_v8 = vadd.f32 %v1422_v63, %v1334_v6 }
 0x17d   : > { %1477 = vst [vmem:[%s2553_s23 + $0x88] sm:$0xff] %v1423_v8 }
 0x17e   : > { %v1247_v13 = vpop.f32.mrf.mxu2 }
 0x17f   : > { %v1248_v16 = vadd.f32 %v1247_v13, %v1159_v21  ;;  %v1336_v17 = vpop.f32.mrf.mxu3 }
 0x180   : > { %v1160_v20 = vpop.f32.mrf.mxu1 }
 0x181   : > { %v1337_v7 = vadd.f32 %v1336_v17, %v1248_v16  ;;  %v1161_v36 = vadd.f32 %v1160_v20, %v2479_v62 }
 0x182   : > { %v1427_v25 = vpop.f32.mrf.mxu0 }
 0x183   : > { %v1426_v22 = vadd.f32 %v1425_v9, %v1337_v7 }
 0x185   : > { %1478 = vst [vmem:[%s2553_s23 + $0x90] sm:$0xff] %v1426_v22 }
 0x186   : > { %v1249_v45 = vpop.f32.mrf.mxu2 }
 0x187   : > { %v1250_v24 = vadd.f32 %v1249_v45, %v1161_v36  ;;  %v1338_v27 = vpop.f32.mrf.mxu3 }
 0x188   : > { %v1163_v28 = vpop.f32.mrf.mxu1 }
 0x189   : > { %v1339_v29 = vadd.f32 %v1338_v27, %v1250_v24  ;;  %v1164_v47 = vadd.f32 %v1163_v28, %v2491_v10 }
 0x18a   : > { %v1430_v30 = vpop.f32.mrf.mxu0 }
 0x18b   : > { %v1428_v19 = vadd.f32 %v1427_v25, %v1339_v29 }
 0x18d   : > { %1479 = vst [vmem:[%s2553_s23 + $0x98] sm:$0xff] %v1428_v19 }
 0x18e   : > { %v1252_v32 = vpop.f32.mrf.mxu2 }
 0x18f   : > { %v1253_v4 = vadd.f32 %v1252_v32, %v1164_v47  ;;  %v1341_v14 = vpop.f32.mrf.mxu3 }
 0x190   : > { %v1165_v55 = vpop.f32.mrf.mxu1 }
 0x191   : > { %v1342_v33 = vadd.f32 %v1341_v14, %v1253_v4  ;;  %v1166_v62 = vadd.f32 %v1165_v55, %v2510_v31 }
 0x192   : > { %v1432_v34 = vpop.f32.mrf.mxu0 }
 0x193   : > { %v1431_v37 = vadd.f32 %v1430_v30, %v1342_v33 }
 0x195   : > { %1480 = vst [vmem:[%s2553_s23 + $0xa0] sm:$0xff] %v1431_v37 }
 0x196   : > { %v1254_v38 = vpop.f32.mrf.mxu2 }
 0x197   : > { %v1255_v44 = vadd.f32 %v1254_v38, %v1166_v62  ;;  %v1343_v39 = vpop.f32.mrf.mxu3 }
 0x198   : > { %v1168_v43 = vpop.f32.mrf.mxu1 }
 0x199   : > { %v1344_v48 = vadd.f32 %v1343_v39, %v1255_v44  ;;  %v1169_v10 = vadd.f32 %v1168_v43, %v2522_v46 }
 0x19a   : > { %v1435_v53 = vpop.f32.mrf.mxu0 }
 0x19b   : > { %v1433_v15 = vadd.f32 %v1432_v34, %v1344_v48 }
 0x19d   : > { %1481 = vst [vmem:[%s2553_s23 + $0xa8] sm:$0xff] %v1433_v15 }
 0x19e   : > { %v1257_v56 = vpop.f32.mrf.mxu2 }
 0x19f   : > { %v1258_v57 = vadd.f32 %v1257_v56, %v1169_v10  ;;  %v1346_v58 = vpop.f32.mrf.mxu3 }
 0x1a0   : > { %v1170_v59 = vpop.f32.mrf.mxu1 }
 0x1a1   : > { %v1347_v41 = vadd.f32 %v1346_v58, %v1258_v57  ;;  %v1171_v31 = vadd.f32 %v1170_v59, %v2541_v3 }
 0x1a2   : > { %v1437_v60 = vpop.f32.mrf.mxu0 }
 0x1a3   : > { %v1436_v61 = vadd.f32 %v1435_v53, %v1347_v41 }
 0x1a5   : > { %1482 = vst [vmem:[%s2553_s23 + $0xb0] sm:$0xff] %v1436_v61 }
 0x1a6   : > { %v1259_v51 = vpop.f32.mrf.mxu2 }
 0x1a7   : > { %v1260_v52 = vadd.f32 %v1259_v51, %v1171_v31  ;;  %v1348_v42 = vpop.f32.mrf.mxu3 }
 0x1a8   : > { %v1173_v63 = vpop.f32.mrf.mxu1 }
 0x1a9   : > { %v1349_v18 = vadd.f32 %v1348_v42, %v1260_v52  ;;  %v1174_v46 = vadd.f32 %v1173_v63, %v2432_v23 }
 0x1aa   : > { %v1440_v54 = vpop.f32.mrf.mxu0 }
 0x1ab   : > { %v1438_v0 = vadd.f32 %v1437_v60, %v1349_v18 }
 0x1ad   : > { %1483 = vst [vmem:[%s2553_s23 + $0xb8] sm:$0xff] %v1438_v0 }
 0x1ae   : > { %v1262_v1 = vpop.f32.mrf.mxu2 }
 0x1af   : > { %v1263_v5 = vadd.f32 %v1262_v1, %v1174_v46  ;;  %v1351_v26 = vpop.f32.mrf.mxu3 }
 0x1b0   : > { %v1175_v6 = vpop.f32.mrf.mxu1 }
 0x1b1   : > { %v1352_v9 = vadd.f32 %v1351_v26, %v1263_v5  ;;  %v1176_v3 = vadd.f32 %v1175_v6, %v2451_v40 }
 0x1b2   : > { %v1442_v8 = vpop.f32.mrf.mxu0 }
 0x1b3   : > { %v1441_v21 = vadd.f32 %v1440_v54, %v1352_v9 }
 0x1b5   : > { %1484 = vst [vmem:[%s2553_s23 + $0xc0] sm:$0xff] %v1441_v21 }
 0x1b6   : > { %v1264_v13 = vpop.f32.mrf.mxu2 }
 0x1b7   : > { %v1265_v16 = vadd.f32 %v1264_v13, %v1176_v3  ;;  %v1353_v17 = vpop.f32.mrf.mxu3 }
 0x1b8   : > { %v1178_v20 = vpop.f32.mrf.mxu1 }
 0x1b9   : > { %v1354_v7 = vadd.f32 %v1353_v17, %v1265_v16  ;;  %v1179_v23 = vadd.f32 %v1178_v20, %v2463_v49 }
 0x1ba   : > { %v1445_v25 = vpop.f32.mrf.mxu0 }
 0x1bb   : > { %v1443_v22 = vadd.f32 %v1442_v8, %v1354_v7 }
 0x1bd   : > { %1485 = vst [vmem:[%s2553_s23 + $0xc8] sm:$0xff] %v1443_v22 }
 0x1be   : > { %v1267_v36 = vpop.f32.mrf.mxu2 }
 0x1bf   : > { %v1268_v45 = vadd.f32 %v1267_v36, %v1179_v23  ;;  %v1356_v24 = vpop.f32.mrf.mxu3 }
 0x1c0   : > { %v1180_v27 = vpop.f32.mrf.mxu1 }
 0x1c1   : > { %v1357_v28 = vadd.f32 %v1356_v24, %v1268_v45  ;;  %v1181_v40 = vadd.f32 %v1180_v27, %v2482_v2 }
 0x1c2   : > { %v1447_v29 = vpop.f32.mrf.mxu0 }
 0x1c3   : > { %v1446_v30 = vadd.f32 %v1445_v25, %v1357_v28 }
 0x1c5   : > { %1486 = vst [vmem:[%s2553_s23 + $0xd0] sm:$0xff] %v1446_v30 }
 0x1c6   : > { %v1269_v19 = vpop.f32.mrf.mxu2 }
 0x1c7   : > { %v1270_v47 = vadd.f32 %v1269_v19, %v1181_v40  ;;  %v1358_v32 = vpop.f32.mrf.mxu3 }
 0x1c8   : > { %v1183_v4 = vpop.f32.mrf.mxu1 }
 0x1c9   : > { %v1359_v14 = vadd.f32 %v1358_v32, %v1270_v47  ;;  %v1184_v49 = vadd.f32 %v1183_v4, %v2494_v12 }
 0x1ca   : > { %v1450_v33 = vpop.f32.mrf.mxu0 }
 0x1cb   : > { %v1448_v55 = vadd.f32 %v1447_v29, %v1359_v14 }
 0x1cd   : > { %1487 = vst [vmem:[%s2553_s23 + $0xd8] sm:$0xff] %v1448_v55 }
 0x1ce   : > { %v1272_v34 = vpop.f32.mrf.mxu2 }
 0x1cf   : > { %v1273_v37 = vadd.f32 %v1272_v34, %v1184_v49  ;;  %v1361_v62 = vpop.f32.mrf.mxu3 }
 0x1d0   : > { %v1185_v38 = vpop.f32.mrf.mxu1 }
 0x1d1   : > { %v1362_v44 = vadd.f32 %v1361_v62, %v1273_v37  ;;  %v1186_v2 = vadd.f32 %v1185_v38, %v2513_v35 }
 0x1d2   : > { %v1452_v43 = vpop.f32.mrf.mxu0 }
 0x1d3   : > { %v1451_v39 = vadd.f32 %v1450_v33, %v1362_v44 }
 0x1d5   : > { %1488 = vst [vmem:[%s2553_s23 + $0xe0] sm:$0xff] %v1451_v39 }
 0x1d6   : > { %v1274_v48 = vpop.f32.mrf.mxu2 }
 0x1d7   : > { %v1275_v53 = vadd.f32 %v1274_v48, %v1186_v2  ;;  %v1363_v15 = vpop.f32.mrf.mxu3 }
 0x1d8   : > { %v1188_v10 = vpop.f32.mrf.mxu1 }
 0x1d9   : > { %v1364_v56 = vadd.f32 %v1363_v15, %v1275_v53  ;;  %v1189_v12 = vadd.f32 %v1188_v10, %v2525_v50 }
 0x1da   : > { %v1455_v60 = vpop.f32.mrf.mxu0 }
 0x1db   : > { %v1453_v57 = vadd.f32 %v1452_v43, %v1364_v56 }
 0x1dd   : > { %1489 = vst [vmem:[%s2553_s23 + $0xe8] sm:$0xff] %v1453_v57 }
 0x1de   : > { %v1277_v58 = vpop.f32.mrf.mxu2 }
 0x1df   : > { %v1278_v59 = vadd.f32 %v1277_v58, %v1189_v12  ;;  %v1366_v41 = vpop.f32.mrf.mxu3 }
 0x1e0   : > { %v1190_v31 = vpop.f32.mrf.mxu1 }
 0x1e1   : > { %v1367_v61 = vadd.f32 %v1366_v41, %v1278_v59  ;;  %v1191_v35 = vadd.f32 %v1190_v31, %v2544_v11 }
 0x1e2   : > { %v1457_v54 = vpop.f32.mrf.mxu0 }
 0x1e3   : > { %v1456_v51 = vadd.f32 %v1455_v60, %v1367_v61 }
 0x1e5   : > { %1490 = vst [vmem:[%s2553_s23 + $0xf0] sm:$0xff] %v1456_v51 }
 0x1e6   : > { %v1279_v52 = vpop.f32.mrf.mxu2 }
 0x1e7   : > { %v1280_v42 = vadd.f32 %v1279_v52, %v1191_v35  ;;  %v1368_v63 = vpop.f32.mrf.mxu3 }
 0x1e9   : > { %v1369_v18 = vadd.f32 %v1368_v63, %v1280_v42 }
 0x1eb   : > { %v1458_v0 = vadd.f32 %v1457_v54, %v1369_v18 }
 0x1ed   : > { %1491 = vst [vmem:[%s2553_s23 + $0xf8] sm:$0xff] %v1458_v0 }
 0x1ee PF: > { %s13_s12 = sadd.s32 1, %s2195_s12  }
 0x1ef   : > { %p10_p4 = scmp.ge.s32.totalorder %s13_s12, 4  }
 0x1f1   :  { %12 = sbr.rel (!%p10_p4) target bundleno = 1 (0x1), region = 62 }

</bundles_post_ra>
